<compile_context>
chip_gen: v7x
topology: tpu7x:2x2x1
jax: 0.10.0
libtpu: 0.0.40
codegen_flags: <defaults>
</compile_context>

<pallas_src>
import functools

import jax
import jax.numpy as jnp
from jax import lax
from jax.experimental import pallas as pl
from jax.experimental.pallas import tpu as pltpu


def _attn_kernel(inv_ref, q_ref, k_ref, v_ref, *rest, keep_scale: float,
                 has_mask: bool):
    """One grid step = G heads.

    Blocks: inv (G,1,1) f32, q (G,Sq,D), k (G,Sk,D), v (G,Sk,Dv),
            [mask (G,Sq,Sk) f32 in {0,1}], out (G,Sq,Dv).
    """
    if has_mask:
        mask_ref, o_ref = rest
    else:
        (o_ref,) = rest

    # Fold the per-head divisor into q:  (q * (1/inv)) @ k^T == (q @ k^T) / inv
    scale = 1.0 / inv_ref[...].astype(jnp.float32)            # (G,1,1)
    q = q_ref[...].astype(jnp.float32) * scale                 # (G,Sq,D) f32

    # bf16 MXU operands, f32 accumulation; contract D-with-D (no k transpose).
    qb = q.astype(jnp.bfloat16)
    kb = k_ref[...].astype(jnp.bfloat16)
    s = lax.dot_general(qb, kb, (((2,), (2,)), ((0,), (0,))),
                        preferred_element_type=jnp.float32)    # (G,Sq,Sk)

    # Numerically stable softmax over the last dim (f32 vector path).
    m = jnp.max(s, axis=-1, keepdims=True)
    e = jnp.exp(s - m)
    denom = jnp.sum(e, axis=-1, keepdims=True)                 # (G,Sq,1)
    # Fold the dropout keep-scale 1/(1-p) into the per-row normalization.
    p_mat = e * (keep_scale / denom)                           # (G,Sq,Sk)

    if has_mask:
        p_mat = p_mat * mask_ref[...]                          # {0,1} keep mask

    pb = p_mat.astype(jnp.bfloat16)
    vb = v_ref[...].astype(jnp.bfloat16)
    out = lax.dot_general(pb, vb, (((2,), (1,)), ((0,), (0,))),
                          preferred_element_type=jnp.float32)  # (G,Sq,Dv)
    o_ref[...] = out.astype(o_ref.dtype)


def _pick_heads_per_step(BH, Sq, Sk, D, Dv, use_mask, budget_bytes=16 << 20):
    """Largest divisor of BH whose per-step footprint fits a conservative
    VMEM budget (double-buffered inputs/outputs + f32 score intermediates)."""
    per_head = 4 * (Sq * D + Sk * D + Sk * Dv + Sq * Dv)
    if use_mask:
        per_head += 4 * Sq * Sk
    per_head = 2 * per_head + 8 * Sq * Sk
    best = 1
    for g in range(1, BH + 1):
        if BH % g == 0 and g * per_head <= budget_bytes:
            best = g
    return best


def sdpa_with_dropout(query, key, value, inv_scale_factor, *,
                      dropout_p: float, rng_key=None, heads_per_step=None):
    B, H, Sq, D = query.shape
    Sk = key.shape[2]
    Dv = value.shape[3]
    BH = B * H

    # F.dropout(p=1.0) zeroes everything (and 1/(1-p) is inf): short-circuit.
    if dropout_p >= 1.0:
        return jnp.zeros((B, H, Sq, Dv), dtype=query.dtype)

    q = query.reshape(BH, Sq, D)
    k = key.reshape(BH, Sk, D)
    v = value.reshape(BH, Sk, Dv)

    # (1, H, 1, 1) -> per-(B*H) scalar, shaped (BH, 1, 1) for easy broadcast.
    inv = jnp.broadcast_to(
        inv_scale_factor.reshape(1, H, 1, 1).astype(jnp.float32),
        (B, H, 1, 1)).reshape(BH, 1, 1)

    use_mask = dropout_p > 0.0
    keep_scale = 1.0 / (1.0 - dropout_p) if use_mask else 1.0

    if heads_per_step is None:
        heads_per_step = _pick_heads_per_step(BH, Sq, Sk, D, Dv, use_mask)
    G = heads_per_step
    assert BH % G == 0, (BH, G)

    in_specs = [
        pl.BlockSpec((G, 1, 1), lambda i: (i, 0, 0)),    # inv scale (per head)
        pl.BlockSpec((G, Sq, D), lambda i: (i, 0, 0)),   # query
        pl.BlockSpec((G, Sk, D), lambda i: (i, 0, 0)),   # key
        pl.BlockSpec((G, Sk, Dv), lambda i: (i, 0, 0)),  # value
    ]
    args = [inv, q, k, v]

    if use_mask:
        if rng_key is None:
            rng_key = jax.random.PRNGKey(0)
        keep = jax.random.bernoulli(rng_key, p=1.0 - dropout_p,
                                    shape=(BH, Sq, Sk))
        args.append(keep.astype(jnp.float32))
        in_specs.append(pl.BlockSpec((G, Sq, Sk), lambda i: (i, 0, 0)))

    kernel = functools.partial(_attn_kernel,
                               keep_scale=float(keep_scale),
                               has_mask=use_mask)

    out = pl.pallas_call(
        kernel,
        out_shape=jax.ShapeDtypeStruct((BH, Sq, Dv), query.dtype),
        grid=(BH // G,),
        in_specs=in_specs,
        out_specs=pl.BlockSpec((G, Sq, Dv), lambda i: (i, 0, 0)),
        compiler_params=pltpu.CompilerParams(
            dimension_semantics=("parallel",)),
    )(*args)

    return out.reshape(B, H, Sq, Dv)


if __name__ == "__main__":
    # Small shapes consistent with the module's attention pattern.
    B, H, Sq, Sk, D, Dv = 1, 8, 128, 128, 64, 64
    dropout_p = 0.5

    root = jax.random.PRNGKey(0)
    k_q, k_k, k_v, k_s, k_d = jax.random.split(root, 5)

    query = jax.random.normal(k_q, (B, H, Sq, D), dtype=jnp.float32)
    key_t = jax.random.normal(k_k, (B, H, Sk, D), dtype=jnp.float32)
    value = jax.random.normal(k_v, (B, H, Sk, Dv), dtype=jnp.float32)
    inv_scale_factor = jax.random.normal(k_s, (1, H, 1, 1), dtype=jnp.float32)

    out = sdpa_with_dropout(query, key_t, value, inv_scale_factor,
                            dropout_p=dropout_p, rng_key=k_d)
    out = jax.block_until_ready(out)

    assert out.shape == (B, H, Sq, Dv), out.shape
    assert bool(jnp.all(jnp.isfinite(out)))
    print("KERNEL_OK")
</pallas_src>

<mosaic_0001>
module attributes {stable_mosaic.version = 11 : i64} {
  func.func @_attn_kernel(%arg0: i32, %arg1: memref<8x1x1xf32, #tpu.memory_space<vmem>>, %arg2: memref<8x128x64xf32, #tpu.memory_space<vmem>>, %arg3: memref<8x128x64xf32, #tpu.memory_space<vmem>>, %arg4: memref<8x128x64xf32, #tpu.memory_space<vmem>>, %arg5: memref<8x128x128xf32, #tpu.memory_space<vmem>>, %arg6: memref<8x128x64xf32, #tpu.memory_space<vmem>>) attributes {dimension_semantics = [#tpu.dimension_semantics<parallel>], iteration_bounds = array<i64: 1>, scalar_prefetch = 0 : i64, scratch_operands = 0 : i64, tpu.core_type = #tpu.core_type<tc>, window_params = [{transform_indices = @transform_0, window_bounds = array<i64: 8, 1, 1>}, {transform_indices = @transform_1, window_bounds = array<i64: 8, 128, 64>}, {transform_indices = @transform_2, window_bounds = array<i64: 8, 128, 64>}, {transform_indices = @transform_3, window_bounds = array<i64: 8, 128, 64>}, {transform_indices = @transform_4, window_bounds = array<i64: 8, 128, 128>}, {transform_indices = @transform_5, window_bounds = array<i64: 8, 128, 64>}]} {
    %c0 = arith.constant 0 : index
    %c0_0 = arith.constant 0 : index
    %c0_1 = arith.constant 0 : index
    %0 = vector.load %arg1[%c0, %c0_0, %c0_1] : memref<8x1x1xf32, #tpu.memory_space<vmem>>, vector<8x1x1xf32>
    %cst = arith.constant 1.000000e+00 : f32
    %1 = vector.broadcast %cst : f32 to vector<8x1x1xf32>
    %2 = arith.divf %1, %0 : vector<8x1x1xf32>
    %c0_2 = arith.constant 0 : index
    %c0_3 = arith.constant 0 : index
    %c0_4 = arith.constant 0 : index
    %3 = vector.load %arg2[%c0_2, %c0_3, %c0_4] : memref<8x128x64xf32, #tpu.memory_space<vmem>>, vector<8x128x64xf32>
    %4 = vector.broadcast %2 : vector<8x1x1xf32> to vector<8x128x64xf32>
    %5 = arith.mulf %3, %4 : vector<8x128x64xf32>
    %6 = arith.truncf %5 : vector<8x128x64xf32> to vector<8x128x64xbf16>
    %c0_5 = arith.constant 0 : index
    %c0_6 = arith.constant 0 : index
    %c0_7 = arith.constant 0 : index
    %7 = vector.load %arg3[%c0_5, %c0_6, %c0_7] : memref<8x128x64xf32, #tpu.memory_space<vmem>>, vector<8x128x64xf32>
    %8 = arith.truncf %7 : vector<8x128x64xf32> to vector<8x128x64xbf16>
    %cst_8 = arith.constant dense<0.000000e+00> : vector<8x128x128xf32>
    %9 = tpu.matmul %6, %8, %cst_8 {dimension_numbers = #tpu.dot_dimension_numbers<[2], [2], [1], [1], [0, 0, 0, 1, 1, 1], [0], [0]>} : vector<8x128x64xbf16>, vector<8x128x64xbf16>, vector<8x128x128xf32> -> vector<8x128x128xf32>
    %cst_9 = arith.constant dense<0xFF800000> : vector<8x128xf32>
    %10 = vector.multi_reduction <maximumf>, %9, %cst_9 [2] : vector<8x128x128xf32> to vector<8x128xf32>
    %11 = vector.shape_cast %10 : vector<8x128xf32> to vector<8x128x1xf32>
    %12 = vector.broadcast %11 : vector<8x128x1xf32> to vector<8x128x128xf32>
    %13 = arith.subf %9, %12 : vector<8x128x128xf32>
    %14 = math.exp %13 : vector<8x128x128xf32>
    %cst_10 = arith.constant dense<0.000000e+00> : vector<8x128xf32>
    %15 = vector.multi_reduction <add>, %14, %cst_10 [2] : vector<8x128x128xf32> to vector<8x128xf32>
    %16 = vector.shape_cast %15 : vector<8x128xf32> to vector<8x128x1xf32>
    %cst_11 = arith.constant 2.000000e+00 : f32
    %17 = vector.broadcast %cst_11 : f32 to vector<8x128x1xf32>
    %18 = arith.divf %17, %16 : vector<8x128x1xf32>
    %19 = vector.broadcast %18 : vector<8x128x1xf32> to vector<8x128x128xf32>
    %20 = arith.mulf %14, %19 : vector<8x128x128xf32>
    %c0_12 = arith.constant 0 : index
    %c0_13 = arith.constant 0 : index
    %c0_14 = arith.constant 0 : index
    %21 = vector.load %arg5[%c0_12, %c0_13, %c0_14] : memref<8x128x128xf32, #tpu.memory_space<vmem>>, vector<8x128x128xf32>
    %22 = arith.mulf %20, %21 : vector<8x128x128xf32>
    %23 = arith.truncf %22 : vector<8x128x128xf32> to vector<8x128x128xbf16>
    %c0_15 = arith.constant 0 : index
    %c0_16 = arith.constant 0 : index
    %c0_17 = arith.constant 0 : index
    %24 = vector.load %arg4[%c0_15, %c0_16, %c0_17] : memref<8x128x64xf32, #tpu.memory_space<vmem>>, vector<8x128x64xf32>
    %25 = arith.truncf %24 : vector<8x128x64xf32> to vector<8x128x64xbf16>
    %cst_18 = arith.constant dense<0.000000e+00> : vector<8x128x64xf32>
    %26 = tpu.matmul %23, %25, %cst_18 {dimension_numbers = #tpu.dot_dimension_numbers<[2], [1], [1], [2], [0, 0, 0, 1, 1, 2], [0], [0]>} : vector<8x128x128xbf16>, vector<8x128x64xbf16>, vector<8x128x64xf32> -> vector<8x128x64xf32>
    %c0_19 = arith.constant 0 : index
    %c0_20 = arith.constant 0 : index
    %c0_21 = arith.constant 0 : index
    %27 = vector.load %arg6[%c0_19, %c0_20, %c0_21] : memref<8x128x64xf32, #tpu.memory_space<vmem>>, vector<8x128x64xf32>
    tpu.vector_store %arg6[%c0_19, %c0_20, %c0_21], %26 {strides = array<i32>} : memref<8x128x64xf32, #tpu.memory_space<vmem>>, vector<8x128x64xf32>,
    return
  }
  func.func @transform_0(%arg0: i32) -> (i32, i32, i32) {
    %c0_i32 = arith.constant 0 : i32
    %c0_i32_0 = arith.constant 0 : i32
    %c0_i32_1 = arith.constant 0 : i32
    return %arg0, %c0_i32, %c0_i32_0 : i32, i32, i32
  }
  func.func @transform_1(%arg0: i32) -> (i32, i32, i32) {
    %c0_i32 = arith.constant 0 : i32
    %c0_i32_0 = arith.constant 0 : i32
    %c0_i32_1 = arith.constant 0 : i32
    return %arg0, %c0_i32, %c0_i32_0 : i32, i32, i32
  }
  func.func @transform_2(%arg0: i32) -> (i32, i32, i32) {
    %c0_i32 = arith.constant 0 : i32
    %c0_i32_0 = arith.constant 0 : i32
    %c0_i32_1 = arith.constant 0 : i32
    return %arg0, %c0_i32, %c0_i32_0 : i32, i32, i32
  }
  func.func @transform_3(%arg0: i32) -> (i32, i32, i32) {
    %c0_i32 = arith.constant 0 : i32
    %c0_i32_0 = arith.constant 0 : i32
    %c0_i32_1 = arith.constant 0 : i32
    return %arg0, %c0_i32, %c0_i32_0 : i32, i32, i32
  }
  func.func @transform_4(%arg0: i32) -> (i32, i32, i32) {
    %c0_i32 = arith.constant 0 : i32
    %c0_i32_0 = arith.constant 0 : i32
    %c0_i32_1 = arith.constant 0 : i32
    return %arg0, %c0_i32, %c0_i32_0 : i32, i32, i32
  }
  func.func @transform_5(%arg0: i32) -> (i32, i32, i32) {
    %c0_i32 = arith.constant 0 : i32
    %c0_i32_0 = arith.constant 0 : i32
    %c0_i32_1 = arith.constant 0 : i32
    return %arg0, %c0_i32, %c0_i32_0 : i32, i32, i32
  }
}

</mosaic_0001>

<bundles_post_ra>
// kernel: tpu_custom_call.1
= control target key start
LH: loop header
LB: loop body
LE: loop exit
PB: predicated region body
PF: predicated region fallthrough
CT: control target
= control target key end

     0   :  { %v5917_v0 = vmov 0   ;;  %v181_v2 = vlaneseq  ;;  %vm629_vm0 = vcmask 523264   ;;  %s9976_s0 = inlined_call_operand.vmem [shape: f32[8,1,1], index: 0, kind: input, shape index: {}]   ;;  %s9977_s2 = inlined_call_operand.vmem [shape: f32[8,128,64], index: 2, kind: input, shape index: {}]   ;;  %s9978_s1 = inlined_call_operand.vmem [shape: f32[8,128,64], index: 1, kind: input, shape index: {}]   ;;  %s9979_s3 = inlined_call_operand.vmem [shape: f32[8,128,64], index: 3, kind: input, shape index: {}]   ;;  %s9980_s4 = inlined_call_operand.vmem [shape: f32[8,128,128], index: 4, kind: input, shape index: {}]   ;;  %s9981_s5 = inlined_call_operand.vmem [shape: f32[8,128,64], index: 5, kind: output, shape index: {}]  }
   0x1   :  { %5387 = vset.pattern.permute.xlu0 %v5917_v0  ;;  %v21_v1 = vld [vmem:[%s9976_s0] sm:$0x1]  ;;  %v22_v3 = vld [vmem:[%s9976_s0 + $0x1] sm:$0x1]  ;;  %5388 = vset.pattern.permute.xlu1 %v5917_v0  ;;  %v25_v4 = vld [vmem:[%s9976_s0 + $0x4] sm:$0x1] }
   0x2   :  { %5389 = vrcp.f32 %v21_v1  ;;  %v437_v5 = vld [vmem:[%s9977_s2] sm:$0xff]  ;;  %v438_v8 = vld [vmem:[%s9977_s2 + $0x8] sm:$0xff]  ;;  %v182_v11 = vshrl.u32 %v181_v2, 7  ;;  %v439_v14 = vld [vmem:[%s9977_s2 + $0x10] sm:$0xff] }
   0x3   :  { %5391 = vrcp.f32 %v22_v3  ;;  %v23_v6 = vld [vmem:[%s9976_s0 + $0x2] sm:$0x1]  ;;  %v24_v7 = vld [vmem:[%s9976_s0 + $0x3] sm:$0x1]  ;;  %v454_v10 = vld [vmem:[%s9977_s2 + $0x88] sm:$0xff]  ;;  %v565_v12 = vpack.c.bf16 %v438_v8, %v437_v5 }
   0x4   :  { %v453_v9 = vld [vmem:[%s9977_s2 + $0x80] sm:$0xff]  ;;  %5393 = vrcp.f32 %v25_v4  ;;  %v440_v15 = vld [vmem:[%s9977_s2 + $0x18] sm:$0xff]  ;;  %v455_v16 = vld [vmem:[%s9977_s2 + $0x90] sm:$0xff]  ;;  %v183_v24 = vsub.s32 0, %v182_v11 }
   0x5   :  { %v573_v13 = vpack.c.bf16 %v454_v10, %v453_v9  ;;  %v27_v17 = vld [vmem:[%s9976_s0 + $0x6] sm:$0x1]  ;;  %5395 = vrcp.f32 %v23_v6  ;;  %v566_v18 = vpack.c.bf16 %v440_v15, %v439_v14  ;;  %v456_v19 = vld [vmem:[%s9977_s2 + $0x98] sm:$0xff]  ;;  %v26_v20 = vld [vmem:[%s9976_s0 + $0x5] sm:$0x1]  ;;  %5322 = vmatprep.subr.msk.bf16.mxu0 %vm629_vm0, %v565_v12  ;;  %v655_v21 = vsel %vm629_vm0, %v565_v12, 0 }
   0x6   :  { %5397 = vrcp.f32 %v24_v7  ;;  %v574_v23 = vpack.c.bf16 %v456_v19, %v455_v16  ;;  %4811 = vmatpush3.bf16.xpose.msra.mxu0 %v655_v21  ;;  %v441_v25 = vld [vmem:[%s9977_s2 + $0x20] sm:$0xff]  ;;  %v442_v26 = vld [vmem:[%s9977_s2 + $0x28] sm:$0xff]  ;;  %v443_v42 = vld [vmem:[%s9977_s2 + $0x30] sm:$0xff] }
   0x7   :  { %5330 = vmatprep.subr.msk.bf16.mxu1 %vm629_vm0, %v573_v13  ;;  %v800_v22 = vsel %vm629_vm0, %v573_v13, 0  ;;  %5399 = vrcp.f32 %v27_v17  ;;  %5323 = vmatprep.subr.msk.bf16.mxu0 %vm629_vm0, %v566_v18  ;;  %v457_v27 = vld [vmem:[%s9977_s2 + $0xa0] sm:$0xff]  ;;  %v458_v28 = vld [vmem:[%s9977_s2 + $0xa8] sm:$0xff]  ;;  %v658_v31 = vsel %vm629_vm0, %v566_v18, 0  ;;  %v567_v35 = vpack.c.bf16 %v442_v26, %v441_v25  ;;  %v444_v43 = vld [vmem:[%s9977_s2 + $0x38] sm:$0xff] }
   0x8   :  { %4843 = vmatpush3.bf16.xpose.msra.mxu1 %v800_v22  ;;  %5401 = vrcp.f32 %v26_v20  ;;  %v28_v29 = vld [vmem:[%s9976_s0 + $0x7] sm:$0x1]  ;;  %v803_v34 = vsel %vm629_vm0, %v574_v23, 0  ;;  %v575_v36 = vpack.c.bf16 %v458_v28, %v457_v27  ;;  %v459_v44 = vld [vmem:[%s9977_s2 + $0xb0] sm:$0xff]  ;;  %v460_v45 = vld [vmem:[%s9977_s2 + $0xb8] sm:$0xff]  ;;  %v568_v52 = vpack.c.bf16 %v444_v43, %v443_v42 }
   0x9   :  { %5331 = vmatprep.subr.msk.bf16.mxu1 %vm629_vm0, %v574_v23  ;;  %5403 = vrcp.f32 %v28_v29  ;;  %v661_v50 = vsel %vm629_vm0, %v567_v35, 0  ;;  %v576_v53 = vpack.c.bf16 %v460_v45, %v459_v44  ;;  %v445_v57 = vld [vmem:[%s9977_s2 + $0x40] sm:$0xff]  ;;  %v446_v58 = vld [vmem:[%s9977_s2 + $0x48] sm:$0xff]  ;;  %v447_v2 = vld [vmem:[%s9977_s2 + $0x50] sm:$0xff] }
   0xa   :  { %v806_v51 = vsel %vm629_vm0, %v575_v36, 0  ;;  %v461_v59 = vld [vmem:[%s9977_s2 + $0xc0] sm:$0xff]  ;;  %v462_v60 = vld [vmem:[%s9977_s2 + $0xc8] sm:$0xff]  ;;  %v664_v62 = vsel %vm629_vm0, %v568_v52, 0  ;;  %v569_v0 = vpack.c.bf16 %v446_v58, %v445_v57  ;;  %v448_v3 = vld [vmem:[%s9977_s2 + $0x58] sm:$0xff] }
   0xb   :  { %v809_v63 = vsel %vm629_vm0, %v576_v53, 0  ;;  %v577_v1 = vpack.c.bf16 %v462_v60, %v461_v59  ;;  %v463_v4 = vld [vmem:[%s9977_s2 + $0xd0] sm:$0xff]  ;;  %v464_v5 = vld [vmem:[%s9977_s2 + $0xd8] sm:$0xff]  ;;  %v570_v8 = vpack.c.bf16 %v448_v3, %v447_v2  ;;  %v449_v10 = vld [vmem:[%s9977_s2 + $0x60] sm:$0xff] }
   0xc   :  { %v5390_v30 = vpop.eup %5389  ;;  %v667_v6 = vsel %vm629_vm0, %v569_v0, 0  ;;  %v578_v9 = vpack.c.bf16 %v464_v5, %v463_v4  ;;  %v450_v11 = vld [vmem:[%s9977_s2 + $0x68] sm:$0xff]  ;;  %v465_v12 = vld [vmem:[%s9977_s2 + $0xe0] sm:$0xff]  ;;  %v451_v18 = vld [vmem:[%s9977_s2 + $0x70] sm:$0xff] }
   0xd   :  { %v5392_v32 = vpop.eup %5391  ;;  %v184_v33 = vrot.slane %v5390_v30, %v183_v24  ;;  %v812_v7 = vsel %vm629_vm0, %v577_v1, 0  ;;  %v466_v13 = vld [vmem:[%s9977_s2 + $0xe8] sm:$0xff]  ;;  %v670_v14 = vsel %vm629_vm0, %v570_v8, 0  ;;  %v571_v16 = vpack.c.bf16 %v450_v11, %v449_v10  ;;  %v452_v19 = vld [vmem:[%s9977_s2 + $0x78] sm:$0xff]  ;;  %v467_v20 = vld [vmem:[%s9977_s2 + $0xf0] sm:$0xff] }
   0xe   :  { %v5394_v37 = vpop.eup %5393  ;;  %v188_v38 = vrot.slane %v5392_v32, %v183_v24  ;;  %4813 = vmatpush3.bf16.xpose.msra.mxu0 %v658_v31  ;;  %v815_v15 = vsel %vm629_vm0, %v578_v9, 0  ;;  %v579_v17 = vpack.c.bf16 %v466_v13, %v465_v12  ;;  %v468_v21 = vld [vmem:[%s9977_s2 + $0xf8] sm:$0xff]  ;;  %v469_v26 = vld [vmem:[%s9977_s2 + $0x100] sm:$0xff]  ;;  %v470_v27 = vld [vmem:[%s9977_s2 + $0x108] sm:$0xff] }
   0xf   :  { %214 = vperm.xlu0 %5387, %v184_v33   ;;  %v5396_v39 = vpop.eup %5395  ;;  %5324 = vmatprep.subr.msk.bf16.mxu0 %vm629_vm0, %v567_v35  ;;  %v200_v47 = vrot.slane %v5394_v37, %v183_v24  ;;  %v673_v22 = vsel %vm629_vm0, %v571_v16, 0  ;;  %v580_v25 = vpack.c.bf16 %v468_v21, %v467_v20  ;;  %v485_v28 = vld [vmem:[%s9977_s2 + $0x180] sm:$0xff]  ;;  %v486_v29 = vld [vmem:[%s9977_s2 + $0x188] sm:$0xff]  ;;  %v581_v32 = vpack.c.bf16 %v470_v27, %v469_v26  ;;  %v48_v37 = vld [vmem:[%s9978_s1 + $0x18] sm:$0xff] }
  0x10   :  { %4845 = vmatpush3.bf16.xpose.msra.mxu1 %v803_v34  ;;  %v5398_v40 = vpop.eup %5397  ;;  %v192_v41 = vrot.slane %v5396_v39, %v183_v24  ;;  %v818_v23 = vsel %vm629_vm0, %v579_v17, 0  ;;  %v589_v33 = vpack.c.bf16 %v486_v29, %v485_v28  ;;  %v45_v34 = vld [vmem:[%s9978_s1] sm:$0xff]  ;;  %v46_v35 = vld [vmem:[%s9978_s1 + $0x8] sm:$0xff]  ;;  %v52_v2 = vld [vmem:[%s9978_s1 + $0x38] sm:$0xff] }
  0x11   :  { %5332 = vmatprep.subr.msk.bf16.mxu1 %vm629_vm0, %v575_v36  ;;  %v5400_v46 = vpop.eup %5399  ;;  %v196_v48 = vrot.slane %v5398_v40, %v183_v24  ;;  %v821_v31 = vsel %vm629_vm0, %v580_v25, 0  ;;  %v47_v36 = vld [vmem:[%s9978_s1 + $0x10] sm:$0xff]  ;;  %v50_v39 = vld [vmem:[%s9978_s1 + $0x28] sm:$0xff]  ;;  %v61_v45 = vld [vmem:[%s9978_s1 + $0x80] sm:$0xff]  ;;  %v945_v58 = vsel %vm629_vm0, %v581_v32, 0 }
  0x12   :  { %222 = vperm.xlu1 %5388, %v192_v41   ;;  %v5402_v49 = vpop.eup %5401  ;;  %v208_v54 = vrot.slane %v5400_v46, %v183_v24  ;;  %v471_v46 = vld [vmem:[%s9977_s2 + $0x110] sm:$0xff]  ;;  %v488_v4 = vld [vmem:[%s9977_s2 + $0x198] sm:$0xff]  ;;  %v1090_v11 = vsel %vm629_vm0, %v589_v33, 0  ;;  %v473_v20 = vld [vmem:[%s9977_s2 + $0x120] sm:$0xff] }
  0x13   :  { %218 = vperm.xlu0 %5387, %v188_v38   ;;  %v204_v55 = vrot.slane %v5402_v49, %v183_v24  ;;  %v5404_v56 = vpop.eup %5403  ;;  %v49_v38 = vld [vmem:[%s9978_s1 + $0x20] sm:$0xff]  ;;  %v487_v3 = vld [vmem:[%s9977_s2 + $0x190] sm:$0xff]  ;;  %v474_v21 = vld [vmem:[%s9977_s2 + $0x128] sm:$0xff] }
  0x14   :  { %v212_v61 = vrot.slane %v5404_v56, %v183_v24  ;;  %v572_v24 = vpack.c.bf16 %v452_v19, %v451_v18  ;;  %v66_v56 = vld [vmem:[%s9978_s1 + $0xa8] sm:$0xff]  ;;  %v68_v19 = vld [vmem:[%s9978_s1 + $0xb8] sm:$0xff]  ;;  %v583_v28 = vpack.c.bf16 %v474_v21, %v473_v20  ;;  %v55_v29 = vld [vmem:[%s9978_s1 + $0x50] sm:$0xff] }
  0x16   :  { %226 = vperm.xlu1 %5388, %v196_v48   ;;  %4815 = vmatpush3.bf16.xpose.msra.mxu0 %v661_v50  ;;  %v676_v30 = vsel %vm629_vm0, %v572_v24, 0  ;;  %v62_v50 = vld [vmem:[%s9978_s1 + $0x88] sm:$0xff] }
  0x17   :  { %230 = vperm.xlu0 %5387, %v200_v47   ;;  %5325 = vmatprep.subr.msk.bf16.mxu0 %vm629_vm0, %v568_v52  ;;  %v472_v47 = vld [vmem:[%s9977_s2 + $0x118] sm:$0xff] }
  0x18   :  { %4847 = vmatpush3.bf16.xpose.msra.mxu1 %v806_v51  ;;  %v63_v51 = vld [vmem:[%s9978_s1 + $0x90] sm:$0xff]  ;;  %v64_v52 = vld [vmem:[%s9978_s1 + $0x98] sm:$0xff]  ;;  %v582_v60 = vpack.c.bf16 %v472_v47, %v471_v46 }
  0x19   :  { %5333 = vmatprep.subr.msk.bf16.mxu1 %vm629_vm0, %v576_v53 }
  0x1a   :  { %234 = vperm.xlu1 %5388, %v204_v55   ;;  %v65_v55 = vld [vmem:[%s9978_s1 + $0xa0] sm:$0xff] }
  0x1b   :  { %238 = vperm.xlu0 %5387, %v208_v54  }
  0x1e   :  { %242 = vperm.xlu1 %5388, %v212_v61   ;;  %4817 = vmatpush3.bf16.xpose.msra.mxu0 %v664_v62  ;;  %v51_v61 = vld [vmem:[%s9978_s1 + $0x30] sm:$0xff] }
  0x1f   :  { %5326 = vmatprep.subr.msk.bf16.mxu0 %vm629_vm0, %v569_v0 }
  0x20   :  { %4849 = vmatpush3.bf16.xpose.msra.mxu1 %v809_v63 }
  0x21   :  { %5334 = vmatprep.subr.msk.bf16.mxu1 %vm629_vm0, %v577_v1 }
  0x26   :  { %4819 = vmatpush3.bf16.xpose.msra.mxu0 %v667_v6 }
  0x27   :  { %5327 = vmatprep.subr.msk.bf16.mxu0 %vm629_vm0, %v570_v8  ;;  %v54_v8 = vld [vmem:[%s9978_s1 + $0x48] sm:$0xff] }
  0x28   :  { %4851 = vmatpush3.bf16.xpose.msra.mxu1 %v812_v7  ;;  %v53_v7 = vld [vmem:[%s9978_s1 + $0x40] sm:$0xff] }
  0x29   :  { %5335 = vmatprep.subr.msk.bf16.mxu1 %vm629_vm0, %v578_v9 }
  0x2e   :  { %4821 = vmatpush3.bf16.xpose.msra.mxu0 %v670_v14  ;;  %v590_v14 = vpack.c.bf16 %v488_v4, %v487_v3  ;;  %v491_v3 = vld [vmem:[%s9977_s2 + $0x1b0] sm:$0xff]  ;;  %v492_v4 = vld [vmem:[%s9977_s2 + $0x1b8] sm:$0xff] }
  0x2f   :  { %5328 = vmatprep.subr.msk.bf16.mxu0 %vm629_vm0, %v571_v16 }
  0x30   :  { %4853 = vmatpush3.bf16.xpose.msra.mxu1 %v815_v15  ;;  %v67_v15 = vld [vmem:[%s9978_s1 + $0xb0] sm:$0xff] }
  0x31   :  { %5336 = vmatprep.subr.msk.bf16.mxu1 %vm629_vm0, %v579_v17 }
  0x36   :  { %4823 = vmatpush3.bf16.xpose.msra.mxu0 %v673_v22  ;;  %v69_v22 = vld [vmem:[%s9978_s1 + $0xc0] sm:$0xff] }
  0x37   :  { %5329 = vmatprep.subr.msk.bf16.mxu0 %vm629_vm0, %v572_v24  ;;  %v948_v24 = vsel %vm629_vm0, %v582_v60, 0 }
  0x38   :  { %4855 = vmatpush3.bf16.xpose.msra.mxu1 %v818_v23  ;;  %v70_v23 = vld [vmem:[%s9978_s1 + $0xc8] sm:$0xff] }
  0x39   :  { %5337 = vmatprep.subr.msk.bf16.mxu1 %vm629_vm0, %v580_v25 }
  0x3e   :  { %4825 = vmatpush3.bf16.xpose.msra.mxu0 %v676_v30 }
  0x3f   :  { %5338 = vmatprep.subr.msk.bf16.mxu0 %vm629_vm0, %v581_v32 }
  0x40   :  { %4857 = vmatpush3.bf16.xpose.msra.mxu1 %v821_v31 }
  0x41   :  { %5346 = vmatprep.subr.msk.bf16.mxu1 %vm629_vm0, %v589_v33  ;;  %v56_v33 = vld [vmem:[%s9978_s1 + $0x58] sm:$0xff] }
  0x8e   :  { %v6132_v40 = vpop.permute.xlu0 %214 }
  0x8f   :  { %v245_v41 = vmul.f32 %v6132_v40, %v45_v34  ;;  %v246_v42 = vmul.f32 %v6132_v40, %v46_v35  ;;  %v247_v43 = vmul.f32 %v6132_v40, %v47_v36  ;;  %v248_v44 = vmul.f32 %v6132_v40, %v48_v37  ;;  %v489_v34 = vld [vmem:[%s9977_s2 + $0x1a0] sm:$0xff]  ;;  %v490_v35 = vld [vmem:[%s9977_s2 + $0x1a8] sm:$0xff] }
  0x90   :  { %v249_v48 = vmul.f32 %v6132_v40, %v49_v38  ;;  %v250_v49 = vmul.f32 %v6132_v40, %v50_v39  ;;  %v251_v12 = vmul.f32 %v6132_v40, %v51_v61  ;;  %v252_v13 = vmul.f32 %v6132_v40, %v52_v2  ;;  %v57_v36 = vld [vmem:[%s9978_s1 + $0x60] sm:$0xff]  ;;  %v58_v37 = vld [vmem:[%s9978_s1 + $0x68] sm:$0xff]  ;;  %v60_v2 = vld [vmem:[%s9978_s1 + $0x78] sm:$0xff] }
  0x91   :  { %v373_v53 = vpack.c.bf16 %v246_v42, %v245_v41  ;;  %v374_v54 = vpack.c.bf16 %v248_v44, %v247_v43  ;;  %v253_v17 = vmul.f32 %v6132_v40, %v53_v7  ;;  %v254_v18 = vmul.f32 %v6132_v40, %v54_v8  ;;  %v71_v44 = vld [vmem:[%s9978_s1 + $0xd0] sm:$0xff]  ;;  %v77_v61 = vld [vmem:[%s9978_s1 + $0x100] sm:$0xff] }
  0x92   :  { %v6164_v57 = vpop.permute.xlu0 %218  ;;  %v375_v59 = vpack.c.bf16 %v250_v49, %v249_v48  ;;  %v376_v25 = vpack.c.bf16 %v252_v13, %v251_v12  ;;  %v1093_v38 = vsel %vm629_vm0, %v590_v14, 0  ;;  %v255_v41 = vmul.f32 %v6132_v40, %v55_v29  ;;  %v72_v48 = vld [vmem:[%s9978_s1 + $0xd8] sm:$0xff]  ;;  %v475_v49 = vld [vmem:[%s9977_s2 + $0x130] sm:$0xff]  ;;  %v93_v13 = vld [vmem:[%s9978_s1 + $0x180] sm:$0xff] }
  0x93   :  { %4826 = vmatprep.mubr.msk.bf16.mxu0 %vm629_vm0, %v373_v53  ;;  %v261_v62 = vmul.f32 %v6164_v57, %v61_v45  ;;  %v262_v63 = vmul.f32 %v6164_v57, %v62_v50  ;;  %v263_v0 = vmul.f32 %v6164_v57, %v63_v51  ;;  %v264_v1 = vmul.f32 %v6164_v57, %v64_v52  ;;  %v476_v50 = vld [vmem:[%s9977_s2 + $0x138] sm:$0xff]  ;;  %v73_v51 = vld [vmem:[%s9978_s1 + $0xe0] sm:$0xff]  ;;  %v74_v52 = vld [vmem:[%s9978_s1 + $0xe8] sm:$0xff] }
  0x94   :  { %4827 = vmatmul.mubr.msk.bf16.vlgmr.msra.gmra.mrb[0].mxu0 %vm629_vm0, %v374_v54  ;;  %v265_v5 = vmul.f32 %v6164_v57, %v65_v55  ;;  %v266_v6 = vmul.f32 %v6164_v57, %v66_v56  ;;  %v267_v26 = vmul.f32 %v6164_v57, %v67_v15  ;;  %v268_v27 = vmul.f32 %v6164_v57, %v68_v19  ;;  %v75_v12 = vld [vmem:[%s9978_s1 + $0xf0] sm:$0xff] }
  0x95   :  { %4875 = vmatpush3.bf16.xpose.msra.mxu0 %v945_v58  ;;  %4830 = vmatprep.mubr.msk.bf16.mxu0 %vm629_vm0, %v375_v59  ;;  %v381_v9 = vpack.c.bf16 %v262_v63, %v261_v62  ;;  %v382_v10 = vpack.c.bf16 %v264_v1, %v263_v0  ;;  %v377_v30 = vpack.c.bf16 %v254_v18, %v253_v17  ;;  %v951_v53 = vsel %vm629_vm0, %v583_v28, 0  ;;  %v59_v59 = vld [vmem:[%s9978_s1 + $0x70] sm:$0xff]  ;;  %v78_v62 = vld [vmem:[%s9978_s1 + $0x108] sm:$0xff] }
  0x96   :  { %5339 = vmatprep.subr.msk.bf16.mxu0 %vm629_vm0, %v582_v60  ;;  %v383_v16 = vpack.c.bf16 %v266_v6, %v265_v5  ;;  %v269_v31 = vmul.f32 %v6164_v57, %v69_v22  ;;  %v270_v32 = vmul.f32 %v6164_v57, %v70_v23  ;;  %v384_v39 = vpack.c.bf16 %v268_v27, %v267_v26  ;;  %v6280_v60 = vpop.permute.xlu1 %222  ;;  %v478_v17 = vld [vmem:[%s9977_s2 + $0x148] sm:$0xff]  ;;  %v493_v27 = vld [vmem:[%s9977_s2 + $0x1c0] sm:$0xff] }
  0x97   :  { %4858 = vmatprep.mubr.msk.bf16.mxu1 %vm629_vm0, %v381_v9  ;;  %v256_v42 = vmul.f32 %v6132_v40, %v56_v33  ;;  %v591_v43 = vpack.c.bf16 %v490_v35, %v489_v34  ;;  %v257_v46 = vmul.f32 %v6132_v40, %v57_v36  ;;  %v258_v47 = vmul.f32 %v6132_v40, %v58_v37  ;;  %v480_v33 = vld [vmem:[%s9977_s2 + $0x158] sm:$0xff]  ;;  %v495_v36 = vld [vmem:[%s9977_s2 + $0x1d0] sm:$0xff] }
  0x98   :  { %4859 = vmatmul.mubr.msk.bf16.vlgmr.msra.gmra.mrb[0].mxu1 %vm629_vm0, %v382_v10  ;;  %v385_v45 = vpack.c.bf16 %v270_v32, %v269_v31  ;;  %v271_v55 = vmul.f32 %v6164_v57, %v71_v44  ;;  %v272_v56 = vmul.f32 %v6164_v57, %v72_v48  ;;  %v584_v58 = vpack.c.bf16 %v476_v50, %v475_v49  ;;  %v479_v32 = vld [vmem:[%s9977_s2 + $0x150] sm:$0xff]  ;;  %v496_v37 = vld [vmem:[%s9977_s2 + $0x1d8] sm:$0xff] }
  0x99   :  { %4907 = vmatpush3.bf16.xpose.msra.mxu1 %v1090_v11  ;;  %4862 = vmatprep.mubr.msk.bf16.mxu1 %vm629_vm0, %v383_v16  ;;  %v378_v54 = vpack.c.bf16 %v256_v42, %v255_v41  ;;  %v379_v63 = vpack.c.bf16 %v258_v47, %v257_v46  ;;  %v273_v0 = vmul.f32 %v6164_v57, %v73_v51  ;;  %v1096_v5 = vsel %vm629_vm0, %v591_v43, 0  ;;  %v76_v16 = vld [vmem:[%s9978_s1 + $0xf8] sm:$0xff]  ;;  %v481_v41 = vld [vmem:[%s9977_s2 + $0x160] sm:$0xff]  ;;  %v482_v42 = vld [vmem:[%s9977_s2 + $0x168] sm:$0xff] }
  0x9a   :  { %5347 = vmatprep.subr.msk.bf16.mxu1 %vm629_vm0, %v590_v14  ;;  %v274_v1 = vmul.f32 %v6164_v57, %v74_v52  ;;  %v277_v6 = vmul.f32 %v6280_v60, %v77_v61  ;;  %v278_v7 = vmul.f32 %v6280_v60, %v78_v62  ;;  %v386_v8 = vpack.c.bf16 %v272_v56, %v271_v55  ;;  %v94_v14 = vld [vmem:[%s9978_s1 + $0x188] sm:$0xff]  ;;  %v6326_v18 = vpop.permute.xlu1 %226  ;;  %v483_v49 = vld [vmem:[%s9977_s2 + $0x170] sm:$0xff]  ;;  %v484_v50 = vld [vmem:[%s9977_s2 + $0x178] sm:$0xff] }
  0x9b   :  { %v259_v9 = vmul.f32 %v6132_v40, %v59_v59  ;;  %v260_v10 = vmul.f32 %v6132_v40, %v60_v2  ;;  %v592_v11 = vpack.c.bf16 %v492_v4, %v491_v3  ;;  %v477_v40 = vld [vmem:[%s9977_s2 + $0x140] sm:$0xff]  ;;  %v954_v19 = vsel %vm629_vm0, %v584_v58, 0  ;;  %v498_v46 = vld [vmem:[%s9977_s2 + $0x1e8] sm:$0xff]  ;;  %v79_v61 = vld [vmem:[%s9978_s1 + $0x110] sm:$0xff] }
  0x9c   :  { %4831 = vmatmul.mubr.msk.bf16.gmra.mrb[4].mxu0 %vm629_vm0, %v376_v25  ;;  %v387_v15 = vpack.c.bf16 %v274_v1, %v273_v0  ;;  %v389_v20 = vpack.c.bf16 %v278_v7, %v277_v6  ;;  %v293_v21 = vmul.f32 %v6326_v18, %v93_v13  ;;  %v294_v22 = vmul.f32 %v6326_v18, %v94_v14  ;;  %v502_v59 = vld [vmem:[%s9977_s2 + $0x208] sm:$0xff]  ;;  %v80_v62 = vld [vmem:[%s9978_s1 + $0x118] sm:$0xff]  ;;  %v81_v1 = vld [vmem:[%s9978_s1 + $0x120] sm:$0xff] }
  0x9d   :  { %4877 = vmatpush3.bf16.xpose.msra.mxu0 %v948_v24  ;;  %4834 = vmatprep.mubr.msk.bf16.mxu0 %vm629_vm0, %v377_v30  ;;  %v380_v23 = vpack.c.bf16 %v260_v10, %v259_v9  ;;  %v275_v24 = vmul.f32 %v6164_v57, %v75_v12  ;;  %v276_v25 = vmul.f32 %v6164_v57, %v76_v16  ;;  %v1099_v31 = vsel %vm629_vm0, %v592_v11, 0  ;;  %v82_v2 = vld [vmem:[%s9978_s1 + $0x128] sm:$0xff]  ;;  %v517_v3 = vld [vmem:[%s9977_s2 + $0x280] sm:$0xff]  ;;  %v95_v9 = vld [vmem:[%s9978_s1 + $0x190] sm:$0xff] }
  0x9e   :  { %5340 = vmatprep.subr.msk.bf16.mxu0 %vm629_vm0, %v583_v28  ;;  %v585_v26 = vpack.c.bf16 %v478_v17, %v477_v40  ;;  %v494_v28 = vld [vmem:[%s9977_s2 + $0x1c8] sm:$0xff]  ;;  %v397_v29 = vpack.c.bf16 %v294_v22, %v293_v21  ;;  %v586_v35 = vpack.c.bf16 %v480_v33, %v479_v32  ;;  %v587_v44 = vpack.c.bf16 %v482_v42, %v481_v41  ;;  %v96_v10 = vld [vmem:[%s9978_s1 + $0x198] sm:$0xff]  ;;  %v503_v13 = vld [vmem:[%s9977_s2 + $0x210] sm:$0xff] }
  0x9f   :  { %v388_v30 = vpack.c.bf16 %v276_v25, %v275_v24  ;;  %v593_v57 = vpack.c.bf16 %v494_v28, %v493_v27  ;;  %v588_v52 = vpack.c.bf16 %v484_v50, %v483_v49  ;;  %v518_v4 = vld [vmem:[%s9977_s2 + $0x288] sm:$0xff]  ;;  %v280_v6 = vmul.f32 %v6280_v60, %v80_v62  ;;  %v504_v14 = vld [vmem:[%s9977_s2 + $0x218] sm:$0xff]  ;;  %v97_v17 = vld [vmem:[%s9978_s1 + $0x1a0] sm:$0xff] }
  0xa0   :  { %4863 = vmatmul.mubr.msk.bf16.gmra.mrb[4].mxu1 %vm629_vm0, %v384_v39  ;;  %v957_v34 = vsel %vm629_vm0, %v585_v26, 0  ;;  %v594_v39 = vpack.c.bf16 %v496_v37, %v495_v36  ;;  %v963_v51 = vsel %vm629_vm0, %v587_v44, 0  ;;  %v281_v7 = vmul.f32 %v6280_v60, %v81_v1  ;;  %v83_v22 = vld [vmem:[%s9978_s1 + $0x130] sm:$0xff]  ;;  %v520_v28 = vld [vmem:[%s9977_s2 + $0x298] sm:$0xff]  ;;  %v505_v41 = vld [vmem:[%s9977_s2 + $0x220] sm:$0xff] }
  0xa1   :  { %4909 = vmatpush3.bf16.xpose.msra.mxu1 %v1093_v38  ;;  %4866 = vmatprep.mubr.msk.bf16.mxu1 %vm629_vm0, %v385_v45  ;;  %v1102_v38 = vsel %vm629_vm0, %v593_v57, 0  ;;  %v497_v45 = vld [vmem:[%s9977_s2 + $0x1e0] sm:$0xff]  ;;  %v605_v12 = vpack.c.bf16 %v518_v4, %v517_v3  ;;  %v295_v16 = vmul.f32 %v6326_v18, %v95_v9  ;;  %v296_v40 = vmul.f32 %v6326_v18, %v96_v10  ;;  %v519_v27 = vld [vmem:[%s9977_s2 + $0x290] sm:$0xff]  ;;  %v506_v42 = vld [vmem:[%s9977_s2 + $0x228] sm:$0xff] }
  0xa2   :  { %5348 = vmatprep.subr.msk.bf16.mxu1 %vm629_vm0, %v591_v43  ;;  %v960_v43 = vsel %vm629_vm0, %v586_v35, 0  ;;  %v1105_v47 = vsel %vm629_vm0, %v594_v39, 0  ;;  %v595_v48 = vpack.c.bf16 %v498_v46, %v497_v45  ;;  %v297_v24 = vmul.f32 %v6326_v18, %v97_v17  ;;  %v87_v49 = vld [vmem:[%s9978_s1 + $0x150] sm:$0xff]  ;;  %v105_v9 = vld [vmem:[%s9978_s1 + $0x1e0] sm:$0xff]  ;;  %v106_v10 = vld [vmem:[%s9978_s1 + $0x1e8] sm:$0xff] }
  0xa3   :  { %v283_v32 = vmul.f32 %v6280_v60, %v83_v22  ;;  %v599_v50 = vpack.c.bf16 %v506_v42, %v505_v41  ;;  %v103_v1 = vld [vmem:[%s9978_s1 + $0x1d0] sm:$0xff]  ;;  %v305_v17 = vmul.f32 %v6326_v18, %v105_v9  ;;  %v524_v22 = vld [vmem:[%s9977_s2 + $0x2b8] sm:$0xff] }
  0xa4   :  { %4835 = vmatmul.mubr.msk.bf16.gmra.mrb[8].mxu0 %vm629_vm0, %v378_v54  ;;  %v500_v54 = vld [vmem:[%s9977_s2 + $0x1f8] sm:$0xff]  ;;  %v1108_v55 = vsel %vm629_vm0, %v595_v48, 0 }
  0xa5   :  { %4879 = vmatpush3.bf16.xpose.msra.mxu0 %v951_v53  ;;  %4838 = vmatprep.mubr.msk.bf16.mxu0 %vm629_vm0, %v379_v63  ;;  %v499_v53 = vld [vmem:[%s9977_s2 + $0x1f0] sm:$0xff]  ;;  %v966_v63 = vsel %vm629_vm0, %v588_v52, 0 }
  0xa6   :  { %5341 = vmatprep.subr.msk.bf16.mxu0 %vm629_vm0, %v584_v58  ;;  %v596_v56 = vpack.c.bf16 %v500_v54, %v499_v53  ;;  %v501_v58 = vld [vmem:[%s9977_s2 + $0x200] sm:$0xff]  ;;  %v88_v54 = vld [vmem:[%s9978_s1 + $0x158] sm:$0xff] }
  0xa7   :  { %v597_v0 = vpack.c.bf16 %v502_v59, %v501_v58  ;;  %v89_v58 = vld [vmem:[%s9978_s1 + $0x160] sm:$0xff]  ;;  %v90_v59 = vld [vmem:[%s9978_s1 + $0x168] sm:$0xff] }
  0xa8   :  { %4867 = vmatmul.mubr.msk.bf16.gmra.mrb[8].mxu1 %vm629_vm0, %v386_v8  ;;  %v282_v8 = vmul.f32 %v6280_v60, %v82_v2  ;;  %v289_v4 = vmul.f32 %v6280_v60, %v89_v58  ;;  %v527_v58 = vld [vmem:[%s9977_s2 + $0x2d0] sm:$0xff] }
  0xa9   :  { %4911 = vmatpush3.bf16.xpose.msra.mxu1 %v1096_v5  ;;  %4870 = vmatprep.mubr.msk.bf16.mxu1 %vm629_vm0, %v387_v15  ;;  %v279_v5 = vmul.f32 %v6280_v60, %v79_v61  ;;  %v1235_v21 = vsel %vm629_vm0, %v597_v0, 0 }
  0xaa   :  { %5349 = vmatprep.subr.msk.bf16.mxu1 %vm629_vm0, %v592_v11  ;;  %v1111_v11 = vsel %vm629_vm0, %v596_v56, 0 }
  0xab   :  { %v390_v15 = vpack.c.bf16 %v280_v6, %v279_v5  ;;  %v290_v5 = vmul.f32 %v6280_v60, %v90_v59  ;;  %v104_v6 = vld [vmem:[%s9978_s1 + $0x1d8] sm:$0xff] }
  0xac   :  { %4839 = vmatmul.mubr.msk.bf16.gmra.mrb[12].mxu0 %vm629_vm0, %v380_v23  ;;  %v598_v23 = vpack.c.bf16 %v504_v14, %v503_v13  ;;  %v303_v13 = vmul.f32 %v6326_v18, %v103_v1  ;;  %v304_v14 = vmul.f32 %v6326_v18, %v104_v6  ;;  %v528_v59 = vld [vmem:[%s9977_s2 + $0x2d8] sm:$0xff] }
  0xad   :  { %4881 = vmatpush3.bf16.xpose.msra.mxu0 %v954_v19  ;;  %4890 = vmatprep.mubr.msk.bf16.mxu0 %vm629_vm0, %v389_v20  ;;  %v98_v19 = vld [vmem:[%s9978_s1 + $0x1a8] sm:$0xff]  ;;  %v391_v20 = vpack.c.bf16 %v282_v8, %v281_v7  ;;  %v507_v7 = vld [vmem:[%s9977_s2 + $0x230] sm:$0xff]  ;;  %v508_v8 = vld [vmem:[%s9977_s2 + $0x238] sm:$0xff] }
  0xae   :  { %5342 = vmatprep.subr.msk.bf16.mxu0 %vm629_vm0, %v585_v26  ;;  %v298_v25 = vmul.f32 %v6326_v18, %v98_v19  ;;  %v84_v26 = vld [vmem:[%s9978_s1 + $0x138] sm:$0xff]  ;;  %v1238_v45 = vsel %vm629_vm0, %v598_v23, 0  ;;  %v306_v19 = vmul.f32 %v6326_v18, %v106_v10 }
  0xaf   :  { %v284_v33 = vmul.f32 %v6280_v60, %v84_v26 }
  0xb0   :  { %4871 = vmatmul.mubr.msk.bf16.gmra.mrb[12].mxu1 %vm629_vm0, %v388_v30  ;;  %v85_v30 = vld [vmem:[%s9978_s1 + $0x140] sm:$0xff]  ;;  %v399_v36 = vpack.c.bf16 %v298_v25, %v297_v24  ;;  %v110_v25 = vld [vmem:[%s9978_s1 + $0x208] sm:$0xff] }
  0xb1   :  { %4913 = vmatpush3.bf16.xpose.msra.mxu1 %v1099_v31  ;;  %4922 = vmatprep.mubr.msk.bf16.mxu1 %vm629_vm0, %v397_v29  ;;  %v398_v29 = vpack.c.bf16 %v296_v40, %v295_v16  ;;  %v86_v31 = vld [vmem:[%s9978_s1 + $0x148] sm:$0xff]  ;;  %v285_v37 = vmul.f32 %v6280_v60, %v85_v30  ;;  %v392_v46 = vpack.c.bf16 %v284_v33, %v283_v32  ;;  %v109_v24 = vld [vmem:[%s9978_s1 + $0x200] sm:$0xff]  ;;  %v107_v30 = vld [vmem:[%s9978_s1 + $0x1f0] sm:$0xff] }
  0xb2   :  { %5350 = vmatprep.subr.msk.bf16.mxu1 %vm629_vm0, %v593_v57  ;;  %v1380_v57 = vsel %vm629_vm0, %v605_v12, 0  ;;  %v600_v16 = vpack.c.bf16 %v508_v8, %v507_v7  ;;  %v395_v40 = vpack.c.bf16 %v290_v5, %v289_v4  ;;  %v307_v42 = vmul.f32 %v6326_v18, %v107_v30  ;;  %v530_v4 = vld [vmem:[%s9977_s2 + $0x2e8] sm:$0xff]  ;;  %v515_v7 = vld [vmem:[%s9977_s2 + $0x270] sm:$0xff]  ;;  %v516_v8 = vld [vmem:[%s9977_s2 + $0x278] sm:$0xff] }
  0xb3   :  { %v604_v10 = vpack.c.bf16 %v516_v8, %v515_v7  ;;  %v128_v30 = vld [vmem:[%s9978_s1 + $0x298] sm:$0xff]  ;;  %v119_v7 = vld [vmem:[%s9978_s1 + $0x250] sm:$0xff] }
  0xb5   :  { %4883 = vmatpush3.bf16.xpose.msra.mxu0 %v957_v34  ;;  %v99_v34 = vld [vmem:[%s9978_s1 + $0x1b0] sm:$0xff] }
  0xb6   :  { %5343 = vmatprep.subr.msk.bf16.mxu0 %vm629_vm0, %v586_v35  ;;  %v606_v35 = vpack.c.bf16 %v520_v28, %v519_v27  ;;  %v402_v27 = vpack.c.bf16 %v304_v14, %v303_v13 }
  0xb8   :  { %v1383_v61 = vsel %vm629_vm0, %v606_v35, 0 }
  0xb9   :  { %4915 = vmatpush3.bf16.xpose.msra.mxu1 %v1102_v38  ;;  %v286_v38 = vmul.f32 %v6280_v60, %v86_v31 }
  0xba   :  { %5351 = vmatprep.subr.msk.bf16.mxu1 %vm629_vm0, %v594_v39  ;;  %v100_v39 = vld [vmem:[%s9978_s1 + $0x1b8] sm:$0xff] }
  0xbd   :  { %4885 = vmatpush3.bf16.xpose.msra.mxu0 %v960_v43  ;;  %v101_v43 = vld [vmem:[%s9978_s1 + $0x1c0] sm:$0xff] }
  0xbe   :  { %5344 = vmatprep.subr.msk.bf16.mxu0 %vm629_vm0, %v587_v44  ;;  %v102_v44 = vld [vmem:[%s9978_s1 + $0x1c8] sm:$0xff] }
  0xbf   :  { %v302_v53 = vmul.f32 %v6326_v18, %v102_v44 }
  0xc1   :  { %4917 = vmatpush3.bf16.xpose.msra.mxu1 %v1105_v47  ;;  %v299_v47 = vmul.f32 %v6326_v18, %v99_v34  ;;  %v108_v34 = vld [vmem:[%s9978_s1 + $0x1f8] sm:$0xff] }
  0xc2   :  { %5352 = vmatprep.subr.msk.bf16.mxu1 %vm629_vm0, %v595_v48  ;;  %v300_v48 = vmul.f32 %v6326_v18, %v100_v39  ;;  %v6604_v39 = vpop.permute.xlu1 %234 }
  0xc4   :  { %v400_v62 = vpack.c.bf16 %v300_v48, %v299_v47  ;;  %v525_v48 = vld [vmem:[%s9977_s2 + $0x2c0] sm:$0xff] }
  0xc5   :  { %4887 = vmatpush3.bf16.xpose.msra.mxu0 %v963_v51  ;;  %v393_v51 = vpack.c.bf16 %v286_v38, %v285_v37  ;;  %v126_v37 = vld [vmem:[%s9978_s1 + $0x288] sm:$0xff]  ;;  %v1244_v38 = vsel %vm629_vm0, %v600_v16, 0 }
  0xc6   :  { %5345 = vmatprep.subr.msk.bf16.mxu0 %vm629_vm0, %v588_v52  ;;  %v301_v52 = vmul.f32 %v6326_v18, %v101_v43  ;;  %v308_v43 = vmul.f32 %v6326_v18, %v108_v34  ;;  %v326_v47 = vmul.f32 %v6604_v39, %v126_v37  ;;  %v536_v34 = vld [vmem:[%s9977_s2 + $0x318] sm:$0xff]  ;;  %v328_v37 = vmul.f32 %v6604_v39, %v128_v30  ;;  %v137_v30 = vld [vmem:[%s9978_s1 + $0x2e0] sm:$0xff] }
  0xc8   :  { %v401_v3 = vpack.c.bf16 %v302_v53, %v301_v52  ;;  %v404_v18 = vpack.c.bf16 %v308_v43, %v307_v42  ;;  %v511_v53 = vld [vmem:[%s9977_s2 + $0x250] sm:$0xff] }
  0xc9   :  { %4919 = vmatpush3.bf16.xpose.msra.mxu1 %v1108_v55  ;;  %v521_v55 = vld [vmem:[%s9977_s2 + $0x2a0] sm:$0xff]  ;;  %v115_v42 = vld [vmem:[%s9978_s1 + $0x230] sm:$0xff] }
  0xca   :  { %5353 = vmatprep.subr.msk.bf16.mxu1 %vm629_vm0, %v596_v56  ;;  %v522_v56 = vld [vmem:[%s9977_s2 + $0x2a8] sm:$0xff] }
  0xcb   :  { %v607_v2 = vpack.c.bf16 %v522_v56, %v521_v55 }
  0xcd   :  { %4889 = vmatpush3.bf16.xpose.msra.mxu0 %v966_v63  ;;  %v287_v63 = vmul.f32 %v6280_v60, %v87_v49  ;;  %v1386_v26 = vsel %vm629_vm0, %v607_v2, 0  ;;  %v526_v49 = vld [vmem:[%s9977_s2 + $0x2c8] sm:$0xff] }
  0xce   :  { %5354 = vmatprep.subr.msk.bf16.mxu0 %vm629_vm0, %v597_v0  ;;  %v288_v0 = vmul.f32 %v6280_v60, %v88_v54  ;;  %v512_v54 = vld [vmem:[%s9977_s2 + $0x258] sm:$0xff] }
  0xcf   :  { %v602_v56 = vpack.c.bf16 %v512_v54, %v511_v53 }
  0xd1   :  { %4921 = vmatpush3.bf16.xpose.msra.mxu1 %v1111_v11  ;;  %v1241_v11 = vsel %vm629_vm0, %v599_v50, 0  ;;  %v1250_v1 = vsel %vm629_vm0, %v602_v56, 0 }
  0xd2   :  { %5362 = vmatprep.subr.msk.bf16.mxu1 %vm629_vm0, %v605_v12  ;;  %v394_v12 = vpack.c.bf16 %v288_v0, %v287_v63  ;;  %v513_v63 = vld [vmem:[%s9977_s2 + $0x260] sm:$0xff]  ;;  %v514_v0 = vld [vmem:[%s9977_s2 + $0x268] sm:$0xff] }
  0xd4   :  { %4891 = vmatmul.mubr.msk.bf16.vlgmr.msra.gmra.mrb[16].mxu0 %vm629_vm0, %v390_v15  ;;  %v91_v15 = vld [vmem:[%s9978_s1 + $0x170] sm:$0xff] }
  0xd5   :  { %4939 = vmatpush3.bf16.xpose.msra.mxu0 %v1235_v21  ;;  %4894 = vmatprep.mubr.msk.bf16.mxu0 %vm629_vm0, %v391_v20  ;;  %v92_v20 = vld [vmem:[%s9978_s1 + $0x178] sm:$0xff]  ;;  %v523_v21 = vld [vmem:[%s9977_s2 + $0x2b0] sm:$0xff]  ;;  %v291_v28 = vmul.f32 %v6280_v60, %v91_v15  ;;  %v533_v15 = vld [vmem:[%s9977_s2 + $0x300] sm:$0xff] }
  0xd6   :  { %5355 = vmatprep.subr.msk.bf16.mxu0 %vm629_vm0, %v598_v23  ;;  %v6567_v23 = vpop.permute.xlu0 %230  ;;  %v608_v31 = vpack.c.bf16 %v524_v22, %v523_v21  ;;  %v549_v21 = vld [vmem:[%s9977_s2 + $0x380] sm:$0xff]  ;;  %v550_v22 = vld [vmem:[%s9977_s2 + $0x388] sm:$0xff] }
  0xd7   :  { %v309_v32 = vmul.f32 %v6567_v23, %v109_v24  ;;  %v310_v33 = vmul.f32 %v6567_v23, %v110_v25  ;;  %v113_v24 = vld [vmem:[%s9978_s1 + $0x220] sm:$0xff]  ;;  %v114_v25 = vld [vmem:[%s9978_s1 + $0x228] sm:$0xff]  ;;  %v315_v53 = vmul.f32 %v6567_v23, %v115_v42  ;;  %v555_v42 = vld [vmem:[%s9977_s2 + $0x3b0] sm:$0xff] }
  0xd8   :  { %4923 = vmatmul.mubr.msk.bf16.vlgmr.msra.gmra.mrb[16].mxu1 %vm629_vm0, %v398_v29  ;;  %v292_v29 = vmul.f32 %v6280_v60, %v92_v20  ;;  %v509_v60 = vld [vmem:[%s9977_s2 + $0x240] sm:$0xff]  ;;  %v112_v20 = vld [vmem:[%s9978_s1 + $0x218] sm:$0xff] }
  0xd9   :  { %4926 = vmatprep.mubr.msk.bf16.mxu1 %vm629_vm0, %v399_v36  ;;  %4971 = vmatpush3.bf16.xpose.msra.mxu1 %v1380_v57  ;;  %v403_v57 = vpack.c.bf16 %v306_v19, %v305_v17  ;;  %v125_v36 = vld [vmem:[%s9978_s1 + $0x280] sm:$0xff]  ;;  %v111_v17 = vld [vmem:[%s9978_s1 + $0x210] sm:$0xff] }
  0xda   :  { %5363 = vmatprep.subr.msk.bf16.mxu1 %vm629_vm0, %v606_v35  ;;  %v510_v35 = vld [vmem:[%s9977_s2 + $0x248] sm:$0xff]  ;;  %v396_v41 = vpack.c.bf16 %v292_v29, %v291_v28  ;;  %v312_v28 = vmul.f32 %v6567_v23, %v112_v20  ;;  %v127_v29 = vld [vmem:[%s9978_s1 + $0x290] sm:$0xff] }
  0xdb   :  { %v601_v44 = vpack.c.bf16 %v510_v35, %v509_v60  ;;  %v129_v60 = vld [vmem:[%s9978_s1 + $0x2a0] sm:$0xff]  ;;  %v130_v35 = vld [vmem:[%s9978_s1 + $0x2a8] sm:$0xff] }
  0xdc   :  { %4895 = vmatmul.mubr.msk.bf16.gmra.mrb[20].mxu0 %vm629_vm0, %v392_v46  ;;  %v325_v46 = vmul.f32 %v6604_v39, %v125_v36  ;;  %v327_v36 = vmul.f32 %v6604_v39, %v127_v29  ;;  %v540_v29 = vld [vmem:[%s9977_s2 + $0x338] sm:$0xff] }
  0xdd   :  { %4898 = vmatprep.mubr.msk.bf16.mxu0 %vm629_vm0, %v393_v51  ;;  %4941 = vmatpush3.bf16.xpose.msra.mxu0 %v1238_v45  ;;  %v405_v45 = vpack.c.bf16 %v310_v33, %v309_v32  ;;  %v609_v51 = vpack.c.bf16 %v526_v49, %v525_v48  ;;  %v1247_v55 = vsel %vm629_vm0, %v601_v44, 0  ;;  %v314_v32 = vmul.f32 %v6567_v23, %v114_v25  ;;  %v535_v33 = vld [vmem:[%s9977_s2 + $0x310] sm:$0xff]  ;;  %v552_v49 = vld [vmem:[%s9977_s2 + $0x398] sm:$0xff] }
  0xde   :  { %5356 = vmatprep.subr.msk.bf16.mxu0 %vm629_vm0, %v599_v50  ;;  %v1389_v50 = vsel %vm629_vm0, %v608_v31, 0  ;;  %v413_v52 = vpack.c.bf16 %v326_v47, %v325_v46  ;;  %v614_v43 = vpack.c.bf16 %v536_v34, %v535_v33  ;;  %v330_v46 = vmul.f32 %v6604_v39, %v130_v35  ;;  %v116_v47 = vld [vmem:[%s9978_s1 + $0x238] sm:$0xff]  ;;  %v551_v48 = vld [vmem:[%s9977_s2 + $0x390] sm:$0xff] }
  0xdf   :  { %v316_v54 = vmul.f32 %v6567_v23, %v116_v47 }
  0xe0   :  { %4927 = vmatmul.mubr.msk.bf16.gmra.mrb[20].mxu1 %vm629_vm0, %v400_v62  ;;  %v610_v62 = vpack.c.bf16 %v528_v59, %v527_v58  ;;  %v622_v58 = vpack.c.bf16 %v552_v49, %v551_v48 }
  0xe1   :  { %4930 = vmatprep.mubr.msk.bf16.mxu1 %vm629_vm0, %v401_v3  ;;  %4973 = vmatpush3.bf16.xpose.msra.mxu1 %v1383_v61  ;;  %v1392_v61 = vsel %vm629_vm0, %v609_v51, 0  ;;  %v529_v3 = vld [vmem:[%s9977_s2 + $0x2e0] sm:$0xff] }
  0xe2   :  { %5364 = vmatprep.subr.msk.bf16.mxu1 %vm629_vm0, %v607_v2  ;;  %v603_v2 = vpack.c.bf16 %v514_v0, %v513_v63  ;;  %v1395_v5 = vsel %vm629_vm0, %v610_v62, 0  ;;  %v611_v6 = vpack.c.bf16 %v530_v4, %v529_v3  ;;  %v537_v63 = vld [vmem:[%s9977_s2 + $0x320] sm:$0xff]  ;;  %v538_v0 = vld [vmem:[%s9977_s2 + $0x328] sm:$0xff] }
  0xe3   :  { %v615_v8 = vpack.c.bf16 %v538_v0, %v537_v63 }
  0xe4   :  { %4899 = vmatmul.mubr.msk.bf16.gmra.mrb[24].mxu0 %vm629_vm0, %v394_v12  ;;  %v1253_v9 = vsel %vm629_vm0, %v603_v2, 0  ;;  %v532_v12 = vld [vmem:[%s9977_s2 + $0x2f8] sm:$0xff]  ;;  %v1398_v13 = vsel %vm629_vm0, %v611_v6, 0 }
  0xe5   :  { %4902 = vmatprep.mubr.msk.bf16.mxu0 %vm629_vm0, %v395_v40  ;;  %4943 = vmatpush3.bf16.xpose.msra.mxu0 %v1241_v11  ;;  %v531_v11 = vld [vmem:[%s9977_s2 + $0x2f0] sm:$0xff]  ;;  %v1256_v40 = vsel %vm629_vm0, %v604_v10, 0  ;;  %v1531_v33 = vsel %vm629_vm0, %v615_v8, 0 }
  0xe6   :  { %5357 = vmatprep.subr.msk.bf16.mxu0 %vm629_vm0, %v600_v16  ;;  %v612_v14 = vpack.c.bf16 %v532_v12, %v531_v11  ;;  %v534_v16 = vld [vmem:[%s9977_s2 + $0x308] sm:$0xff]  ;;  %v120_v12 = vld [vmem:[%s9978_s1 + $0x258] sm:$0xff] }
  0xe7   :  { %v613_v19 = vpack.c.bf16 %v534_v16, %v533_v15  ;;  %v121_v15 = vld [vmem:[%s9978_s1 + $0x260] sm:$0xff]  ;;  %v122_v16 = vld [vmem:[%s9978_s1 + $0x268] sm:$0xff]  ;;  %v320_v20 = vmul.f32 %v6567_v23, %v120_v12  ;;  %v544_v12 = vld [vmem:[%s9977_s2 + $0x358] sm:$0xff] }
  0xe8   :  { %4931 = vmatmul.mubr.msk.bf16.gmra.mrb[24].mxu1 %vm629_vm0, %v402_v27  ;;  %v311_v27 = vmul.f32 %v6567_v23, %v111_v17  ;;  %v1673_v17 = vsel %vm629_vm0, %v622_v58, 0  ;;  %v321_v25 = vmul.f32 %v6567_v23, %v121_v15  ;;  %v559_v15 = vld [vmem:[%s9977_s2 + $0x3d0] sm:$0xff] }
  0xe9   :  { %4934 = vmatprep.mubr.msk.bf16.mxu1 %vm629_vm0, %v403_v57  ;;  %4975 = vmatpush3.bf16.xpose.msra.mxu1 %v1386_v26  ;;  %v1401_v26 = vsel %vm629_vm0, %v612_v14, 0  ;;  %v313_v57 = vmul.f32 %v6567_v23, %v113_v24 }
  0xea   :  { %5365 = vmatprep.subr.msk.bf16.mxu1 %vm629_vm0, %v608_v31  ;;  %v621_v31 = vpack.c.bf16 %v550_v22, %v549_v21  ;;  %v135_v21 = vld [vmem:[%s9978_s1 + $0x2d0] sm:$0xff] }
  0xec   :  { %4903 = vmatmul.mubr.msk.bf16.gmra.mrb[28].mxu0 %vm629_vm0, %v396_v41  ;;  %v1525_v41 = vsel %vm629_vm0, %v613_v19, 0 }
  0xed   :  { %4945 = vmatpush3.bf16.xpose.msra.mxu0 %v1244_v38  ;;  %4954 = vmatprep.mubr.msk.bf16.mxu0 %vm629_vm0, %v405_v45  ;;  %v406_v38 = vpack.c.bf16 %v312_v28, %v311_v27  ;;  %v329_v45 = vmul.f32 %v6604_v39, %v129_v60  ;;  %v136_v27 = vld [vmem:[%s9978_s1 + $0x2d8] sm:$0xff]  ;;  %v539_v28 = vld [vmem:[%s9977_s2 + $0x330] sm:$0xff] }
  0xee   :  { %5358 = vmatprep.subr.msk.bf16.mxu0 %vm629_vm0, %v601_v44  ;;  %v407_v44 = vpack.c.bf16 %v314_v32, %v313_v57  ;;  %v335_v57 = vmul.f32 %v6604_v39, %v135_v21  ;;  %v336_v34 = vmul.f32 %v6604_v39, %v136_v27  ;;  %v123_v60 = vld [vmem:[%s9978_s1 + $0x270] sm:$0xff]  ;;  %v616_v35 = vpack.c.bf16 %v540_v29, %v539_v28  ;;  %v548_v29 = vld [vmem:[%s9977_s2 + $0x378] sm:$0xff] }
  0xef   :  { %v415_v59 = vpack.c.bf16 %v330_v46, %v329_v45  ;;  %v141_v45 = vld [vmem:[%s9978_s1 + $0x300] sm:$0xff]  ;;  %v142_v46 = vld [vmem:[%s9978_s1 + $0x308] sm:$0xff]  ;;  %v323_v47 = vmul.f32 %v6567_v23, %v123_v60  ;;  %v547_v28 = vld [vmem:[%s9977_s2 + $0x370] sm:$0xff] }
  0xf0   :  { %4935 = vmatmul.mubr.msk.bf16.gmra.mrb[28].mxu1 %vm629_vm0, %v404_v18  ;;  %v117_v18 = vld [vmem:[%s9978_s1 + $0x240] sm:$0xff]  ;;  %v418_v48 = vpack.c.bf16 %v336_v34, %v335_v57  ;;  %v1534_v0 = vsel %vm629_vm0, %v616_v35, 0  ;;  %v563_v57 = vld [vmem:[%s9977_s2 + $0x3f0] sm:$0xff] }
  0xf1   :  { %4977 = vmatpush3.bf16.xpose.msra.mxu1 %v1389_v50  ;;  %4986 = vmatprep.mubr.msk.bf16.mxu1 %vm629_vm0, %v413_v52  ;;  %v118_v50 = vld [vmem:[%s9978_s1 + $0x248] sm:$0xff]  ;;  %v1670_v52 = vsel %vm629_vm0, %v621_v31, 0 }
  0xf2   :  { %5366 = vmatprep.subr.msk.bf16.mxu1 %vm629_vm0, %v609_v51  ;;  %v414_v51 = vpack.c.bf16 %v328_v37, %v327_v36  ;;  %v337_v37 = vmul.f32 %v6604_v39, %v137_v30 }
  0xf5   :  { %4947 = vmatpush3.bf16.xpose.msra.mxu0 %v1247_v55  ;;  %v131_v55 = vld [vmem:[%s9978_s1 + $0x2b0] sm:$0xff] }
  0xf6   :  { %5359 = vmatprep.subr.msk.bf16.mxu0 %vm629_vm0, %v602_v56  ;;  %v132_v56 = vld [vmem:[%s9978_s1 + $0x2b8] sm:$0xff]  ;;  %v331_v3 = vmul.f32 %v6604_v39, %v131_v55 }
  0xf7   :  { %v332_v4 = vmul.f32 %v6604_v39, %v132_v56  ;;  %v140_v55 = vld [vmem:[%s9978_s1 + $0x2f8] sm:$0xff]  ;;  %v542_v56 = vld [vmem:[%s9977_s2 + $0x348] sm:$0xff] }
  0xf9   :  { %4979 = vmatpush3.bf16.xpose.msra.mxu1 %v1392_v61  ;;  %v317_v61 = vmul.f32 %v6567_v23, %v117_v18 }
  0xfa   :  { %5367 = vmatprep.subr.msk.bf16.mxu1 %vm629_vm0, %v610_v62  ;;  %v318_v62 = vmul.f32 %v6567_v23, %v118_v50  ;;  %v139_v50 = vld [vmem:[%s9978_s1 + $0x2f0] sm:$0xff] }
  0xfd   :  { %4949 = vmatpush3.bf16.xpose.msra.mxu0 %v1250_v1  ;;  %v133_v1 = vld [vmem:[%s9978_s1 + $0x2c0] sm:$0xff] }
  0xfe   :  { %5360 = vmatprep.subr.msk.bf16.mxu0 %vm629_vm0, %v603_v2  ;;  %v134_v2 = vld [vmem:[%s9978_s1 + $0x2c8] sm:$0xff] }
  0xff   :  { %v334_v11 = vmul.f32 %v6604_v39, %v134_v2 }
 0x101   :  { %4981 = vmatpush3.bf16.xpose.msra.mxu1 %v1395_v5  ;;  %v408_v5 = vpack.c.bf16 %v316_v54, %v315_v53 }
 0x102   :  { %5368 = vmatprep.subr.msk.bf16.mxu1 %vm629_vm0, %v611_v6  ;;  %v1528_v6 = vsel %vm629_vm0, %v614_v43, 0 }
 0x105   :  { %4951 = vmatpush3.bf16.xpose.msra.mxu0 %v1253_v9  ;;  %v409_v9 = vpack.c.bf16 %v318_v62, %v317_v61  ;;  %v158_v61 = vld [vmem:[%s9978_s1 + $0x388] sm:$0xff]  ;;  %v339_v62 = vmul.f32 %v6604_v39, %v139_v50 }
 0x106   :  { %5361 = vmatprep.subr.msk.bf16.mxu0 %vm629_vm0, %v604_v10  ;;  %v333_v10 = vmul.f32 %v6604_v39, %v133_v1  ;;  %v340_v1 = vmul.f32 %v6604_v39, %v140_v55 }
 0x108   :  { %v417_v24 = vpack.c.bf16 %v334_v11, %v333_v10  ;;  %v543_v11 = vld [vmem:[%s9977_s2 + $0x350] sm:$0xff] }
 0x109   :  { %4983 = vmatpush3.bf16.xpose.msra.mxu1 %v1398_v13  ;;  %v553_v13 = vld [vmem:[%s9977_s2 + $0x3a0] sm:$0xff] }
 0x10a   :  { %5369 = vmatprep.subr.msk.bf16.mxu1 %vm629_vm0, %v612_v14  ;;  %v554_v14 = vld [vmem:[%s9977_s2 + $0x3a8] sm:$0xff] }
 0x10b   :  { %v623_v22 = vpack.c.bf16 %v554_v14, %v553_v13  ;;  %v618_v14 = vpack.c.bf16 %v544_v12, %v543_v11 }
 0x10d   :  { %4953 = vmatpush3.bf16.xpose.msra.mxu0 %v1256_v40  ;;  %v416_v40 = vpack.c.bf16 %v332_v4, %v331_v3  ;;  %v1676_v49 = vsel %vm629_vm0, %v623_v22, 0  ;;  %v1540_v21 = vsel %vm629_vm0, %v618_v14, 0 }
 0x10e   :  { %5370 = vmatprep.subr.msk.bf16.mxu0 %vm629_vm0, %v613_v19  ;;  %v319_v19 = vmul.f32 %v6567_v23, %v119_v7  ;;  %v558_v7 = vld [vmem:[%s9977_s2 + $0x3c8] sm:$0xff] }
 0x110   :  { %v410_v32 = vpack.c.bf16 %v320_v20, %v319_v19  ;;  %v545_v19 = vld [vmem:[%s9977_s2 + $0x360] sm:$0xff]  ;;  %v546_v20 = vld [vmem:[%s9977_s2 + $0x368] sm:$0xff] }
 0x111   :  { %4985 = vmatpush3.bf16.xpose.msra.mxu1 %v1401_v26  ;;  %v322_v26 = vmul.f32 %v6567_v23, %v122_v16  ;;  %v560_v16 = vld [vmem:[%s9977_s2 + $0x3d8] sm:$0xff] }
 0x112   :  { %5378 = vmatprep.subr.msk.bf16.mxu1 %vm629_vm0, %v621_v31  ;;  %v138_v31 = vld [vmem:[%s9978_s1 + $0x2e8] sm:$0xff] }
 0x113   :  { %v411_v36 = vpack.c.bf16 %v322_v26, %v321_v25  ;;  %v562_v25 = vld [vmem:[%s9977_s2 + $0x3e8] sm:$0xff] }
 0x114   :  { %4955 = vmatmul.mubr.msk.bf16.vlgmr.msra.gmra.mrb[32].mxu0 %vm629_vm0, %v406_v38  ;;  %v338_v38 = vmul.f32 %v6604_v39, %v138_v31  ;;  %v420_v39 = vpack.c.bf16 %v340_v1, %v339_v62  ;;  %v620_v31 = vpack.c.bf16 %v548_v29, %v547_v28 }
 0x115   :  { %4958 = vmatprep.mubr.msk.bf16.mxu0 %vm629_vm0, %v407_v44  ;;  %5003 = vmatpush3.bf16.xpose.msra.mxu0 %v1525_v41  ;;  %v124_v41 = vld [vmem:[%s9978_s1 + $0x278] sm:$0xff]  ;;  %v6843_v44 = vpop.permute.xlu0 %238 }
 0x116   :  { %5371 = vmatprep.subr.msk.bf16.mxu0 %vm629_vm0, %v614_v43  ;;  %v556_v43 = vld [vmem:[%s9977_s2 + $0x3b8] sm:$0xff]  ;;  %v324_v18 = vmul.f32 %v6567_v23, %v124_v41  ;;  %v341_v53 = vmul.f32 %v6843_v44, %v141_v45  ;;  %v342_v54 = vmul.f32 %v6843_v44, %v142_v46  ;;  %v541_v23 = vld [vmem:[%s9977_s2 + $0x340] sm:$0xff]  ;;  %v1546_v60 = vsel %vm629_vm0, %v620_v31, 0 }
 0x117   :  { %v617_v2 = vpack.c.bf16 %v542_v56, %v541_v23  ;;  %v147_v23 = vld [vmem:[%s9978_s1 + $0x330] sm:$0xff]  ;;  %v148_v56 = vld [vmem:[%s9978_s1 + $0x338] sm:$0xff] }
 0x118   :  { %4987 = vmatmul.mubr.msk.bf16.vlgmr.msra.gmra.mrb[32].mxu1 %vm629_vm0, %v414_v51  ;;  %v624_v51 = vpack.c.bf16 %v556_v43, %v555_v42  ;;  %v412_v63 = vpack.c.bf16 %v324_v18, %v323_v47  ;;  %v421_v3 = vpack.c.bf16 %v342_v54, %v341_v53  ;;  %v159_v47 = vld [vmem:[%s9978_s1 + $0x390] sm:$0xff]  ;;  %v162_v18 = vld [vmem:[%s9978_s1 + $0x3a8] sm:$0xff] }
 0x119   :  { %4990 = vmatprep.mubr.msk.bf16.mxu1 %vm629_vm0, %v415_v59  ;;  %5035 = vmatpush3.bf16.xpose.msra.mxu1 %v1670_v52  ;;  %v419_v52 = vpack.c.bf16 %v338_v38, %v337_v37  ;;  %v157_v59 = vld [vmem:[%s9978_s1 + $0x380] sm:$0xff]  ;;  %v1537_v13 = vsel %vm629_vm0, %v617_v2, 0  ;;  %v146_v38 = vld [vmem:[%s9978_s1 + $0x328] sm:$0xff] }
 0x11a   :  { %5379 = vmatprep.subr.msk.bf16.mxu1 %vm629_vm0, %v622_v58  ;;  %v6871_v58 = vpop.permute.xlu1 %242  ;;  %v145_v37 = vld [vmem:[%s9978_s1 + $0x320] sm:$0xff]  ;;  %v346_v46 = vmul.f32 %v6843_v44, %v146_v38 }
 0x11b   :  { %v357_v4 = vmul.f32 %v6871_v58, %v157_v59  ;;  %v345_v45 = vmul.f32 %v6843_v44, %v145_v37  ;;  %v362_v55 = vmul.f32 %v6871_v58, %v162_v18  ;;  %v149_v59 = vld [vmem:[%s9978_s1 + $0x340] sm:$0xff] }
 0x11c   :  { %4959 = vmatmul.mubr.msk.bf16.gmra.mrb[36].mxu0 %vm629_vm0, %v408_v5  ;;  %v358_v5 = vmul.f32 %v6871_v58, %v158_v61  ;;  %v150_v61 = vld [vmem:[%s9978_s1 + $0x348] sm:$0xff] }
 0x11d   :  { %4962 = vmatprep.mubr.msk.bf16.mxu0 %vm629_vm0, %v409_v9  ;;  %5005 = vmatpush3.bf16.xpose.msra.mxu0 %v1528_v6  ;;  %v557_v6 = vld [vmem:[%s9977_s2 + $0x3c0] sm:$0xff]  ;;  %v423_v53 = vpack.c.bf16 %v346_v46, %v345_v45 }
 0x11e   :  { %5372 = vmatprep.subr.msk.bf16.mxu0 %vm629_vm0, %v615_v8  ;;  %v1679_v8 = vsel %vm629_vm0, %v624_v51, 0  ;;  %v625_v9 = vpack.c.bf16 %v558_v7, %v557_v6  ;;  %v429_v10 = vpack.c.bf16 %v358_v5, %v357_v4  ;;  %v163_v4 = vld [vmem:[%s9978_s1 + $0x3b0] sm:$0xff]  ;;  %v164_v5 = vld [vmem:[%s9978_s1 + $0x3b8] sm:$0xff]  ;;  %v165_v6 = vld [vmem:[%s9978_s1 + $0x3c0] sm:$0xff] }
 0x11f   :  { %v166_v7 = vld [vmem:[%s9978_s1 + $0x3c8] sm:$0xff]  ;;  %v365_v11 = vmul.f32 %v6871_v58, %v165_v6 }
 0x120   :  { %4991 = vmatmul.mubr.msk.bf16.gmra.mrb[36].mxu1 %vm629_vm0, %v416_v40  ;;  %v1682_v40 = vsel %vm629_vm0, %v625_v9, 0  ;;  %v366_v12 = vmul.f32 %v6871_v58, %v166_v7 }
 0x121   :  { %4994 = vmatprep.mubr.msk.bf16.mxu1 %vm629_vm0, %v417_v24  ;;  %5037 = vmatpush3.bf16.xpose.msra.mxu1 %v1673_v17  ;;  %v626_v17 = vpack.c.bf16 %v560_v16, %v559_v15  ;;  %v561_v24 = vld [vmem:[%s9977_s2 + $0x3e0] sm:$0xff]  ;;  %v154_v16 = vld [vmem:[%s9978_s1 + $0x368] sm:$0xff] }
 0x122   :  { %5380 = vmatprep.subr.msk.bf16.mxu1 %vm629_vm0, %v623_v22  ;;  %v619_v22 = vpack.c.bf16 %v546_v20, %v545_v19  ;;  %v627_v27 = vpack.c.bf16 %v562_v25, %v561_v24  ;;  %v153_v15 = vld [vmem:[%s9978_s1 + $0x360] sm:$0xff]  ;;  %v433_v20 = vpack.c.bf16 %v366_v12, %v365_v11  ;;  %v167_v24 = vld [vmem:[%s9978_s1 + $0x3d0] sm:$0xff]  ;;  %v168_v25 = vld [vmem:[%s9978_s1 + $0x3d8] sm:$0xff] }
 0x123   :  { %v1685_v26 = vsel %vm629_vm0, %v626_v17, 0  ;;  %v367_v29 = vmul.f32 %v6871_v58, %v167_v24 }
 0x124   :  { %4963 = vmatmul.mubr.msk.bf16.gmra.mrb[40].mxu0 %vm629_vm0, %v410_v32  ;;  %v1543_v30 = vsel %vm629_vm0, %v619_v22, 0  ;;  %v564_v32 = vld [vmem:[%s9977_s2 + $0x3f8] sm:$0xff] }
 0x125   :  { %4966 = vmatprep.mubr.msk.bf16.mxu0 %vm629_vm0, %v411_v36  ;;  %5007 = vmatpush3.bf16.xpose.msra.mxu0 %v1531_v33  ;;  %v1688_v33 = vsel %vm629_vm0, %v627_v27, 0  ;;  %v628_v34 = vpack.c.bf16 %v564_v32, %v563_v57  ;;  %v144_v36 = vld [vmem:[%s9978_s1 + $0x318] sm:$0xff] }
 0x126   :  { %5373 = vmatprep.subr.msk.bf16.mxu0 %vm629_vm0, %v616_v35  ;;  %v143_v35 = vld [vmem:[%s9978_s1 + $0x310] sm:$0xff]  ;;  %v344_v43 = vmul.f32 %v6843_v44, %v144_v36 }
 0x127   :  { %v1691_v41 = vsel %vm629_vm0, %v628_v34, 0  ;;  %v343_v42 = vmul.f32 %v6843_v44, %v143_v35 }
 0x128   :  { %4995 = vmatmul.mubr.msk.bf16.gmra.mrb[40].mxu1 %vm629_vm0, %v418_v48  ;;  %v160_v48 = vld [vmem:[%s9978_s1 + $0x398] sm:$0xff] }
 0x129   :  { %4998 = vmatprep.mubr.msk.bf16.mxu1 %vm629_vm0, %v419_v52  ;;  %5039 = vmatpush3.bf16.xpose.msra.mxu1 %v1676_v49  ;;  %v161_v49 = vld [vmem:[%s9978_s1 + $0x3a0] sm:$0xff]  ;;  %v422_v50 = vpack.c.bf16 %v344_v43, %v343_v42  ;;  %v360_v52 = vmul.f32 %v6871_v58, %v160_v48  ;;  %v172_v42 = vld [vmem:[%s9978_s1 + $0x3f8] sm:$0xff] }
 0x12a   :  { %5381 = vmatprep.subr.msk.bf16.mxu1 %vm629_vm0, %v624_v51  ;;  %v359_v51 = vmul.f32 %v6871_v58, %v159_v47  ;;  %v361_v54 = vmul.f32 %v6871_v58, %v161_v49  ;;  %v372_v48 = vmul.f32 %v6871_v58, %v172_v42 }
 0x12c   :  { %4967 = vmatmul.mubr.msk.bf16.gmra.mrb[44].mxu0 %vm629_vm0, %v412_v63  ;;  %v430_v62 = vpack.c.bf16 %v360_v52, %v359_v51  ;;  %v347_v63 = vmul.f32 %v6843_v44, %v147_v23  ;;  %v431_v1 = vpack.c.bf16 %v362_v55, %v361_v54 }
 0x12d   :  { %5009 = vmatpush3.bf16.xpose.msra.mxu0 %v1534_v0  ;;  %5018 = vmatprep.mubr.msk.bf16.mxu0 %vm629_vm0, %v421_v3  ;;  %v348_v0 = vmul.f32 %v6843_v44, %v148_v56  ;;  %v350_v3 = vmul.f32 %v6843_v44, %v150_v61 }
 0x12e   :  { %5374 = vmatprep.subr.msk.bf16.mxu0 %vm629_vm0, %v617_v2  ;;  %v349_v2 = vmul.f32 %v6843_v44, %v149_v59 }
 0x130   :  { %4999 = vmatmul.mubr.msk.bf16.gmra.mrb[44].mxu1 %vm629_vm0, %v420_v39  ;;  %v424_v39 = vpack.c.bf16 %v348_v0, %v347_v63 }
 0x131   :  { %5041 = vmatpush3.bf16.xpose.msra.mxu1 %v1679_v8  ;;  %5050 = vmatprep.mubr.msk.bf16.mxu1 %vm629_vm0, %v429_v10  ;;  %v363_v8 = vmul.f32 %v6871_v58, %v163_v4  ;;  %v425_v10 = vpack.c.bf16 %v350_v3, %v349_v2 }
 0x132   :  { %5382 = vmatprep.subr.msk.bf16.mxu1 %vm629_vm0, %v625_v9  ;;  %v364_v9 = vmul.f32 %v6871_v58, %v164_v5 }
 0x135   :  { %5011 = vmatpush3.bf16.xpose.msra.mxu0 %v1537_v13  ;;  %v151_v13 = vld [vmem:[%s9978_s1 + $0x350] sm:$0xff] }
 0x136   :  { %5375 = vmatprep.subr.msk.bf16.mxu0 %vm629_vm0, %v618_v14  ;;  %v152_v14 = vld [vmem:[%s9978_s1 + $0x358] sm:$0xff] }
 0x137   :  { %v352_v19 = vmul.f32 %v6843_v44, %v152_v14 }
 0x139   :  { %5043 = vmatpush3.bf16.xpose.msra.mxu1 %v1682_v40  ;;  %v432_v40 = vpack.c.bf16 %v364_v9, %v363_v8 }
 0x13a   :  { %5383 = vmatprep.subr.msk.bf16.mxu1 %vm629_vm0, %v626_v17  ;;  %v351_v17 = vmul.f32 %v6843_v44, %v151_v13 }
 0x13c   :  { %v426_v28 = vpack.c.bf16 %v352_v19, %v351_v17 }
 0x13d   :  { %5013 = vmatpush3.bf16.xpose.msra.mxu0 %v1540_v21  ;;  %v353_v21 = vmul.f32 %v6843_v44, %v153_v15 }
 0x13e   :  { %5376 = vmatprep.subr.msk.bf16.mxu0 %vm629_vm0, %v619_v22  ;;  %v354_v22 = vmul.f32 %v6843_v44, %v154_v16 }
 0x141   :  { %5045 = vmatpush3.bf16.xpose.msra.mxu1 %v1685_v26  ;;  %v169_v26 = vld [vmem:[%s9978_s1 + $0x3e0] sm:$0xff] }
 0x142   :  { %5384 = vmatprep.subr.msk.bf16.mxu1 %vm629_vm0, %v627_v27  ;;  %v170_v27 = vld [vmem:[%s9978_s1 + $0x3e8] sm:$0xff]  ;;  %v369_v57 = vmul.f32 %v6871_v58, %v169_v26 }
 0x143   :  { %v370_v32 = vmul.f32 %v6871_v58, %v170_v27 }
 0x145   :  { %5015 = vmatpush3.bf16.xpose.msra.mxu0 %v1543_v30  ;;  %v368_v30 = vmul.f32 %v6871_v58, %v168_v25  ;;  %v435_v38 = vpack.c.bf16 %v370_v32, %v369_v57 }
 0x146   :  { %5377 = vmatprep.subr.msk.bf16.mxu0 %vm629_vm0, %v620_v31  ;;  %v427_v31 = vpack.c.bf16 %v354_v22, %v353_v21 }
 0x149   :  { %5047 = vmatpush3.bf16.xpose.msra.mxu1 %v1688_v33  ;;  %v155_v33 = vld [vmem:[%s9978_s1 + $0x370] sm:$0xff] }
 0x14a   :  { %5385 = vmatprep.subr.msk.bf16.mxu1 %vm629_vm0, %v628_v34  ;;  %v156_v34 = vld [vmem:[%s9978_s1 + $0x378] sm:$0xff]  ;;  %v355_v35 = vmul.f32 %v6843_v44, %v155_v33 }
 0x14b   :  { %v356_v36 = vmul.f32 %v6843_v44, %v156_v34 }
 0x14d   :  { %5017 = vmatpush3.bf16.xpose.msra.mxu0 %v1546_v60  ;;  %v434_v60 = vpack.c.bf16 %v368_v30, %v367_v29  ;;  %v428_v46 = vpack.c.bf16 %v356_v36, %v355_v35 }
 0x151   :  { %5049 = vmatpush3.bf16.xpose.msra.mxu1 %v1691_v41  ;;  %v171_v41 = vld [vmem:[%s9978_s1 + $0x3f0] sm:$0xff] }
 0x152   :  { %v371_v47 = vmul.f32 %v6871_v58, %v171_v41 }
 0x154   :  { %5019 = vmatmul.mubr.msk.bf16.vlgmr.msra.gmra.mrb[48].mxu0 %vm629_vm0, %v422_v50  ;;  %v436_v52 = vpack.c.bf16 %v372_v48, %v371_v47 }
 0x155   :  { %5022 = vmatprep.mubr.msk.bf16.mxu0 %vm629_vm0, %v423_v53 }
 0x158   :  { %5051 = vmatmul.mubr.msk.bf16.vlgmr.msra.gmra.mrb[48].mxu1 %vm629_vm0, %v430_v62 }
 0x159   :  { %5054 = vmatprep.mubr.msk.bf16.mxu1 %vm629_vm0, %v431_v1 }
 0x15c   :  { %5023 = vmatmul.mubr.msk.bf16.gmra.mrb[52].mxu0 %vm629_vm0, %v424_v39 }
 0x15d   :  { %5026 = vmatprep.mubr.msk.bf16.mxu0 %vm629_vm0, %v425_v10 }
 0x160   :  { %5055 = vmatmul.mubr.msk.bf16.gmra.mrb[52].mxu1 %vm629_vm0, %v432_v40 }
 0x161   :  { %5058 = vmatprep.mubr.msk.bf16.mxu1 %vm629_vm0, %v433_v20 }
 0x164   :  { %5027 = vmatmul.mubr.msk.bf16.gmra.mrb[56].mxu0 %vm629_vm0, %v426_v28 }
 0x165   :  { %5030 = vmatprep.mubr.msk.bf16.mxu0 %vm629_vm0, %v427_v31 }
 0x167   :  { %v7064_v37 = vpop.f32.mrb[0].mxu0 }
 0x168   :  { %5059 = vmatmul.mubr.msk.bf16.gmra.mrb[56].mxu1 %vm629_vm0, %v434_v60  ;;  %1794 = vmax.xlane.f32.xlu1 %v7064_v37  ;;  %v7074_v43 = vpop.f32.mrb[1].mxu0 }
 0x169   :  { %5062 = vmatprep.mubr.msk.bf16.mxu1 %vm629_vm0, %v435_v38  ;;  %1790 = vmax.xlane.f32.xlu0 %v7074_v43  ;;  %v7078_v44 = vpop.f32.mrb[2].mxu0 }
 0x16a   :  { %v7080_v45 = vpop.f32.mrb[3].mxu0 }
 0x16b   :  { %v7084_v49 = vpop.f32.mrb[0].mxu1 }
 0x16c   :  { %5031 = vmatmul.mubr.msk.bf16.gmra.mrb[60].mxu0 %vm629_vm0, %v428_v46  ;;  %1826 = vmax.xlane.f32.xlu1 %v7084_v49  ;;  %v7088_v18 = vpop.f32.mrb[1].mxu1 }
 0x16d   :  { %1822 = vmax.xlane.f32.xlu0 %v7088_v18  ;;  %v7091_v50 = vpop.f32.mrb[2].mxu1 }
 0x16e   :  { %v7093_v51 = vpop.f32.mrb[3].mxu1 }
 0x16f   :  { %v7095_v53 = vpop.f32.mrb[4].mxu0 }
 0x170   :  { %5063 = vmatmul.mubr.msk.bf16.gmra.mrb[60].mxu1 %vm629_vm0, %v436_v52  ;;  %v7098_v58 = vpop.f32.mrb[5].mxu0  ;;  %1792 = vmax.xlane.f32.xlu1 %v7080_v45 }
 0x171   :  { %v7101_v54 = vpop.f32.mrb[6].mxu0  ;;  %1796 = vmax.xlane.f32.xlu0 %v7078_v44 }
 0x172   :  { %v7104_v55 = vpop.f32.mrb[7].mxu0 }
 0x173   :  { %v7106_v23 = vpop.f32.mrb[4].mxu1 }
 0x174   :  { %1802 = vmax.xlane.f32.xlu1 %v7095_v53  ;;  %v7109_v56 = vpop.f32.mrb[5].mxu1 }
 0x175   :  { %1828 = vmax.xlane.f32.xlu0 %v7091_v50  ;;  %v7112_v59 = vpop.f32.mrb[6].mxu1 }
 0x176   :  { %v7114_v61 = vpop.f32.mrb[7].mxu1 }
 0x177   :  { %v7116_v62 = vpop.f32.mrb[8].mxu0 }
 0x178   :  { %v7118_v63 = vpop.f32.mrb[9].mxu0  ;;  %1834 = vmax.xlane.f32.xlu1 %v7106_v23 }
 0x179   :  { %v7121_v0 = vpop.f32.mrb[10].mxu0  ;;  %1824 = vmax.xlane.f32.xlu0 %v7093_v51 }
 0x17a   :  { %v7124_v1 = vpop.f32.mrb[11].mxu0 }
 0x17b   :  { %v7126_v2 = vpop.f32.mrb[8].mxu1 }
 0x17c   :  { %1798 = vmax.xlane.f32.xlu1 %v7098_v58  ;;  %v7129_v3 = vpop.f32.mrb[9].mxu1 }
 0x17d   :  { %1804 = vmax.xlane.f32.xlu0 %v7101_v54  ;;  %v7132_v4 = vpop.f32.mrb[10].mxu1 }
 0x17e   :  { %v7134_v5 = vpop.f32.mrb[11].mxu1 }
 0x17f   :  { %10272 = vst [vmem:[#allocation2_spill] sm:$0xff] %v7134_v5  ;;  %v7136_v6 = vpop.f32.mrb[12].mxu0 }
 0x180   :  { %10273 = vst [vmem:[#allocation3_spill] sm:$0xff] %v7136_v6  ;;  %v7138_v7 = vpop.f32.mrb[13].mxu0  ;;  %1830 = vmax.xlane.f32.xlu1 %v7109_v56 }
 0x181   :  { %10274 = vst [vmem:[#allocation4_spill] sm:$0xff] %v7138_v7  ;;  %v7141_v39 = vpop.f32.mrb[14].mxu0  ;;  %1836 = vmax.xlane.f32.xlu0 %v7112_v59 }
 0x182   :  { %10275 = vst [vmem:[#allocation5_spill] sm:$0xff] %v7141_v39  ;;  %v7144_v8 = vpop.f32.mrb[15].mxu0 }
 0x183   :  { %10276 = vst [vmem:[#allocation6_spill] sm:$0xff] %v7144_v8  ;;  %v7146_v9 = vpop.f32.mrb[12].mxu1 }
 0x184   :  { %10277 = vst [vmem:[#allocation7_spill] sm:$0xff] %v7146_v9  ;;  %1810 = vmax.xlane.f32.xlu1 %v7116_v62  ;;  %v7149_v10 = vpop.f32.mrb[13].mxu1 }
 0x185   :  { %10278 = vst [vmem:[#allocation8_spill] sm:$0xff] %v7149_v10  ;;  %1800 = vmax.xlane.f32.xlu0 %v7104_v55  ;;  %v7152_v11 = vpop.f32.mrb[14].mxu1 }
 0x186   :  { %10279 = vst [vmem:[#allocation9_spill] sm:$0xff] %v7152_v11  ;;  %v7154_v12 = vpop.f32.mrb[15].mxu1 }
 0x187   :  { %10280 = vst [vmem:[#allocation10_spill] sm:$0xff] %v7154_v12 }
 0x188   :  { %1842 = vmax.xlane.f32.xlu1 %v7126_v2 }
 0x189   :  { %1832 = vmax.xlane.f32.xlu0 %v7114_v61 }
 0x18c   :  { %1806 = vmax.xlane.f32.xlu1 %v7118_v63 }
 0x18d   :  { %1812 = vmax.xlane.f32.xlu0 %v7121_v0 }
 0x190   :  { %1838 = vmax.xlane.f32.xlu1 %v7129_v3 }
 0x191   :  { %1844 = vmax.xlane.f32.xlu0 %v7132_v4 }
 0x194   :  { %1818 = vmax.xlane.f32.xlu1 %v7136_v6 }
 0x195   :  { %1808 = vmax.xlane.f32.xlu0 %v7124_v1 }
 0x198   :  { %1850 = vmax.xlane.f32.xlu1 %v7146_v9 }
 0x199   :  { %1840 = vmax.xlane.f32.xlu0 %v7134_v5 }
 0x19c   :  { %1814 = vmax.xlane.f32.xlu1 %v7138_v7 }
 0x19d   :  { %1820 = vmax.xlane.f32.xlu0 %v7141_v39 }
 0x1a0   :  { %1846 = vmax.xlane.f32.xlu1 %v7149_v10 }
 0x1a1   :  { %1852 = vmax.xlane.f32.xlu0 %v7152_v11 }
 0x1a5   :  { %1816 = vmax.xlane.f32.xlu0 %v7144_v8 }
 0x1a7   :  { %v7171_v13 = vpop.f32.mrb[16].mxu0 }
 0x1a8   :  { %v7173_v14 = vpop.f32.mrb[17].mxu0  ;;  %1858 = vmax.xlane.f32.xlu1 %v7171_v13 }
 0x1a9   :  { %v7176_v15 = vpop.f32.mrb[18].mxu0  ;;  %1848 = vmax.xlane.f32.xlu0 %v7154_v12 }
 0x1aa   :  { %v7179_v16 = vpop.f32.mrb[19].mxu0 }
 0x1ab   :  { %10281 = vst [vmem:[#allocation11_spill] sm:$0xff] %v7179_v16  ;;  %v7181_v40 = vpop.f32.mrb[16].mxu1 }
 0x1ac   :  { %1890 = vmax.xlane.f32.xlu1 %v7181_v40  ;;  %v7184_v17 = vpop.f32.mrb[17].mxu1 }
 0x1ad   :  { %10282 = vst [vmem:[#allocation12_spill] sm:$0xff] %v7184_v17  ;;  %v7186_v19 = vpop.f32.mrb[18].mxu1  ;;  %1860 = vmax.xlane.f32.xlu0 %v7176_v15 }
 0x1ae   :  { %v7189_v20 = vpop.f32.mrb[19].mxu1 }
 0x1af   :  { %10283 = vst [vmem:[#allocation13_spill] sm:$0xff] %v7189_v20  ;;  %v7191_v21 = vpop.f32.mrb[20].mxu0 }
 0x1b0   :  { %10284 = vst [vmem:[#allocation14_spill] sm:$0xff] %v7191_v21  ;;  %v7193_v22 = vpop.f32.mrb[21].mxu0  ;;  %1854 = vmax.xlane.f32.xlu1 %v7173_v14 }
 0x1b1   :  { %10285 = vst [vmem:[#allocation15_spill] sm:$0xff] %v7193_v22  ;;  %v7196_v24 = vpop.f32.mrb[22].mxu0  ;;  %1892 = vmax.xlane.f32.xlu0 %v7186_v19 }
 0x1b2   :  { %10286 = vst [vmem:[#allocation16_spill] sm:$0xff] %v7196_v24  ;;  %v7199_v25 = vpop.f32.mrb[23].mxu0 }
 0x1b3   :  { %10287 = vst [vmem:[#allocation17_spill] sm:$0xff] %v7199_v25  ;;  %v7201_v26 = vpop.f32.mrb[20].mxu1 }
 0x1b4   :  { %10288 = vst [vmem:[#allocation18_spill] sm:$0xff] %v7201_v26  ;;  %1886 = vmax.xlane.f32.xlu1 %v7184_v17  ;;  %v7204_v27 = vpop.f32.mrb[21].mxu1 }
 0x1b5   :  { %10289 = vst [vmem:[#allocation19_spill] sm:$0xff] %v7204_v27  ;;  %v7206_v28 = vpop.f32.mrb[22].mxu1  ;;  %1856 = vmax.xlane.f32.xlu0 %v7179_v16 }
 0x1b6   :  { %10290 = vst [vmem:[#allocation20_spill] sm:$0xff] %v7206_v28  ;;  %v7209_v29 = vpop.f32.mrb[23].mxu1 }
 0x1b7   :  { %10291 = vst [vmem:[#allocation21_spill] sm:$0xff] %v7209_v29  ;;  %v7211_v30 = vpop.f32.mrb[24].mxu0 }
 0x1b8   :  { %10292 = vst [vmem:[#allocation22_spill] sm:$0xff] %v7211_v30  ;;  %v7213_v31 = vpop.f32.mrb[25].mxu0  ;;  %1866 = vmax.xlane.f32.xlu1 %v7191_v21 }
 0x1b9   :  { %10293 = vst [vmem:[#allocation23_spill] sm:$0xff] %v7213_v31  ;;  %v7216_v57 = vpop.f32.mrb[26].mxu0  ;;  %1888 = vmax.xlane.f32.xlu0 %v7189_v20 }
 0x1ba   :  { %10294 = vst [vmem:[#allocation24_spill] sm:$0xff] %v7216_v57  ;;  %v7219_v32 = vpop.f32.mrb[27].mxu0 }
 0x1bb   :  { %10295 = vst [vmem:[#allocation25_spill] sm:$0xff] %v7219_v32  ;;  %v7221_v33 = vpop.f32.mrb[24].mxu1 }
 0x1bc   :  { %10296 = vst [vmem:[#allocation26_spill] sm:$0xff] %v7221_v33  ;;  %1898 = vmax.xlane.f32.xlu1 %v7201_v26  ;;  %v7224_v34 = vpop.f32.mrb[25].mxu1 }
 0x1bd   :  { %10297 = vst [vmem:[#allocation27_spill] sm:$0xff] %v7224_v34  ;;  %v7226_v60 = vpop.f32.mrb[26].mxu1  ;;  %1868 = vmax.xlane.f32.xlu0 %v7196_v24 }
 0x1be   :  { %10298 = vst [vmem:[#allocation28_spill] sm:$0xff] %v7226_v60  ;;  %v7229_v35 = vpop.f32.mrb[27].mxu1 }
 0x1bf   :  { %10299 = vst [vmem:[#allocation29_spill] sm:$0xff] %v7229_v35  ;;  %v7231_v36 = vpop.f32.mrb[28].mxu0 }
 0x1c0   :  { %10300 = vst [vmem:[#allocation30_spill] sm:$0xff] %v7231_v36  ;;  %v7233_v38 = vpop.f32.mrb[29].mxu0  ;;  %1862 = vmax.xlane.f32.xlu1 %v7193_v22 }
 0x1c1   :  { %10301 = vst [vmem:[#allocation31_spill] sm:$0xff] %v7233_v38  ;;  %v7236_v41 = vpop.f32.mrb[30].mxu0  ;;  %1900 = vmax.xlane.f32.xlu0 %v7206_v28 }
 0x1c2   :  { %10302 = vst [vmem:[#allocation32_spill] sm:$0xff] %v7236_v41  ;;  %v7239_v42 = vpop.f32.mrb[31].mxu0 }
 0x1c3   :  { %10303 = vst [vmem:[#allocation33_spill] sm:$0xff] %v7239_v42  ;;  %v7241_v46 = vpop.f32.mrb[28].mxu1 }
 0x1c4   :  { %10304 = vst [vmem:[#allocation34_spill] sm:$0xff] %v7241_v46  ;;  %1894 = vmax.xlane.f32.xlu1 %v7204_v27  ;;  %v7244_v47 = vpop.f32.mrb[29].mxu1 }
 0x1c5   :  { %10305 = vst [vmem:[#allocation35_spill] sm:$0xff] %v7244_v47  ;;  %v7246_v48 = vpop.f32.mrb[30].mxu1  ;;  %1864 = vmax.xlane.f32.xlu0 %v7199_v25 }
 0x1c6   :  { %10306 = vst [vmem:[#allocation36_spill] sm:$0xff] %v7246_v48  ;;  %v7249_v52 = vpop.f32.mrb[31].mxu1 }
 0x1c7   :  { %10307 = vst [vmem:[#allocation37_spill] sm:$0xff] %v7249_v52 }
 0x1c8   :  { %1874 = vmax.xlane.f32.xlu1 %v7211_v30 }
 0x1c9   :  { %1896 = vmax.xlane.f32.xlu0 %v7209_v29 }
 0x1cc   :  { %1906 = vmax.xlane.f32.xlu1 %v7221_v33 }
 0x1cd   :  { %1876 = vmax.xlane.f32.xlu0 %v7216_v57 }
 0x1d0   :  { %1870 = vmax.xlane.f32.xlu1 %v7213_v31 }
 0x1d1   :  { %1908 = vmax.xlane.f32.xlu0 %v7226_v60 }
 0x1d4   :  { %1902 = vmax.xlane.f32.xlu1 %v7224_v34 }
 0x1d5   :  { %1872 = vmax.xlane.f32.xlu0 %v7219_v32 }
 0x1d8   :  { %1882 = vmax.xlane.f32.xlu1 %v7231_v36 }
 0x1d9   :  { %1904 = vmax.xlane.f32.xlu0 %v7229_v35 }
 0x1dc   :  { %1914 = vmax.xlane.f32.xlu1 %v7241_v46 }
 0x1dd   :  { %1884 = vmax.xlane.f32.xlu0 %v7236_v41 }
 0x1e0   :  { %1878 = vmax.xlane.f32.xlu1 %v7233_v38 }
 0x1e1   :  { %1916 = vmax.xlane.f32.xlu0 %v7246_v48 }
 0x1e4   :  { %1910 = vmax.xlane.f32.xlu1 %v7244_v47 }
 0x1e5   :  { %1880 = vmax.xlane.f32.xlu0 %v7239_v42 }
 0x1e7   :  { %v7267_v60 = vpop.f32.mrb[32].mxu0 }
 0x1e8   :  { %10308 = vst [vmem:[#allocation38_spill] sm:$0xff] %v7267_v60  ;;  %1922 = vmax.xlane.f32.xlu1 %v7267_v60  ;;  %v7270_v32 = vpop.f32.mrb[33].mxu0 }
 0x1e9   :  { %10309 = vst [vmem:[#allocation39_spill] sm:$0xff] %v7270_v32  ;;  %v7272_v36 = vpop.f32.mrb[34].mxu0  ;;  %1912 = vmax.xlane.f32.xlu0 %v7249_v52 }
 0x1ea   :  { %10310 = vst [vmem:[#allocation40_spill] sm:$0xff] %v7272_v36  ;;  %v7275_v46 = vpop.f32.mrb[35].mxu0 }
 0x1eb   :  { %10311 = vst [vmem:[#allocation41_spill] sm:$0xff] %v7275_v46  ;;  %v7277_v41 = vpop.f32.mrb[32].mxu1 }
 0x1ec   :  { %10312 = vst [vmem:[#allocation42_spill] sm:$0xff] %v7277_v41  ;;  %v7279_v38 = vpop.f32.mrb[33].mxu1  ;;  %1954 = vmax.xlane.f32.xlu1 %v7277_v41 }
 0x1ed   :  { %10313 = vst [vmem:[#allocation43_spill] sm:$0xff] %v7279_v38  ;;  %v7282_v47 = vpop.f32.mrb[34].mxu1  ;;  %1924 = vmax.xlane.f32.xlu0 %v7272_v36 }
 0x1ee   :  { %10314 = vst [vmem:[#allocation44_spill] sm:$0xff] %v7282_v47  ;;  %v7285_v42 = vpop.f32.mrb[35].mxu1 }
 0x1ef   :  { %10315 = vst [vmem:[#allocation45_spill] sm:$0xff] %v7285_v42  ;;  %v7287_v60 = vpop.f32.mrb[36].mxu0 }
 0x1f0   :  { %10316 = vst [vmem:[#allocation46_spill] sm:$0xff] %v7287_v60  ;;  %1918 = vmax.xlane.f32.xlu1 %v7270_v32  ;;  %v7290_v48 = vpop.f32.mrb[37].mxu0 }
 0x1f1   :  { %10317 = vst [vmem:[#allocation47_spill] sm:$0xff] %v7290_v48  ;;  %v7292_v52 = vpop.f32.mrb[38].mxu0  ;;  %1956 = vmax.xlane.f32.xlu0 %v7282_v47 }
 0x1f2   :  { %10318 = vst [vmem:[#allocation48_spill] sm:$0xff] %v7292_v52  ;;  %v7295_v35 = vpop.f32.mrb[39].mxu0 }
 0x1f3   :  { %10319 = vst [vmem:[#allocation49_spill] sm:$0xff] %v7295_v35  ;;  %v7297_v34 = vpop.f32.mrb[36].mxu1 }
 0x1f4   :  { %10320 = vst [vmem:[#allocation50_spill] sm:$0xff] %v7297_v34  ;;  %v7299_v41 = vpop.f32.mrb[37].mxu1  ;;  %1950 = vmax.xlane.f32.xlu1 %v7279_v38 }
 0x1f5   :  { %10321 = vst [vmem:[#allocation51_spill] sm:$0xff] %v7299_v41  ;;  %v7302_v36 = vpop.f32.mrb[38].mxu1  ;;  %v1795_v31 = vpop.xlane.xlu1 %1794  ;;  %1920 = vmax.xlane.f32.xlu0 %v7275_v46 }
 0x1f6   :  { %10322 = vst [vmem:[#allocation52_spill] sm:$0xff] %v7302_v36  ;;  %v7305_v32 = vpop.f32.mrb[39].mxu1  ;;  %v7307_v57 = vpop.xlane.xlu0 %1790 }
 0x1f7   :  { %10323 = vst [vmem:[#allocation53_spill] sm:$0xff] %v7305_v32  ;;  %v7309_v33 = vpop.f32.mrb[40].mxu0 }
 0x1f8   :  { %10324 = vst [vmem:[#allocation54_spill] sm:$0xff] %v7309_v33  ;;  %1930 = vmax.xlane.f32.xlu1 %v7287_v60  ;;  %v7312_v47 = vpop.f32.mrb[41].mxu0 }
 0x1f9   :  { %10325 = vst [vmem:[#allocation55_spill] sm:$0xff] %v7312_v47  ;;  %v7314_v29 = vpop.f32.mrb[42].mxu0  ;;  %v1827_v30 = vpop.xlane.xlu1 %1826  ;;  %1952 = vmax.xlane.f32.xlu0 %v7285_v42 }
 0x1fa   :  { %10326 = vst [vmem:[#allocation56_spill] sm:$0xff] %v7314_v29  ;;  %v7317_v38 = vpop.f32.mrb[43].mxu0  ;;  %v7319_v12 = vpop.xlane.xlu0 %1822 }
 0x1fb   :  { %10327 = vst [vmem:[#allocation57_spill] sm:$0xff] %v7317_v38  ;;  %v7321_v46 = vpop.f32.mrb[40].mxu1 }
 0x1fc   :  { %10328 = vst [vmem:[#allocation58_spill] sm:$0xff] %v7321_v46  ;;  %v7323_v25 = vpop.f32.mrb[41].mxu1  ;;  %1962 = vmax.xlane.f32.xlu1 %v7297_v34 }
 0x1fd   :  { %10329 = vst [vmem:[#allocation59_spill] sm:$0xff] %v7323_v25  ;;  %v7326_v27 = vpop.f32.mrb[42].mxu1  ;;  %v7328_v60 = vpop.xlane.xlu1 %1792  ;;  %1932 = vmax.xlane.f32.xlu0 %v7292_v52 }
 0x1fe   :  { %10330 = vst [vmem:[#allocation60_spill] sm:$0xff] %v7326_v27  ;;  %v7331_v8 = vpop.f32.mrb[43].mxu1  ;;  %v1797_v10 = vpop.xlane.xlu0 %1796 }
 0x1ff   :  { %10331 = vst [vmem:[#allocation61_spill] sm:$0xff] %v7331_v8  ;;  %v7333_v42 = vpop.f32.mrb[44].mxu0 }
 0x200   :  { %10332 = vst [vmem:[#allocation62_spill] sm:$0xff] %v7333_v42  ;;  %1926 = vmax.xlane.f32.xlu1 %v7290_v48  ;;  %v7336_v28 = vpop.f32.mrb[45].mxu0 }
 0x201   :  { %10333 = vst [vmem:[#allocation63_spill] sm:$0xff] %v7336_v28  ;;  %v7338_v22 = vpop.f32.mrb[46].mxu0  ;;  %v7340_v11 = vpop.xlane.xlu1 %1802  ;;  %1964 = vmax.xlane.f32.xlu0 %v7302_v36 }
 0x202   :  { %10334 = vst [vmem:[#allocation64_spill] sm:$0xff] %v7338_v22  ;;  %v7343_v34 = vpop.f32.mrb[47].mxu0  ;;  %v1829_v7 = vpop.xlane.xlu0 %1828 }
 0x203   :  { %10335 = vst [vmem:[#allocation65_spill] sm:$0xff] %v7343_v34  ;;  %v7345_v24 = vpop.f32.mrb[44].mxu1 }
 0x204   :  { %10336 = vst [vmem:[#allocation66_spill] sm:$0xff] %v7345_v24  ;;  %v7347_v52 = vpop.f32.mrb[45].mxu1  ;;  %1958 = vmax.xlane.f32.xlu1 %v7299_v41 }
 0x205   :  { %10337 = vst [vmem:[#allocation67_spill] sm:$0xff] %v7347_v52  ;;  %v7350_v26 = vpop.f32.mrb[46].mxu1  ;;  %v7352_v48 = vpop.xlane.xlu1 %1834  ;;  %1928 = vmax.xlane.f32.xlu0 %v7295_v35 }
 0x206   :  { %10338 = vst [vmem:[#allocation68_spill] sm:$0xff] %v7350_v26  ;;  %v7355_v39 = vpop.f32.mrb[47].mxu1  ;;  %v7357_v9 = vpop.xlane.xlu0 %1824 }
 0x207   :  { %10339 = vst [vmem:[#allocation69_spill] sm:$0xff] %v7355_v39 }
 0x208   :  { %1938 = vmax.xlane.f32.xlu1 %v7309_v33 }
 0x209   :  { %v7360_v36 = vpop.xlane.xlu1 %1798  ;;  %1960 = vmax.xlane.f32.xlu0 %v7305_v32  ;;  %v2048_v32 = vsub.f32 %v7064_v37, %v1795_v31  ;;  %v2046_v37 = vsub.f32 %v7074_v43, %v7307_v57  ;;  %v2047_v43 = vsub.f32 %v7080_v45, %v7328_v60  ;;  %v2063_v45 = vsub.f32 %v7093_v51, %v7357_v9 }
 0x20a   :  { %v7363_v20 = vpop.xlane.xlu0 %1804 }
 0x20b   :  { %v2208_v51 = vmul.f32 1.442695, %v2063_v45  ;;  %v2053_v9 = vsub.f32 %v7101_v54, %v7363_v20  ;;  %v2050_v54 = vsub.f32 %v7098_v58, %v7360_v36 }
 0x20c   :  { %1970 = vmax.xlane.f32.xlu1 %v7321_v46 }
 0x20d   :  { %v7366_v41 = vpop.xlane.xlu1 %1830  ;;  %1940 = vmax.xlane.f32.xlu0 %v7314_v29  ;;  %v2178_v29 = vmul.f32 1.442695, %v2048_v32  ;;  %v2182_v36 = vmul.f32 1.442695, %v2050_v54 }
 0x20e   :  { %v7369_v21 = vpop.xlane.xlu0 %1836 }
 0x20f   :  { %5405 = vpow2.f32 %v2178_v29 }
 0x210   :  { %1934 = vmax.xlane.f32.xlu1 %v7312_v47  ;;  %v2064_v47 = vsub.f32 %v7084_v49, %v1827_v30  ;;  %v2065_v30 = vsub.f32 %v7091_v50, %v1829_v7  ;;  %v2052_v7 = vsub.f32 %v7095_v53, %v7340_v11  ;;  %v2068_v11 = vsub.f32 %v7106_v23, %v7352_v48 }
 0x211   :  { %v7372_v35 = vpop.xlane.xlu1 %1810  ;;  %1972 = vmax.xlane.f32.xlu0 %v7326_v27  ;;  %v2049_v27 = vsub.f32 %v7078_v44, %v1797_v10  ;;  %v2174_v44 = vmul.f32 1.442695, %v2046_v37  ;;  %v2062_v10 = vsub.f32 %v7088_v18, %v7319_v12  ;;  %v2176_v18 = vmul.f32 1.442695, %v2047_v43 }
 0x212   :  { %v7375_v33 = vpop.xlane.xlu0 %1800  ;;  %v2210_v31 = vmul.f32 1.442695, %v2064_v47  ;;  %v2186_v53 = vmul.f32 1.442695, %v2052_v7  ;;  %v2188_v7 = vmul.f32 1.442695, %v2053_v9 }
 0x213   :  { %v2180_v49 = vmul.f32 1.442695, %v2049_v27  ;;  %v2212_v27 = vmul.f32 1.442695, %v2065_v30  ;;  %v2206_v50 = vmul.f32 1.442695, %v2062_v10 }
 0x214   :  { %1966 = vmax.xlane.f32.xlu1 %v7323_v25  ;;  %5407 = vpow2.f32 %v2210_v31 }
 0x215   :  { %v7379_v5 = vpop.xlane.xlu1 %1842  ;;  %1936 = vmax.xlane.f32.xlu0 %v7317_v38  ;;  %5409 = vpow2.f32 %v2180_v49 }
 0x216   :  { %v7382_v46 = vpop.xlane.xlu0 %1832  ;;  %5411 = vpow2.f32 %v2174_v44 }
 0x217   :  { %5413 = vpow2.f32 %v2212_v27 }
 0x218   :  { %1946 = vmax.xlane.f32.xlu1 %v7333_v42  ;;  %5415 = vpow2.f32 %v2206_v50  ;;  %v2218_v50 = vmul.f32 1.442695, %v2068_v11 }
 0x219   :  { %v7386_v6 = vpop.xlane.xlu1 %1806  ;;  %1968 = vmax.xlane.f32.xlu0 %v7331_v8  ;;  %v7421_v60 = vpop.eup %5405  ;;  %5417 = vpow2.f32 %v2176_v18  ;;  %v2069_v18 = vsub.f32 %v7112_v59, %v7369_v21 }
 0x21a   :  { %v7390_v25 = vpop.xlane.xlu0 %1812  ;;  %10340 = vst [vmem:[#allocation70_spill] sm:$0xff] %v7421_v60  ;;  %5419 = vpow2.f32 %v2186_v53 }
 0x21b   :  { %5421 = vpow2.f32 %v2208_v51  ;;  %v2066_v51 = vsub.f32 %v7109_v56, %v7366_v41  ;;  %v2220_v9 = vmul.f32 1.442695, %v2069_v18  ;;  %v2056_v18 = vsub.f32 %v7116_v62, %v7372_v35 }
 0x21c   :  { %1978 = vmax.xlane.f32.xlu1 %v7345_v24  ;;  %5423 = vpow2.f32 %v2218_v50 }
 0x21d   :  { %v7395_v38 = vpop.xlane.xlu1 %1838  ;;  %1948 = vmax.xlane.f32.xlu0 %v7338_v22  ;;  %5425 = vpow2.f32 %v2188_v7  ;;  %v2214_v7 = vmul.f32 1.442695, %v2066_v51 }
 0x21e   :  { %v7399_v32 = vpop.xlane.xlu0 %1844  ;;  %v7439_v10 = vpop.eup %5407  ;;  %5427 = vpow2.f32 %v2182_v36 }
 0x21f   :  { %10345 = vst [vmem:[#allocation75_spill] sm:$0xff] %v7439_v10  ;;  %v7445_v23 = vpop.eup %5409  ;;  %5429 = vpow2.f32 %v2220_v9 }
 0x220   :  { %1942 = vmax.xlane.f32.xlu1 %v7336_v28  ;;  %10347 = vst [vmem:[#allocation77_spill] sm:$0xff] %v7445_v23  ;;  %5431 = vpow2.f32 %v2214_v7 }
 0x221   :  { %v7404_v29 = vpop.xlane.xlu1 %1818  ;;  %1980 = vmax.xlane.f32.xlu0 %v7350_v26 }
 0x222   :  { %v7409_v57 = vpop.xlane.xlu0 %1808 }
 0x224   :  { %1974 = vmax.xlane.f32.xlu1 %v7347_v52 }
 0x225   :  { %v7414_v47 = vpop.xlane.xlu1 %1850  ;;  %1944 = vmax.xlane.f32.xlu0 %v7343_v34 }
 0x226   :  { %v7419_v12 = vpop.xlane.xlu0 %1840 }
 0x227   :  { %v7423_v37 = vpop.f32.mrb[48].mxu0 }
 0x228   :  { %10341 = vst [vmem:[#allocation71_spill] sm:$0xff] %v7423_v37  ;;  %2434 = vadd.xlane.f32.xlu1 %v7421_v60  ;;  %v7426_v31 = vpop.f32.mrb[49].mxu0 }
 0x229   :  { %10342 = vst [vmem:[#allocation72_spill] sm:$0xff] %v7426_v31  ;;  %v7430_v49 = vpop.f32.mrb[50].mxu0  ;;  %1976 = vmax.xlane.f32.xlu0 %v7355_v39  ;;  %v7441_v43 = vpop.xlane.xlu1 %1814 }
 0x22a   :  { %10343 = vst [vmem:[#allocation73_spill] sm:$0xff] %v7430_v49  ;;  %v7435_v30 = vpop.f32.mrb[51].mxu0  ;;  %v7437_v44 = vpop.xlane.xlu0 %1820 }
 0x22b   :  { %10344 = vst [vmem:[#allocation74_spill] sm:$0xff] %v7435_v30  ;;  %v7443_v27 = vpop.f32.mrb[48].mxu1  ;;  %v7461_v39 = vpop.eup %5411 }
 0x22c   :  { %10346 = vst [vmem:[#allocation76_spill] sm:$0xff] %v7443_v27  ;;  %v7447_v48 = vpop.f32.mrb[49].mxu1  ;;  %2466 = vadd.xlane.f32.xlu1 %v7439_v10  ;;  %10351 = vst [vmem:[#allocation81_spill] sm:$0xff] %v7461_v39  ;;  %v7465_v11 = vpop.eup %5413  ;;  %v2051_v10 = vsub.f32 %v7104_v55, %v7375_v33 }
 0x22d   :  { %10348 = vst [vmem:[#allocation78_spill] sm:$0xff] %v7447_v48  ;;  %v7452_v20 = vpop.f32.mrb[50].mxu1  ;;  %2436 = vadd.xlane.f32.xlu0 %v7445_v23  ;;  %10353 = vst [vmem:[#allocation83_spill] sm:$0xff] %v7465_v11  ;;  %v7472_v59 = vpop.xlane.xlu1 %1846 }
 0x22e   :  { %10349 = vst [vmem:[#allocation79_spill] sm:$0xff] %v7452_v20  ;;  %v7457_v45 = vpop.f32.mrb[51].mxu1  ;;  %v7459_v60 = vpop.xlane.xlu0 %1852 }
 0x22f   :  { %10350 = vst [vmem:[#allocation80_spill] sm:$0xff] %v7457_v45  ;;  %v7463_v53 = vpop.f32.mrb[52].mxu0  ;;  %v7483_v50 = vpop.eup %5415 }
 0x230   :  { %10352 = vst [vmem:[#allocation82_spill] sm:$0xff] %v7463_v53  ;;  %v7467_v58 = vpop.f32.mrb[53].mxu0  ;;  %2430 = vadd.xlane.f32.xlu1 %v7461_v39  ;;  %10357 = vst [vmem:[#allocation87_spill] sm:$0xff] %v7483_v50  ;;  %v7487_v56 = vpop.eup %5417  ;;  %v2067_v39 = vsub.f32 %v7114_v61, %v7382_v46  ;;  %v2072_v61 = vsub.f32 %v7126_v2, %v7379_v5  ;;  %v2073_v5 = vsub.f32 %v7132_v4, %v7399_v32 }
 0x231   :  { %10354 = vst [vmem:[#allocation84_spill] sm:$0xff] %v7467_v58  ;;  %v7474_v21 = vpop.f32.mrb[54].mxu0  ;;  %2468 = vadd.xlane.f32.xlu0 %v7465_v11  ;;  %10359 = vst [vmem:[#allocation89_spill] sm:$0xff] %v7487_v56  ;;  %v2184_v11 = vmul.f32 1.442695, %v2051_v10  ;;  %v7507_v51 = vpop.eup %5419  ;;  %v2070_v32 = vsub.f32 %v7129_v3, %v7395_v38  ;;  %v10390_v38 = vld [vmem:[#allocation2_spill] sm:$0xff] }
 0x232   :  { %10355 = vst [vmem:[#allocation85_spill] sm:$0xff] %v7474_v21  ;;  %v7479_v23 = vpop.f32.mrb[55].mxu0  ;;  %v7481_v34 = vpop.xlane.xlu0 %1816  ;;  %10363 = vst [vmem:[#allocation93_spill] sm:$0xff] %v7507_v51  ;;  %v2194_v10 = vmul.f32 1.442695, %v2056_v18 }
 0x233   :  { %10356 = vst [vmem:[#allocation86_spill] sm:$0xff] %v7479_v23  ;;  %v7485_v54 = vpop.f32.mrb[52].mxu1  ;;  %v7511_v35 = vpop.eup %5421  ;;  %5433 = vpow2.f32 %v2184_v11  ;;  %v2216_v52 = vmul.f32 1.442695, %v2067_v39  ;;  %v2228_v8 = vmul.f32 1.442695, %v2073_v5 }
 0x234   :  { %10358 = vst [vmem:[#allocation88_spill] sm:$0xff] %v7485_v54  ;;  %v7489_v41 = vpop.f32.mrb[53].mxu1  ;;  %2462 = vadd.xlane.f32.xlu1 %v7483_v50  ;;  %10365 = vst [vmem:[#allocation95_spill] sm:$0xff] %v7511_v35  ;;  %v7531_v18 = vpop.eup %5423  ;;  %5435 = vpow2.f32 %v2194_v10 }
 0x235   :  { %10360 = vst [vmem:[#allocation90_spill] sm:$0xff] %v7489_v41  ;;  %v7494_v55 = vpop.xlane.xlu1 %1858  ;;  %v7496_v33 = vpop.f32.mrb[54].mxu1  ;;  %2432 = vadd.xlane.f32.xlu0 %v7487_v56  ;;  %v2057_v56 = vsub.f32 %v7121_v0, %v7390_v25  ;;  %10369 = vst [vmem:[#allocation99_spill] sm:$0xff] %v7531_v18  ;;  %v2226_v0 = vmul.f32 1.442695, %v2072_v61  ;;  %v2054_v25 = vsub.f32 %v7118_v63, %v7386_v6  ;;  %5437 = vpow2.f32 %v2216_v52 }
 0x236   :  { %10361 = vst [vmem:[#allocation91_spill] sm:$0xff] %v7496_v33  ;;  %v7503_v50 = vpop.f32.mrb[55].mxu1  ;;  %v7505_v36 = vpop.xlane.xlu0 %1848  ;;  %v2055_v6 = vsub.f32 %v7124_v1, %v7409_v57  ;;  %v2222_v1 = vmul.f32 1.442695, %v2070_v32  ;;  %v10387_v57 = vld [vmem:[#allocation3_spill] sm:$0xff] }
 0x237   :  { %10362 = vst [vmem:[#allocation92_spill] sm:$0xff] %v7503_v50  ;;  %v7509_v62 = vpop.f32.mrb[56].mxu0  ;;  %v2196_v22 = vmul.f32 1.442695, %v2057_v56  ;;  %5439 = vpow2.f32 %v2226_v0  ;;  %v2190_v4 = vmul.f32 1.442695, %v2054_v25  ;;  %v2060_v5 = vsub.f32 %v10387_v57, %v7404_v29 }
 0x238   :  { %10364 = vst [vmem:[#allocation94_spill] sm:$0xff] %v7509_v62  ;;  %v7513_v26 = vpop.f32.mrb[57].mxu0  ;;  %2442 = vadd.xlane.f32.xlu1 %v7507_v51 }
 0x239   :  { %10366 = vst [vmem:[#allocation96_spill] sm:$0xff] %v7513_v26  ;;  %v7518_v46 = vpop.xlane.xlu1 %1890  ;;  %v7520_v9 = vpop.f32.mrb[58].mxu0  ;;  %2464 = vadd.xlane.f32.xlu0 %v7511_v35  ;;  %5441 = vpow2.f32 %v2196_v22  ;;  %v2202_v17 = vmul.f32 1.442695, %v2060_v5 }
 0x23a   :  { %10367 = vst [vmem:[#allocation97_spill] sm:$0xff] %v7520_v9  ;;  %v7527_v51 = vpop.f32.mrb[59].mxu0  ;;  %v7529_v7 = vpop.xlane.xlu0 %1860  ;;  %5443 = vpow2.f32 %v2190_v4 }
 0x23b   :  { %10368 = vst [vmem:[#allocation98_spill] sm:$0xff] %v7527_v51  ;;  %v7533_v2 = vpop.f32.mrb[56].mxu1  ;;  %v7537_v35 = vpop.eup %5425  ;;  %5445 = vpow2.f32 %v2228_v8  ;;  %v10397_v8 = vld [vmem:[#allocation7_spill] sm:$0xff] }
 0x23c   :  { %10370 = vst [vmem:[#allocation100_spill] sm:$0xff] %v7533_v2  ;;  %10371 = vst [vmem:[#allocation101_spill] sm:$0xff] %v7537_v35  ;;  %v7539_v39 = vpop.f32.mrb[57].mxu1  ;;  %2474 = vadd.xlane.f32.xlu1 %v7531_v18  ;;  %v7557_v61 = vpop.eup %5427  ;;  %5447 = vpow2.f32 %v2222_v1 }
 0x23d   :  { %10372 = vst [vmem:[#allocation102_spill] sm:$0xff] %v7539_v39  ;;  %v7544_v11 = vpop.xlane.xlu1 %1854  ;;  %v7546_v28 = vpop.f32.mrb[58].mxu1  ;;  %2444 = vadd.xlane.f32.xlu0 %v7537_v35  ;;  %10375 = vst [vmem:[#allocation105_spill] sm:$0xff] %v7557_v61 }
 0x23e   :  { %10373 = vst [vmem:[#allocation103_spill] sm:$0xff] %v7546_v28  ;;  %v7553_v18 = vpop.f32.mrb[59].mxu1  ;;  %v7555_v10 = vpop.xlane.xlu0 %1892 }
 0x23f   :  { %10374 = vst [vmem:[#allocation104_spill] sm:$0xff] %v7553_v18  ;;  %v7559_v63 = vpop.f32.mrb[60].mxu0  ;;  %v7563_v35 = vpop.eup %5429 }
 0x240   :  { %10376 = vst [vmem:[#allocation106_spill] sm:$0xff] %v7559_v63  ;;  %10377 = vst [vmem:[#allocation107_spill] sm:$0xff] %v7563_v35  ;;  %v7565_v52 = vpop.f32.mrb[61].mxu0  ;;  %2438 = vadd.xlane.f32.xlu1 %v7557_v61  ;;  %v7583_v25 = vpop.eup %5431 }
 0x241   :  { %10378 = vst [vmem:[#allocation108_spill] sm:$0xff] %v7565_v52  ;;  %v7570_v56 = vpop.xlane.xlu1 %1886  ;;  %v7572_v24 = vpop.f32.mrb[62].mxu0  ;;  %2476 = vadd.xlane.f32.xlu0 %v7563_v35  ;;  %10383 = vst [vmem:[#allocation113_spill] sm:$0xff] %v7583_v25 }
 0x242   :  { %10379 = vst [vmem:[#allocation109_spill] sm:$0xff] %v7570_v56  ;;  %10380 = vst [vmem:[#allocation110_spill] sm:$0xff] %v7572_v24  ;;  %v7579_v61 = vpop.f32.mrb[63].mxu0  ;;  %v7581_v0 = vpop.xlane.xlu0 %1856  ;;  %v2192_v56 = vmul.f32 1.442695, %v2055_v6  ;;  %v2076_v6 = vsub.f32 %v10397_v8, %v7414_v47 }
 0x243   :  { %10381 = vst [vmem:[#allocation111_spill] sm:$0xff] %v7579_v61  ;;  %10382 = vst [vmem:[#allocation112_spill] sm:$0xff] %v7581_v0  ;;  %v7585_v3 = vpop.f32.mrb[60].mxu1  ;;  %v7589_v35 = vpop.eup %5433  ;;  %v2071_v0 = vsub.f32 %v10390_v38, %v7419_v12  ;;  %v3390_v12 = vld [vmem:[%s9979_s3] sm:$0xff]  ;;  %v3391_v38 = vld [vmem:[%s9979_s3 + $0x8] sm:$0xff] }
 0x244   :  { %10384 = vst [vmem:[#allocation114_spill] sm:$0xff] %v7585_v3  ;;  %10385 = vst [vmem:[#allocation115_spill] sm:$0xff] %v7589_v35  ;;  %v7591_v22 = vpop.f32.mrb[61].mxu1  ;;  %2470 = vadd.xlane.f32.xlu1 %v7583_v25  ;;  %v7609_v32 = vpop.eup %5435  ;;  %v3518_v47 = vpack.c.bf16 %v3391_v38, %v3390_v12  ;;  %5449 = vpow2.f32 %v2192_v56  ;;  %v3392_v38 = vld [vmem:[%s9979_s3 + $0x10] sm:$0xff] }
 0x245   :  { %10386 = vst [vmem:[#allocation116_spill] sm:$0xff] %v7591_v22  ;;  %v7596_v42 = vpop.xlane.xlu1 %1866  ;;  %v7598_v61 = vpop.f32.mrb[62].mxu1  ;;  %2440 = vadd.xlane.f32.xlu0 %v7589_v35  ;;  %10394 = vst [vmem:[#allocation119_spill] sm:$0xff] %v7609_v32  ;;  %v10398_v35 = vld [vmem:[#allocation5_spill] sm:$0xff]  ;;  %v2224_v8 = vmul.f32 1.442695, %v2071_v0  ;;  %5451 = vpow2.f32 %v2202_v17 }
 0x246   :  { %10388 = vst [vmem:[#allocation3_spill] sm:$0xff] %v7596_v42  ;;  %10389 = vst [vmem:[#allocation117_spill] sm:$0xff] %v7598_v61  ;;  %v7605_v25 = vpop.f32.mrb[63].mxu1  ;;  %v7607_v4 = vpop.xlane.xlu0 %1888  ;;  %v2061_v57 = vsub.f32 %v10398_v35, %v7437_v44  ;;  %5066 = vmatprep.subr.bf16.mxu0 %v3518_v47  ;;  %v2234_v44 = vmul.f32 1.442695, %v2076_v6  ;;  %v10404_v35 = vld [vmem:[#allocation4_spill] sm:$0xff] }
 0x247   :  { %10392 = vst [vmem:[#allocation2_spill] sm:$0xff] %v7605_v25  ;;  %10393 = vst [vmem:[#allocation118_spill] sm:$0xff] %v7607_v4  ;;  %v7613_v22 = vpop.eup %5437  ;;  %5067 = vmatpush3.bf16.msra.mxu0 %v3518_v47  ;;  %v2058_v56 = vsub.f32 %v10404_v35, %v7441_v43  ;;  %v3393_v6 = vld [vmem:[%s9979_s3 + $0x18] sm:$0xff]  ;;  %v3406_v17 = vld [vmem:[%s9979_s3 + $0x80] sm:$0xff]  ;;  %5453 = vpow2.f32 %v2224_v8 }
 0x248   :  { %10396 = vst [vmem:[#allocation120_spill] sm:$0xff] %v7613_v22  ;;  %2450 = vadd.xlane.f32.xlu1 %v7609_v32  ;;  %v10399_v32 = vld [vmem:[#allocation18_spill] sm:$0xff]  ;;  %v7633_v42 = vpop.eup %5439  ;;  %v2204_v0 = vmul.f32 1.442695, %v2061_v57  ;;  %v10406_v43 = vld [vmem:[#allocation9_spill] sm:$0xff]  ;;  %v3519_v29 = vpack.c.bf16 %v3393_v6, %v3392_v38  ;;  %5455 = vpow2.f32 %v2234_v44  ;;  %v3395_v38 = vld [vmem:[%s9979_s3 + $0x28] sm:$0xff] }
 0x249   :  { %v7626_v4 = vpop.xlane.xlu1 %1898  ;;  %2472 = vadd.xlane.f32.xlu0 %v7613_v22  ;;  %10401 = vst [vmem:[#allocation5_spill] sm:$0xff] %v7633_v42  ;;  %v7637_v16 = vpop.eup %5441  ;;  %v2077_v57 = vsub.f32 %v10406_v43, %v7459_v60  ;;  %v3394_v60 = vld [vmem:[%s9979_s3 + $0x20] sm:$0xff]  ;;  %v3408_v6 = vld [vmem:[%s9979_s3 + $0x90] sm:$0xff]  ;;  %v2198_v43 = vmul.f32 1.442695, %v2058_v56  ;;  %v3409_v35 = vld [vmem:[%s9979_s3 + $0x98] sm:$0xff] }
 0x24a   :  { %v7631_v25 = vpop.xlane.xlu0 %1868  ;;  %10403 = vst [vmem:[#allocation18_spill] sm:$0xff] %v7637_v16  ;;  %5068 = vmatprep.subr.bf16.mxu0 %v3519_v29  ;;  %5457 = vpow2.f32 %v2204_v0  ;;  %v3397_v56 = vld [vmem:[%s9979_s3 + $0x38] sm:$0xff]  ;;  %v3410_v22 = vld [vmem:[%s9979_s3 + $0xa0] sm:$0xff] }
 0x24b   :  { %10400 = vst [vmem:[#allocation7_spill] sm:$0xff] %v7631_v25  ;;  %v3520_v25 = vpack.c.bf16 %v3395_v38, %v3394_v60  ;;  %v2236_v0 = vmul.f32 1.442695, %v2077_v57  ;;  %5069 = vmatpush3.bf16.msra.mxu0 %v3519_v29  ;;  %v3527_v38 = vpack.c.bf16 %v3409_v35, %v3408_v6  ;;  %v3398_v29 = vld [vmem:[%s9979_s3 + $0x40] sm:$0xff]  ;;  %v3412_v35 = vld [vmem:[%s9979_s3 + $0xb0] sm:$0xff]  ;;  %5459 = vpow2.f32 %v2198_v43 }
 0x24c   :  { %2482 = vadd.xlane.f32.xlu1 %v7633_v42  ;;  %v3407_v42 = vld [vmem:[%s9979_s3 + $0x88] sm:$0xff] }
 0x24d   :  { %v7642_v12 = vpop.xlane.xlu1 %1862  ;;  %2452 = vadd.xlane.f32.xlu0 %v7637_v16  ;;  %v7663_v16 = vpop.eup %5443  ;;  %v3526_v1 = vpack.c.bf16 %v3407_v42, %v3406_v17  ;;  %v10412_v42 = vld [vmem:[#allocation8_spill] sm:$0xff]  ;;  %5070 = vmatprep.subr.bf16.mxu0 %v3520_v25  ;;  %5461 = vpow2.f32 %v2236_v0 }
 0x24e   :  { %10405 = vst [vmem:[#allocation4_spill] sm:$0xff] %v7642_v12  ;;  %v7658_v5 = vpop.xlane.xlu0 %1900  ;;  %10409 = vst [vmem:[#allocation121_spill] sm:$0xff] %v7663_v16  ;;  %v7667_v8 = vpop.eup %5445  ;;  %v2074_v44 = vsub.f32 %v10412_v42, %v7472_v59  ;;  %v10414_v59 = vld [vmem:[#allocation6_spill] sm:$0xff]  ;;  %v3411_v12 = vld [vmem:[%s9979_s3 + $0xa8] sm:$0xff] }
 0x24f   :  { %10408 = vst [vmem:[#allocation9_spill] sm:$0xff] %v7658_v5  ;;  %10411 = vst [vmem:[#allocation122_spill] sm:$0xff] %v7667_v8  ;;  %5098 = vmatprep.subr.bf16.mxu1 %v3526_v1  ;;  %v2059_v42 = vsub.f32 %v10414_v59, %v7481_v34  ;;  %v7705_v57 = vpop.eup %5447  ;;  %5071 = vmatpush3.bf16.msra.mxu0 %v3520_v25  ;;  %v3401_v25 = vld [vmem:[%s9979_s3 + $0x58] sm:$0xff] }
 0x250   :  { %2446 = vadd.xlane.f32.xlu1 %v7663_v16  ;;  %v3396_v16 = vld [vmem:[%s9979_s3 + $0x30] sm:$0xff]  ;;  %5099 = vmatpush3.bf16.msra.mxu1 %v3526_v1  ;;  %10417 = vst [vmem:[#allocation123_spill] sm:$0xff] %v7705_v57  ;;  %v3399_v1 = vld [vmem:[%s9979_s3 + $0x48] sm:$0xff] }
 0x251   :  { %v7681_v17 = vpop.xlane.xlu1 %1894  ;;  %2484 = vadd.xlane.f32.xlu0 %v7667_v8  ;;  %v3521_v5 = vpack.c.bf16 %v3397_v56, %v3396_v16  ;;  %v7709_v8 = vpop.eup %5449  ;;  %5100 = vmatprep.subr.bf16.mxu1 %v3527_v38  ;;  %v2230_v16 = vmul.f32 1.442695, %v2074_v44  ;;  %v2200_v6 = vmul.f32 1.442695, %v2059_v42  ;;  %v10420_v56 = vld [vmem:[#allocation10_spill] sm:$0xff]  ;;  %v3522_v47 = vpack.c.bf16 %v3399_v1, %v3398_v29  ;;  %v3415_v29 = vld [vmem:[%s9979_s3 + $0xc8] sm:$0xff] }
 0x252   :  { %10413 = vst [vmem:[#allocation8_spill] sm:$0xff] %v7681_v17  ;;  %v7697_v60 = vpop.xlane.xlu0 %1864  ;;  %v3528_v17 = vpack.c.bf16 %v3411_v12, %v3410_v22  ;;  %10419 = vst [vmem:[#allocation124_spill] sm:$0xff] %v7709_v8  ;;  %v3413_v12 = vld [vmem:[%s9979_s3 + $0xb8] sm:$0xff]  ;;  %v2075_v59 = vsub.f32 %v10420_v56, %v7505_v36  ;;  %v7733_v43 = vpop.eup %5451  ;;  %v3400_v36 = vld [vmem:[%s9979_s3 + $0x50] sm:$0xff] }
 0x253   :  { %10416 = vst [vmem:[#allocation6_spill] sm:$0xff] %v7697_v60  ;;  %5072 = vmatprep.subr.bf16.mxu0 %v3521_v5  ;;  %v3529_v0 = vpack.c.bf16 %v3413_v12, %v3412_v35  ;;  %v7737_v42 = vpop.eup %5453  ;;  %5463 = vpow2.f32 %v2230_v16  ;;  %v10427_v12 = vld [vmem:[#allocation26_spill] sm:$0xff] }
 0x254   :  { %2478 = vadd.xlane.f32.xlu1 %v7705_v57  ;;  %v10421_v57 = vld [vmem:[#allocation22_spill] sm:$0xff]  ;;  %5101 = vmatpush3.bf16.msra.mxu1 %v3527_v38  ;;  %10425 = vst [vmem:[#allocation125_spill] sm:$0xff] %v7737_v42  ;;  %v7755_v1 = vpop.eup %5455  ;;  %5465 = vpow2.f32 %v2200_v6  ;;  %v2232_v35 = vmul.f32 1.442695, %v2075_v59 }
 0x255   :  { %v7721_v22 = vpop.xlane.xlu1 %1874  ;;  %2448 = vadd.xlane.f32.xlu0 %v7709_v8  ;;  %10423 = vst [vmem:[#allocation22_spill] sm:$0xff] %v7733_v43  ;;  %5102 = vmatprep.subr.bf16.mxu1 %v3528_v17  ;;  %v3414_v38 = vld [vmem:[%s9979_s3 + $0xc0] sm:$0xff]  ;;  %10426 = vst [vmem:[#allocation126_spill] sm:$0xff] %v7755_v1  ;;  %v7761_v16 = vpop.eup %5457 }
 0x256   :  { %v7731_v34 = vpop.xlane.xlu0 %1896  ;;  %5073 = vmatpush3.bf16.msra.mxu0 %v3521_v5  ;;  %10429 = vst [vmem:[#allocation127_spill] sm:$0xff] %v7761_v16  ;;  %v3530_v44 = vpack.c.bf16 %v3415_v29, %v3414_v38  ;;  %v3402_v59 = vld [vmem:[%s9979_s3 + $0x60] sm:$0xff]  ;;  %v3403_v5 = vld [vmem:[%s9979_s3 + $0x68] sm:$0xff]  ;;  %5467 = vpow2.f32 %v2232_v35  ;;  %v3404_v35 = vld [vmem:[%s9979_s3 + $0x70] sm:$0xff] }
 0x257   :  { %10422 = vst [vmem:[#allocation10_spill] sm:$0xff] %v7731_v34  ;;  %5074 = vmatprep.subr.bf16.mxu0 %v3522_v47  ;;  %v3523_v34 = vpack.c.bf16 %v3401_v25, %v3400_v36  ;;  %v3417_v36 = vld [vmem:[%s9979_s3 + $0xd8] sm:$0xff]  ;;  %v10432_v25 = vld [vmem:[#allocation23_spill] sm:$0xff] }
 0x258   :  { %2458 = vadd.xlane.f32.xlu1 %v7733_v43  ;;  %5103 = vmatpush3.bf16.msra.mxu1 %v3528_v17  ;;  %v3416_v17 = vld [vmem:[%s9979_s3 + $0xd0] sm:$0xff] }
 0x259   :  { %v7749_v56 = vpop.xlane.xlu1 %1906  ;;  %2480 = vadd.xlane.f32.xlu0 %v7737_v42  ;;  %5104 = vmatprep.subr.bf16.mxu1 %v3529_v0  ;;  %v7785_v42 = vpop.eup %5459 }
 0x25a   :  { %v7759_v60 = vpop.xlane.xlu0 %1876  ;;  %5075 = vmatpush3.bf16.msra.mxu0 %v3522_v47  ;;  %10434 = vst [vmem:[#allocation129_spill] sm:$0xff] %v7785_v42  ;;  %v7789_v43 = vpop.eup %5461  ;;  %v3405_v47 = vld [vmem:[%s9979_s3 + $0x78] sm:$0xff] }
 0x25b   :  { %10428 = vst [vmem:[#allocation26_spill] sm:$0xff] %v7759_v60  ;;  %5076 = vmatprep.subr.bf16.mxu0 %v3523_v34  ;;  %v3531_v60 = vpack.c.bf16 %v3417_v36, %v3416_v17  ;;  %10436 = vst [vmem:[#allocation130_spill] sm:$0xff] %v7789_v43  ;;  %v3525_v8 = vpack.c.bf16 %v3405_v47, %v3404_v35  ;;  %v3420_v17 = vld [vmem:[%s9979_s3 + $0xf0] sm:$0xff]  ;;  %v10446_v35 = vld [vmem:[#allocation34_spill] sm:$0xff] }
 0x25c   :  { %2490 = vadd.xlane.f32.xlu1 %v7755_v1  ;;  %5105 = vmatpush3.bf16.msra.mxu1 %v3529_v0  ;;  %v3418_v0 = vld [vmem:[%s9979_s3 + $0xe0] sm:$0xff] }
 0x25d   :  { %v7775_v6 = vpop.xlane.xlu1 %1870  ;;  %2460 = vadd.xlane.f32.xlu0 %v7761_v16  ;;  %5106 = vmatprep.subr.bf16.mxu1 %v3530_v44  ;;  %v3524_v16 = vpack.c.bf16 %v3403_v5, %v3402_v59  ;;  %v3419_v59 = vld [vmem:[%s9979_s3 + $0xe8] sm:$0xff]  ;;  %v7811_v38 = vpop.eup %5463 }
 0x25e   :  { %10431 = vst [vmem:[#allocation128_spill] sm:$0xff] %v7775_v6  ;;  %v7783_v29 = vpop.xlane.xlu0 %1908  ;;  %v10437_v5 = vld [vmem:[#allocation27_spill] sm:$0xff]  ;;  %5077 = vmatpush3.bf16.msra.mxu0 %v3523_v34  ;;  %10439 = vst [vmem:[#allocation131_spill] sm:$0xff] %v7811_v38  ;;  %v7815_v6 = vpop.eup %5465  ;;  %v3421_v34 = vld [vmem:[%s9979_s3 + $0xf8] sm:$0xff] }
 0x25f   :  { %10433 = vst [vmem:[#allocation23_spill] sm:$0xff] %v7783_v29  ;;  %5078 = vmatprep.subr.bf16.mxu0 %v3524_v16  ;;  %10441 = vst [vmem:[#allocation132_spill] sm:$0xff] %v7815_v6  ;;  %v10443_v29 = vld [vmem:[#allocation30_spill] sm:$0xff] }
 0x260   :  { %2454 = vadd.xlane.f32.xlu1 %v7785_v42  ;;  %5107 = vmatpush3.bf16.msra.mxu1 %v3530_v44 }
 0x261   :  { %v7801_v1 = vpop.xlane.xlu1 %1902  ;;  %2492 = vadd.xlane.f32.xlu0 %v7789_v43  ;;  %5108 = vmatprep.subr.bf16.mxu1 %v3531_v60  ;;  %v3532_v43 = vpack.c.bf16 %v3419_v59, %v3418_v0  ;;  %v10444_v0 = vld [vmem:[#allocation29_spill] sm:$0xff]  ;;  %v10457_v59 = vld [vmem:[#allocation42_spill] sm:$0xff] }
 0x262   :  { %v7809_v36 = vpop.xlane.xlu0 %1872  ;;  %5079 = vmatpush3.bf16.msra.mxu0 %v3524_v16  ;;  %v10451_v16 = vld [vmem:[#allocation35_spill] sm:$0xff] }
 0x263   :  { %10438 = vst [vmem:[#allocation27_spill] sm:$0xff] %v7809_v36  ;;  %5080 = vmatprep.subr.bf16.mxu0 %v3525_v8  ;;  %v7833_v36 = vpop.eup %5467 }
 0x264   :  { %2486 = vadd.xlane.f32.xlu1 %v7811_v38  ;;  %5109 = vmatpush3.bf16.msra.mxu1 %v3531_v60  ;;  %v3533_v38 = vpack.c.bf16 %v3421_v34, %v3420_v17  ;;  %10445 = vst [vmem:[#allocation30_spill] sm:$0xff] %v7833_v36  ;;  %v10447_v60 = vld [vmem:[#allocation32_spill] sm:$0xff]  ;;  %v10448_v34 = vld [vmem:[#allocation31_spill] sm:$0xff] }
 0x265   :  { %v7824_v44 = vpop.xlane.xlu1 %1882  ;;  %2456 = vadd.xlane.f32.xlu0 %v7815_v6  ;;  %5110 = vmatprep.subr.bf16.mxu1 %v3532_v43  ;;  %v10460_v6 = vld [vmem:[#allocation39_spill] sm:$0xff] }
 0x266   :  { %10442 = vst [vmem:[#allocation133_spill] sm:$0xff] %v7824_v44  ;;  %v7829_v47 = vpop.xlane.xlu0 %1904  ;;  %5081 = vmatpush3.bf16.msra.mxu0 %v3525_v8  ;;  %v10454_v8 = vld [vmem:[#allocation38_spill] sm:$0xff] }
 0x268   :  { %1986 = vmax.xlane.f32.xlu1 %v7423_v37  ;;  %5111 = vmatpush3.bf16.msra.mxu1 %v3532_v43 }
 0x269   :  { %v7836_v42 = vpop.xlane.xlu1 %1914  ;;  %2488 = vadd.xlane.f32.xlu0 %v7833_v36  ;;  %5112 = vmatprep.subr.bf16.mxu1 %v3533_v38 }
 0x26a   :  { %v7841_v44 = vpop.xlane.xlu0 %1884 }
 0x26c   :  { %2018 = vmax.xlane.f32.xlu1 %v7443_v27  ;;  %5113 = vmatpush3.bf16.msra.mxu1 %v3533_v38 }
 0x26d   :  { %v7846_v17 = vpop.xlane.xlu1 %1878  ;;  %1988 = vmax.xlane.f32.xlu0 %v7430_v49  ;;  %v10463_v49 = vld [vmem:[#allocation43_spill] sm:$0xff] }
 0x26e   :  { %v7851_v37 = vpop.xlane.xlu0 %1916 }
 0x26f   :  { %10449 = vst [vmem:[#allocation29_spill] sm:$0xff] %v7851_v37 }
 0x270   :  { %1982 = vmax.xlane.f32.xlu1 %v7426_v31 }
 0x271   :  { %v7856_v43 = vpop.xlane.xlu1 %1910  ;;  %2020 = vmax.xlane.f32.xlu0 %v7452_v20  ;;  %v10466_v20 = vld [vmem:[#allocation46_spill] sm:$0xff] }
 0x272   :  { %v7861_v36 = vpop.xlane.xlu0 %1880 }
 0x273   :  { %10452 = vst [vmem:[#allocation34_spill] sm:$0xff] %v7861_v36 }
 0x274   :  { %2014 = vmax.xlane.f32.xlu1 %v7447_v48 }
 0x275   :  { %v7866_v38 = vpop.xlane.xlu1 %1922  ;;  %1984 = vmax.xlane.f32.xlu0 %v7435_v30  ;;  %v10469_v30 = vld [vmem:[#allocation50_spill] sm:$0xff] }
 0x276   :  { %v7871_v37 = vpop.xlane.xlu0 %1912 }
 0x277   :  { %10455 = vst [vmem:[#allocation32_spill] sm:$0xff] %v7871_v37 }
 0x278   :  { %1994 = vmax.xlane.f32.xlu1 %v7463_v53 }
 0x279   :  { %v7876_v27 = vpop.xlane.xlu1 %1954  ;;  %2016 = vmax.xlane.f32.xlu0 %v7457_v45  ;;  %v10472_v45 = vld [vmem:[#allocation47_spill] sm:$0xff] }
 0x27a   :  { %v7881_v36 = vpop.xlane.xlu0 %1924 }
 0x27b   :  { %10458 = vst [vmem:[#allocation31_spill] sm:$0xff] %v7881_v36 }
 0x27c   :  { %2026 = vmax.xlane.f32.xlu1 %v7485_v54 }
 0x27d   :  { %v7886_v31 = vpop.xlane.xlu1 %1918  ;;  %1996 = vmax.xlane.f32.xlu0 %v7474_v21  ;;  %v10475_v21 = vld [vmem:[#allocation51_spill] sm:$0xff] }
 0x27e   :  { %v7891_v37 = vpop.xlane.xlu0 %1956 }
 0x27f   :  { %10461 = vst [vmem:[#allocation35_spill] sm:$0xff] %v7891_v37 }
 0x280   :  { %1990 = vmax.xlane.f32.xlu1 %v7467_v58 }
 0x281   :  { %v7896_v48 = vpop.xlane.xlu1 %1950  ;;  %2028 = vmax.xlane.f32.xlu0 %v7496_v33  ;;  %v10479_v33 = vld [vmem:[#allocation54_spill] sm:$0xff] }
 0x282   :  { %v7901_v36 = vpop.xlane.xlu0 %1920 }
 0x283   :  { %10464 = vst [vmem:[#allocation38_spill] sm:$0xff] %v7901_v36 }
 0x284   :  { %2022 = vmax.xlane.f32.xlu1 %v7489_v41 }
 0x285   :  { %v7906_v53 = vpop.xlane.xlu1 %1930  ;;  %1992 = vmax.xlane.f32.xlu0 %v7479_v23 }
 0x286   :  { %v7911_v37 = vpop.xlane.xlu0 %1952 }
 0x287   :  { %10467 = vst [vmem:[#allocation42_spill] sm:$0xff] %v7911_v37 }
 0x288   :  { %2002 = vmax.xlane.f32.xlu1 %v7509_v62 }
 0x289   :  { %v7916_v54 = vpop.xlane.xlu1 %1962  ;;  %2024 = vmax.xlane.f32.xlu0 %v7503_v50  ;;  %v10485_v50 = vsub.f32 %v7181_v40, %v7518_v46  ;;  %v10489_v40 = vsub.f32 %v7173_v14, %v7544_v11  ;;  %v10496_v14 = vld [vmem:[#allocation12_spill] sm:$0xff]  ;;  %v10497_v11 = vld [vmem:[#allocation109_spill] sm:$0xff] }
 0x28a   :  { %v7921_v36 = vpop.xlane.xlu0 %1932 }
 0x28b   :  { %10470 = vst [vmem:[#allocation39_spill] sm:$0xff] %v7921_v36 }
 0x28c   :  { %2034 = vmax.xlane.f32.xlu1 %v7533_v2  ;;  %v10481_v2 = vsub.f32 %v7171_v13, %v7494_v55  ;;  %v2274_v13 = vmul.f32 1.442695, %v10485_v50  ;;  %v2238_v50 = vmul.f32 1.442695, %v10489_v40  ;;  %v10498_v40 = vsub.f32 %v10496_v14, %v10497_v11  ;;  %v10508_v11 = vld [vmem:[#allocation14_spill] sm:$0xff] }
 0x28d   :  { %v7926_v58 = vpop.xlane.xlu1 %1926  ;;  %2004 = vmax.xlane.f32.xlu0 %v7520_v9 }
 0x28e   :  { %v7931_v37 = vpop.xlane.xlu0 %1964  ;;  %v2242_v23 = vmul.f32 1.442695, %v10481_v2  ;;  %v10486_v2 = vsub.f32 %v7176_v15, %v7529_v7  ;;  %v10491_v15 = vsub.f32 %v7186_v19, %v7555_v10  ;;  %v10501_v19 = vld [vmem:[#allocation11_spill] sm:$0xff]  ;;  %v10502_v10 = vld [vmem:[#allocation112_spill] sm:$0xff] }
 0x28f   :  { %10473 = vst [vmem:[#allocation43_spill] sm:$0xff] %v7931_v37 }
 0x290   :  { %1998 = vmax.xlane.f32.xlu1 %v7513_v26  ;;  %v10484_v26 = vld [vmem:[#allocation56_spill] sm:$0xff]  ;;  %5469 = vpow2.f32 %v2242_v23  ;;  %v2276_v7 = vmul.f32 1.442695, %v10491_v15  ;;  %v10503_v15 = vsub.f32 %v10501_v19, %v10502_v10  ;;  %v10512_v19 = vld [vmem:[#allocation2_spill] sm:$0xff]  ;;  %v10513_v10 = vld [vmem:[#allocation13_spill] sm:$0xff] }
 0x291   :  { %v7936_v41 = vpop.xlane.xlu1 %1958  ;;  %2036 = vmax.xlane.f32.xlu0 %v7546_v28  ;;  %v10480_v28 = vld [vmem:[#allocation53_spill] sm:$0xff]  ;;  %5471 = vpow2.f32 %v2274_v13 }
 0x292   :  { %v7941_v36 = vpop.xlane.xlu0 %1928 }
 0x293   :  { %10476 = vst [vmem:[#allocation46_spill] sm:$0xff] %v7941_v36 }
 0x294   :  { %2030 = vmax.xlane.f32.xlu1 %v7539_v39  ;;  %v2244_v39 = vmul.f32 1.442695, %v10486_v2 }
 0x295   :  { %v7946_v62 = vpop.xlane.xlu1 %1938  ;;  %2000 = vmax.xlane.f32.xlu0 %v7527_v51  ;;  %v10483_v51 = vld [vmem:[#allocation58_spill] sm:$0xff] }
 0x296   :  { %10478 = vst [vmem:[#allocation50_spill] sm:$0xff] %v7946_v62  ;;  %v7951_v37 = vpop.xlane.xlu0 %1960  ;;  %v10488_v62 = vld [vmem:[#allocation60_spill] sm:$0xff]  ;;  %5473 = vpow2.f32 %v2244_v39 }
 0x297   :  { %5475 = vpow2.f32 %v2238_v50 }
 0x298   :  { %2010 = vmax.xlane.f32.xlu1 %v7559_v63  ;;  %5477 = vpow2.f32 %v2276_v7  ;;  %v2240_v63 = vmul.f32 1.442695, %v10503_v15  ;;  %v10514_v15 = vld [vmem:[#allocation118_spill] sm:$0xff] }
 0x299   :  { %v7959_v36 = vpop.xlane.xlu1 %1970  ;;  %2032 = vmax.xlane.f32.xlu0 %v7553_v18  ;;  %v10487_v18 = vld [vmem:[#allocation55_spill] sm:$0xff]  ;;  %v10515_v2 = vsub.f32 %v10513_v10, %v10514_v15  ;;  %v10523_v10 = vld [vmem:[#allocation16_spill] sm:$0xff] }
 0x29a   :  { %10482 = vst [vmem:[#allocation47_spill] sm:$0xff] %v7959_v36  ;;  %v7964_v9 = vpop.xlane.xlu0 %1940  ;;  %v10524_v15 = vld [vmem:[#allocation7_spill] sm:$0xff] }
 0x29b   :  { %v10525_v13 = vsub.f32 %v10523_v10, %v10524_v15  ;;  %v10537_v15 = vld [vmem:[#allocation19_spill] sm:$0xff] }
 0x29c   :  { %2042 = vmax.xlane.f32.xlu1 %v7585_v3 }
 0x29d   :  { %v7972_v55 = vpop.xlane.xlu1 %1934  ;;  %2012 = vmax.xlane.f32.xlu0 %v7572_v24  ;;  %v10500_v24 = vld [vmem:[#allocation111_spill] sm:$0xff] }
 0x29e   :  { %v7980_v36 = vpop.xlane.xlu0 %1972 }
 0x2a0   :  { %2006 = vmax.xlane.f32.xlu1 %v7565_v52  ;;  %v10495_v52 = vld [vmem:[#allocation116_spill] sm:$0xff] }
 0x2a1   :  { %v7988_v46 = vpop.xlane.xlu1 %1966  ;;  %2044 = vmax.xlane.f32.xlu0 %v7598_v61  ;;  %v2270_v61 = vmul.f32 1.442695, %v10498_v40  ;;  %v10509_v40 = vld [vmem:[#allocation3_spill] sm:$0xff] }
 0x2a2   :  { %10490 = vst [vmem:[#allocation51_spill] sm:$0xff] %v7988_v46  ;;  %v7996_v23 = vpop.xlane.xlu0 %1936  ;;  %v10510_v7 = vsub.f32 %v10508_v11, %v10509_v40 }
 0x2a3   :  { %10493 = vst [vmem:[#allocation54_spill] sm:$0xff] %v7996_v23  ;;  %5479 = vpow2.f32 %v2270_v61 }
 0x2a4   :  { %2038 = vmax.xlane.f32.xlu1 %v10495_v52  ;;  %v8014_v52 = vpop.eup %5469  ;;  %5481 = vpow2.f32 %v2240_v63  ;;  %v10521_v63 = vsub.f32 %v10399_v32, %v7626_v4 }
 0x2a5   :  { %v8004_v39 = vpop.xlane.xlu1 %1946  ;;  %2008 = vmax.xlane.f32.xlu0 %v10500_v24  ;;  %10506 = vst [vmem:[#allocation56_spill] sm:$0xff] %v8014_v52  ;;  %v2250_v24 = vmul.f32 1.442695, %v10510_v7 }
 0x2a6   :  { %10499 = vst [vmem:[#allocation53_spill] sm:$0xff] %v8004_v39  ;;  %v8012_v3 = vpop.xlane.xlu0 %1968  ;;  %v2272_v39 = vmul.f32 1.442695, %v10515_v2  ;;  %v2282_v7 = vmul.f32 1.442695, %v10521_v63  ;;  %v10532_v63 = vld [vmem:[#allocation68_spill] sm:$0xff] }
 0x2a7   :  { %10505 = vst [vmem:[#allocation58_spill] sm:$0xff] %v8012_v3  ;;  %5483 = vpow2.f32 %v2250_v24  ;;  %v10529_v24 = vld [vmem:[#allocation15_spill] sm:$0xff]  ;;  %v10535_v3 = vld [vmem:[#allocation9_spill] sm:$0xff] }
 0x2a8   :  { %2498 = vadd.xlane.f32.xlu1 %v8014_v52  ;;  %v8032_v52 = vpop.eup %5471  ;;  %5485 = vpow2.f32 %v2272_v39  ;;  %v10534_v39 = vld [vmem:[#allocation20_spill] sm:$0xff] }
 0x2a9   :  { %v8022_v23 = vpop.xlane.xlu1 %1978  ;;  %2040 = vmax.xlane.f32.xlu0 %v10512_v19  ;;  %10518 = vst [vmem:[#allocation12_spill] sm:$0xff] %v8032_v52  ;;  %v8036_v40 = vpop.eup %5473  ;;  %v2252_v19 = vmul.f32 1.442695, %v10525_v13  ;;  %v10536_v10 = vsub.f32 %v10534_v39, %v10535_v3  ;;  %5487 = vpow2.f32 %v2282_v7 }
 0x2aa   :  { %10511 = vst [vmem:[#allocation55_spill] sm:$0xff] %v8022_v23  ;;  %v8030_v14 = vpop.xlane.xlu0 %1948  ;;  %10520 = vst [vmem:[#allocation109_spill] sm:$0xff] %v8036_v40  ;;  %v10530_v23 = vld [vmem:[#allocation4_spill] sm:$0xff] }
 0x2ab   :  { %10517 = vst [vmem:[#allocation60_spill] sm:$0xff] %v8030_v14  ;;  %v10531_v4 = vsub.f32 %v10529_v24, %v10530_v23  ;;  %v2284_v13 = vmul.f32 1.442695, %v10536_v10  ;;  %v10538_v14 = vld [vmem:[#allocation8_spill] sm:$0xff]  ;;  %5489 = vpow2.f32 %v2252_v19  ;;  %v10541_v23 = vld [vmem:[#allocation17_spill] sm:$0xff]  ;;  %v10542_v24 = vld [vmem:[#allocation6_spill] sm:$0xff] }
 0x2ac   :  { %2530 = vadd.xlane.f32.xlu1 %v8032_v52  ;;  %v8052_v52 = vpop.eup %5475 }
 0x2ad   :  { %v8042_v2 = vpop.xlane.xlu1 %1942  ;;  %2500 = vadd.xlane.f32.xlu0 %v8036_v40  ;;  %10528 = vst [vmem:[#allocation14_spill] sm:$0xff] %v8052_v52  ;;  %v2246_v32 = vmul.f32 1.442695, %v10531_v4  ;;  %v8059_v40 = vpop.eup %5477  ;;  %v10543_v4 = vsub.f32 %v10541_v23, %v10542_v24  ;;  %v10550_v23 = vld [vmem:[#allocation21_spill] sm:$0xff]  ;;  %v10551_v24 = vld [vmem:[#allocation10_spill] sm:$0xff] }
 0x2ae   :  { %10522 = vst [vmem:[#allocation11_spill] sm:$0xff] %v8042_v2  ;;  %v8050_v61 = vpop.xlane.xlu0 %1980  ;;  %10533 = vst [vmem:[#allocation3_spill] sm:$0xff] %v8059_v40  ;;  %v10539_v2 = vsub.f32 %v10537_v15, %v10538_v14  ;;  %v8078_v10 = vpop.eup %5479  ;;  %v10547_v14 = vsub.f32 %v10421_v57, %v7721_v22  ;;  %v10554_v57 = vld [vmem:[#allocation24_spill] sm:$0xff]  ;;  %v10555_v22 = vld [vmem:[#allocation26_spill] sm:$0xff] }
 0x2af   :  { %10527 = vst [vmem:[#allocation112_spill] sm:$0xff] %v8050_v61  ;;  %v2248_v46 = vmul.f32 1.442695, %v10543_v4  ;;  %v10544_v61 = vld [vmem:[#allocation67_spill] sm:$0xff]  ;;  %10546 = vst [vmem:[#allocation16_spill] sm:$0xff] %v8078_v10  ;;  %5491 = vpow2.f32 %v2246_v32  ;;  %v8085_v19 = vpop.eup %5481  ;;  %v10552_v4 = vsub.f32 %v10550_v23, %v10551_v24  ;;  %v10553_v32 = vsub.f32 %v10427_v12, %v7749_v56  ;;  %v10559_v23 = vld [vmem:[#allocation128_spill] sm:$0xff] }
 0x2b0   :  { %2494 = vadd.xlane.f32.xlu1 %v8052_v52  ;;  %v2278_v11 = vmul.f32 1.442695, %v10539_v2  ;;  %v2258_v7 = vmul.f32 1.442695, %v10547_v14  ;;  %10549 = vst [vmem:[#allocation7_spill] sm:$0xff] %v8085_v19  ;;  %5493 = vpow2.f32 %v2284_v13  ;;  %v10556_v14 = vsub.f32 %v10554_v57, %v10555_v22  ;;  %v10575_v12 = vld [vmem:[#allocation27_spill] sm:$0xff] }
 0x2b1   :  { %v8068_v50 = vpop.xlane.xlu1 %1974  ;;  %2532 = vadd.xlane.f32.xlu0 %v8059_v40  ;;  %v2280_v40 = vmul.f32 1.442695, %v10552_v4  ;;  %v2290_v3 = vmul.f32 1.442695, %v10553_v32 }
 0x2b2   :  { %10540 = vst [vmem:[#allocation13_spill] sm:$0xff] %v8068_v50  ;;  %v8076_v39 = vpop.xlane.xlu0 %1944  ;;  %5495 = vpow2.f32 %v2278_v11  ;;  %v2260_v15 = vmul.f32 1.442695, %v10556_v14  ;;  %v10560_v11 = vsub.f32 %v10432_v25, %v10559_v23  ;;  %v10565_v25 = vld [vmem:[#allocation23_spill] sm:$0xff] }
 0x2b3   :  { %10545 = vst [vmem:[#allocation118_spill] sm:$0xff] %v8076_v39  ;;  %5497 = vpow2.f32 %v2248_v46  ;;  %v8100_v39 = vpop.eup %5483 }
 0x2b4   :  { %2526 = vadd.xlane.f32.xlu1 %v8078_v10  ;;  %10558 = vst [vmem:[#allocation4_spill] sm:$0xff] %v8100_v39  ;;  %5499 = vpow2.f32 %v2258_v7  ;;  %v2254_v24 = vmul.f32 1.442695, %v10560_v11  ;;  %v8107_v4 = vpop.eup %5485  ;;  %v10564_v7 = vld [vmem:[#allocation28_spill] sm:$0xff]  ;;  %v10596_v10 = vld [vmem:[#allocation34_spill] sm:$0xff] }
 0x2b5   :  { %v2435_v52 = vpop.xlane.xlu1 %2434  ;;  %2496 = vadd.xlane.f32.xlu0 %v8085_v19  ;;  %10562 = vst [vmem:[#allocation68_spill] sm:$0xff] %v8107_v4  ;;  %5501 = vpow2.f32 %v2280_v40  ;;  %v8111_v57 = vpop.eup %5487  ;;  %v10566_v22 = vsub.f32 %v10564_v7, %v10565_v25 }
 0x2b6   :  { %v8098_v13 = vpop.xlane.xlu0 %1976  ;;  %5503 = vpow2.f32 %v2290_v3  ;;  %10563 = vst [vmem:[#allocation20_spill] sm:$0xff] %v8111_v57  ;;  %v8116_v23 = vpop.eup %5489 }
 0x2b7   :  { %10557 = vst [vmem:[#allocation15_spill] sm:$0xff] %v8098_v13  ;;  %5505 = vpow2.f32 %v2260_v15  ;;  %v2292_v14 = vmul.f32 1.442695, %v10566_v22  ;;  %10567 = vst [vmem:[#allocation9_spill] sm:$0xff] %v8116_v23  ;;  %v10574_v22 = vld [vmem:[#allocation25_spill] sm:$0xff]  ;;  %v10599_v13 = vld [vmem:[#allocation83_spill] sm:$0xff] }
 0x2b8   :  { %2506 = vadd.xlane.f32.xlu1 %v8100_v39  ;;  %5507 = vpow2.f32 %v2254_v24 }
 0x2b9   :  { %v2467_v46 = vpop.xlane.xlu1 %2466  ;;  %2528 = vadd.xlane.f32.xlu0 %v8107_v4  ;;  %v8119_v40 = vpop.eup %5491 }
 0x2ba   :  { %v2437_v32 = vpop.xlane.xlu0 %2436  ;;  %10568 = vst [vmem:[#allocation19_spill] sm:$0xff] %v8119_v40  ;;  %v8122_v15 = vpop.eup %5493 }
 0x2bb   :  { %5509 = vrcp.f32 %v2437_v32  ;;  %10569 = vst [vmem:[#allocation8_spill] sm:$0xff] %v8122_v15  ;;  %v10572_v32 = vsub.f32 %v10437_v5, %v7801_v1 }
 0x2bc   :  { %2538 = vadd.xlane.f32.xlu1 %v8111_v57  ;;  %5511 = vrcp.f32 %v2435_v52  ;;  %v8124_v24 = vpop.eup %5495  ;;  %v10576_v57 = vsub.f32 %v10574_v22, %v10575_v12  ;;  %v10582_v12 = vsub.f32 %v10444_v0, %v7829_v47 }
 0x2bd   :  { %v2431_v3 = vpop.xlane.xlu1 %2430  ;;  %2508 = vadd.xlane.f32.xlu0 %v8116_v23  ;;  %10570 = vst [vmem:[#allocation17_spill] sm:$0xff] %v8124_v24  ;;  %v8126_v7 = vpop.eup %5497  ;;  %v2286_v25 = vmul.f32 1.442695, %v10572_v32  ;;  %v10578_v23 = vld [vmem:[#allocation133_spill] sm:$0xff] }
 0x2be   :  { %5513 = vrcp.f32 %v2431_v3  ;;  %v2469_v11 = vpop.xlane.xlu0 %2468  ;;  %10571 = vst [vmem:[#allocation6_spill] sm:$0xff] %v8126_v7  ;;  %v8132_v52 = vpop.eup %5499  ;;  %v2256_v39 = vmul.f32 1.442695, %v10576_v57  ;;  %v10579_v4 = vsub.f32 %v10443_v29, %v10578_v23  ;;  %v10584_v29 = vsub.f32 %v10446_v35, %v7836_v42  ;;  %v3422_v42 = vld [vmem:[%s9979_s3 + $0x100] sm:$0xff]  ;;  %v3423_v35 = vld [vmem:[%s9979_s3 + $0x108] sm:$0xff] }
 0x2bf   :  { %5515 = vpow2.f32 %v2292_v14  ;;  %10573 = vst [vmem:[#allocation67_spill] sm:$0xff] %v8132_v52  ;;  %v8138_v14 = vpop.eup %5501 }
 0x2c0   :  { %5517 = vrcp.f32 %v2469_v11  ;;  %2502 = vadd.xlane.f32.xlu1 %v8119_v40  ;;  %10577 = vst [vmem:[#allocation21_spill] sm:$0xff] %v8138_v14  ;;  %v2266_v1 = vmul.f32 1.442695, %v10579_v4  ;;  %v8143_v11 = vpop.eup %5503  ;;  %v2298_v4 = vmul.f32 1.442695, %v10584_v29  ;;  %v10595_v40 = vld [vmem:[#allocation33_spill] sm:$0xff] }
 0x2c1   :  { %5519 = vrcp.f32 %v2467_v46  ;;  %v2463_v3 = vpop.xlane.xlu1 %2462  ;;  %2540 = vadd.xlane.f32.xlu0 %v8122_v15  ;;  %10580 = vst [vmem:[#allocation10_spill] sm:$0xff] %v8143_v11  ;;  %v8145_v32 = vpop.eup %5505  ;;  %v2288_v46 = vmul.f32 1.442695, %v10582_v12 }
 0x2c2   :  { %5521 = vrcp.f32 %v2463_v3  ;;  %v2433_v5 = vpop.xlane.xlu0 %2432  ;;  %10581 = vst [vmem:[#allocation24_spill] sm:$0xff] %v8145_v32  ;;  %v8151_v57 = vpop.eup %5507 }
 0x2c3   :  { %5523 = vrcp.f32 %v2433_v5  ;;  %10583 = vst [vmem:[#allocation26_spill] sm:$0xff] %v8151_v57  ;;  %v10586_v5 = vsub.f32 %v10448_v34, %v7846_v17 }
 0x2c4   :  { %5525 = vpow2.f32 %v2286_v25  ;;  %2534 = vadd.xlane.f32.xlu1 %v8124_v24  ;;  %v10585_v25 = vsub.f32 %v10447_v60, %v7841_v44  ;;  %v8170_v44 = vpack.c.bf16 %v3423_v35, %v3422_v42 }
 0x2c5   :  { %5527 = vpow2.f32 %v2256_v39  ;;  %v2443_v23 = vpop.xlane.xlu1 %2442  ;;  %2504 = vadd.xlane.f32.xlu0 %v8126_v7  ;;  %v5510_v22 = vpop.eup %5509  ;;  %v2262_v12 = vmul.f32 1.442695, %v10586_v5  ;;  %v10589_v5 = vld [vmem:[#allocation29_spill] sm:$0xff] }
 0x2c6   :  { %5529 = vpow2.f32 %v2266_v1  ;;  %v2268_v3 = vmul.f32 1.442695, %v10585_v25  ;;  %v2465_v47 = vpop.xlane.xlu0 %2464  ;;  %v5512_v0 = vpop.eup %5511  ;;  %v2693_v17 = vmul.f32 2.0, %v5510_v22  ;;  %5130 = vmatprep.subr.bf16.mxu0 %v8170_v44  ;;  %v10591_v22 = vld [vmem:[#allocation77_spill] sm:$0xff] }
 0x2c7   :  { %5531 = vrcp.f32 %v2465_v47  ;;  %v2691_v35 = vmul.f32 2.0, %v5512_v0 }
 0x2c8   :  { %v5514_v39 = vpop.eup %5513  ;;  %5533 = vpow2.f32 %v2288_v46  ;;  %2514 = vadd.xlane.f32.xlu1 %v8132_v52  ;;  %v10588_v46 = vld [vmem:[#allocation36_spill] sm:$0xff] }
 0x2c9   :  { %v8172_v60 = vpop.eup %5515  ;;  %5535 = vpow2.f32 %v2298_v4  ;;  %v2687_v34 = vmul.f32 2.0, %v5514_v39  ;;  %v2475_v1 = vpop.xlane.xlu1 %2474  ;;  %2536 = vadd.xlane.f32.xlu0 %v8138_v14  ;;  %v10590_v52 = vsub.f32 %v10588_v46, %v10589_v5  ;;  %v2945_v39 = vmul.f32 %v10591_v22, %v2693_v17  ;;  %v10592_v14 = vld [vmem:[#allocation81_spill] sm:$0xff]  ;;  %v10593_v5 = vld [vmem:[#allocation70_spill] sm:$0xff] }
 0x2ca   :  { %10587 = vst [vmem:[#allocation128_spill] sm:$0xff] %v8172_v60  ;;  %v5518_v29 = vpop.eup %5517  ;;  %5537 = vpow2.f32 %v2268_v3  ;;  %v2445_v25 = vpop.xlane.xlu0 %2444  ;;  %v3073_v17 = vld [vmem:[%s9980_s4 + $0x18] sm:$0xff]  ;;  %v2944_v22 = vmul.f32 %v10593_v5, %v2691_v35 }
 0x2cb   :  { %v5520_v47 = vpop.eup %5519  ;;  %5539 = vpow2.f32 %v2262_v12  ;;  %v2300_v42 = vmul.f32 1.442695, %v10590_v52  ;;  %v2942_v15 = vmul.f32 %v10592_v14, %v2687_v34  ;;  %v2725_v3 = vmul.f32 2.0, %v5518_v29  ;;  %v3438_v12 = vld [vmem:[%s9979_s3 + $0x180] sm:$0xff]  ;;  %v3439_v52 = vld [vmem:[%s9979_s3 + $0x188] sm:$0xff]  ;;  %v10598_v35 = vld [vmem:[#allocation89_spill] sm:$0xff] }
 0x2cc   :  { %v5522_v24 = vpop.eup %5521  ;;  %5541 = vrcp.f32 %v2445_v25  ;;  %2546 = vadd.xlane.f32.xlu1 %v8143_v11  ;;  %v3070_v29 = vld [vmem:[%s9980_s4] sm:$0xff]  ;;  %v8197_v25 = vpack.c.bf16 %v3439_v52, %v3438_v12  ;;  %v2723_v11 = vmul.f32 2.0, %v5520_v47  ;;  %v10597_v12 = vsub.f32 %v10595_v40, %v10596_v10 }
 0x2cd   :  { %v5524_v4 = vpop.eup %5523  ;;  %5543 = vrcp.f32 %v2443_v23  ;;  %v2439_v7 = vpop.xlane.xlu1 %2438  ;;  %2516 = vadd.xlane.f32.xlu0 %v8145_v32  ;;  %v2719_v14 = vmul.f32 2.0, %v5522_v24  ;;  %v3071_v32 = vld [vmem:[%s9980_s4 + $0x8] sm:$0xff]  ;;  %v3201_v19 = vmul.f32 %v3073_v17, %v2945_v39  ;;  %v3198_v10 = vmul.f32 %v3070_v29, %v2942_v15  ;;  %v3425_v15 = vld [vmem:[%s9979_s3 + $0x118] sm:$0xff] }
 0x2ce   :  { %v8189_v0 = vpop.eup %5525  ;;  %v2689_v34 = vmul.f32 2.0, %v5524_v4  ;;  %5545 = vrcp.f32 %v2439_v7  ;;  %v2477_v23 = vpop.xlane.xlu0 %2476  ;;  %v10594_v7 = vsub.f32 %v10451_v16, %v7856_v43  ;;  %v2264_v52 = vmul.f32 1.442695, %v10597_v12  ;;  %5162 = vmatprep.subr.bf16.mxu1 %v8197_v25 }
 0x2cf   :  { %v8199_v46 = vpop.eup %5527  ;;  %5547 = vpow2.f32 %v2300_v42  ;;  %v3072_v42 = vld [vmem:[%s9980_s4 + $0x10] sm:$0xff]  ;;  %v2961_v16 = vmul.f32 %v10599_v13, %v2725_v3  ;;  %v10602_v3 = vld [vmem:[#allocation75_spill] sm:$0xff] }
 0x2d0   :  { %v8205_v24 = vpop.eup %5529  ;;  %v2294_v4 = vmul.f32 1.442695, %v10594_v7  ;;  %v2943_v47 = vmul.f32 %v10598_v35, %v2689_v34  ;;  %5549 = vrcp.f32 %v2477_v23  ;;  %2510 = vadd.xlane.f32.xlu1 %v8151_v57  ;;  %v3089_v34 = vld [vmem:[%s9980_s4 + $0x98] sm:$0xff]  ;;  %v10600_v23 = vld [vmem:[#allocation87_spill] sm:$0xff]  ;;  %v3424_v13 = vld [vmem:[%s9979_s3 + $0x110] sm:$0xff]  ;;  %v3200_v39 = vmul.f32 %v3072_v42, %v2944_v22 }
 0x2d1   :  { %v5532_v5 = vpop.eup %5531  ;;  %5551 = vrcp.f32 %v2475_v1  ;;  %v2471_v43 = vpop.xlane.xlu1 %2470  ;;  %2548 = vadd.xlane.f32.xlu0 %v8172_v60  ;;  %v2958_v7 = vmul.f32 %v10600_v23, %v2719_v14  ;;  %v2960_v17 = vmul.f32 %v10602_v3, %v2723_v11  ;;  %v3086_v14 = vld [vmem:[%s9980_s4 + $0x80] sm:$0xff]  ;;  %v3088_v11 = vld [vmem:[%s9980_s4 + $0x90] sm:$0xff]  ;;  %v10604_v22 = vld [vmem:[#allocation95_spill] sm:$0xff]  ;;  %v3217_v2 = vmul.f32 %v3089_v34, %v2961_v16 }
 0x2d2   :  { %v8221_v40 = vpop.eup %5533  ;;  %v2721_v12 = vmul.f32 2.0, %v5532_v5  ;;  %5553 = vrcp.f32 %v2471_v43  ;;  %v2441_v35 = vpop.xlane.xlu0 %2440  ;;  %v3199_v57 = vmul.f32 %v3071_v32, %v2943_v47  ;;  %v3087_v32 = vld [vmem:[%s9980_s4 + $0x88] sm:$0xff]  ;;  %v10603_v47 = vsub.f32 %v10454_v8, %v7866_v38  ;;  %v10606_v3 = vld [vmem:[#allocation32_spill] sm:$0xff] }
 0x2d3   :  { %v8233_v1 = vpop.eup %5535  ;;  %5555 = vrcp.f32 %v2441_v35  ;;  %v10605_v35 = vld [vmem:[#allocation37_spill] sm:$0xff]  ;;  %v3535_v8 = vpack.c.bf16 %v3425_v15, %v3424_v13  ;;  %v10609_v16 = vld [vmem:[#allocation40_spill] sm:$0xff]  ;;  %v10610_v34 = vld [vmem:[#allocation31_spill] sm:$0xff]  ;;  %v3216_v13 = vmul.f32 %v3088_v11, %v2960_v17 }
 0x2d4   :  { %10601 = vst [vmem:[#allocation28_spill] sm:$0xff] %v8233_v1  ;;  %v8242_v29 = vpop.eup %5537  ;;  %5557 = vpow2.f32 %v2294_v4  ;;  %v2306_v5 = vmul.f32 1.442695, %v10603_v47  ;;  %v2959_v42 = vmul.f32 %v10604_v22, %v2721_v12  ;;  %2542 = vadd.xlane.f32.xlu1 %v8189_v0  ;;  %v3326_v43 = vpack.c.bf16 %v3199_v57, %v3198_v10 }
 0x2d5   :  { %v8252_v23 = vpop.eup %5539  ;;  %v10607_v60 = vsub.f32 %v10605_v35, %v10606_v3  ;;  %v3327_v4 = vpack.c.bf16 %v3201_v19, %v3200_v39  ;;  %v2451_v50 = vpop.xlane.xlu1 %2450  ;;  %2512 = vadd.xlane.f32.xlu0 %v8199_v46  ;;  %5559 = vpow2.f32 %v2264_v52  ;;  %v10608_v12 = vsub.f32 %v10457_v59, %v7876_v27  ;;  %v3427_v27 = vld [vmem:[%s9979_s3 + $0x128] sm:$0xff]  ;;  %v3440_v59 = vld [vmem:[%s9979_s3 + $0x190] sm:$0xff]  ;;  %v3441_v52 = vld [vmem:[%s9979_s3 + $0x198] sm:$0xff] }
 0x2d6   :  { %v5542_v38 = vpop.eup %5541  ;;  %5082 = vmatprep.mubr.bf16.mxu0 %v3326_v43  ;;  %v2473_v57 = vpop.xlane.xlu0 %2472  ;;  %v3214_v10 = vmul.f32 %v3086_v14, %v2958_v7  ;;  %v3215_v22 = vmul.f32 %v3087_v32, %v2959_v42  ;;  %v10611_v39 = vsub.f32 %v10609_v16, %v10610_v34  ;;  %v3335_v14 = vpack.c.bf16 %v3217_v2, %v3216_v13  ;;  %v3428_v43 = vld [vmem:[%s9979_s3 + $0x130] sm:$0xff]  ;;  %v3430_v13 = vld [vmem:[%s9979_s3 + $0x140] sm:$0xff] }
 0x2d7   :  { %v2296_v56 = vmul.f32 1.442695, %v10607_v60  ;;  %v2338_v47 = vmul.f32 1.442695, %v10608_v12  ;;  %v3426_v60 = vld [vmem:[%s9979_s3 + $0x120] sm:$0xff]  ;;  %v5544_v19 = vpop.eup %5543  ;;  %5561 = vrcp.f32 %v2473_v57  ;;  %5083 = vmatmul.mubr.bf16.vlgmr.msra.gmra.mrb[64].mxu0 %v3327_v4  ;;  %v2701_v32 = vmul.f32 2.0, %v5542_v38 }
 0x2d8   :  { %v2308_v35 = vmul.f32 1.442695, %v10611_v39  ;;  %v5546_v7 = vpop.eup %5545  ;;  %5563 = vpow2.f32 %v2306_v5  ;;  %2522 = vadd.xlane.f32.xlu1 %v8205_v24  ;;  %v3334_v15 = vpack.c.bf16 %v3215_v22, %v3214_v10  ;;  %5131 = vmatpush3.bf16.msra.mxu0 %v8170_v44  ;;  %v3429_v5 = vld [vmem:[%s9979_s3 + $0x138] sm:$0xff]  ;;  %v3543_v2 = vpack.c.bf16 %v3441_v52, %v3440_v59  ;;  %v3442_v10 = vld [vmem:[%s9979_s3 + $0x1a0] sm:$0xff] }
 0x2d9   :  { %v8278_v17 = vpop.eup %5547  ;;  %5565 = vpow2.f32 %v2296_v56  ;;  %v2695_v11 = vmul.f32 2.0, %v5546_v7  ;;  %v2483_v42 = vpop.xlane.xlu1 %2482  ;;  %2544 = vadd.xlane.f32.xlu0 %v8221_v40  ;;  %5132 = vmatprep.subr.bf16.mxu0 %v3535_v8  ;;  %v3536_v56 = vpack.c.bf16 %v3427_v27, %v3426_v60  ;;  %v10613_v38 = vsub.f32 %v10460_v6, %v7886_v31  ;;  %v10614_v31 = vld [vmem:[#allocation101_spill] sm:$0xff] }
 0x2da   :  { %10612 = vst [vmem:[#allocation23_spill] sm:$0xff] %v8278_v17  ;;  %v5550_v3 = vpop.eup %5549  ;;  %5567 = vpow2.f32 %v2338_v47  ;;  %5114 = vmatprep.mubr.bf16.mxu1 %v3334_v15  ;;  %v2453_v44 = vpop.xlane.xlu0 %2452  ;;  %v2699_v57 = vmul.f32 2.0, %v5544_v19  ;;  %v3443_v47 = vld [vmem:[%s9979_s3 + $0x1a8] sm:$0xff]  ;;  %v8297_v60 = vpack.c.bf16 %v3429_v5, %v3428_v43  ;;  %v2949_v6 = vmul.f32 %v10614_v31, %v2701_v32  ;;  %v10615_v19 = vld [vmem:[#allocation105_spill] sm:$0xff] }
 0x2db   :  { %v5552_v4 = vpop.eup %5551  ;;  %5569 = vpow2.f32 %v2308_v35  ;;  %v2302_v12 = vmul.f32 1.442695, %v10613_v38  ;;  %5115 = vmatmul.mubr.bf16.vlgmr.msra.gmra.mrb[64].mxu1 %v3335_v14  ;;  %v2946_v34 = vmul.f32 %v10615_v19, %v2695_v11  ;;  %v2733_v39 = vmul.f32 2.0, %v5550_v3  ;;  %v10617_v14 = vld [vmem:[#allocation44_spill] sm:$0xff]  ;;  %v10618_v32 = vld [vmem:[#allocation35_spill] sm:$0xff]  ;;  %v10620_v5 = vld [vmem:[#allocation93_spill] sm:$0xff] }
 0x2dc   :  { %v5554_v22 = vpop.eup %5553  ;;  %5571 = vrcp.f32 %v2453_v44  ;;  %2554 = vadd.xlane.f32.xlu1 %v8233_v1  ;;  %5133 = vmatpush3.bf16.msra.mxu0 %v3535_v8  ;;  %v3431_v8 = vld [vmem:[%s9979_s3 + $0x148] sm:$0xff]  ;;  %v3544_v15 = vpack.c.bf16 %v3443_v47, %v3442_v10  ;;  %v10619_v11 = vsub.f32 %v10617_v14, %v10618_v32  ;;  %v2948_v3 = vmul.f32 %v10620_v5, %v2699_v57  ;;  %v3444_v57 = vld [vmem:[%s9979_s3 + $0x1b0] sm:$0xff] }
 0x2dd   :  { %v5556_v16 = vpop.eup %5555  ;;  %5573 = vrcp.f32 %v2451_v50  ;;  %v2447_v35 = vpop.xlane.xlu1 %2446  ;;  %2524 = vadd.xlane.f32.xlu0 %v8242_v29  ;;  %5163 = vmatpush3.bf16.msra.mxu1 %v8197_v25  ;;  %v2727_v59 = vmul.f32 2.0, %v5554_v22  ;;  %v3074_v50 = vld [vmem:[%s9980_s4 + $0x20] sm:$0xff]  ;;  %v3077_v25 = vld [vmem:[%s9980_s4 + $0x38] sm:$0xff]  ;;  %v2731_v44 = vmul.f32 2.0, %v5552_v4  ;;  %v3075_v38 = vld [vmem:[%s9980_s4 + $0x28] sm:$0xff]  ;;  %v8334_v4 = vpack.c.bf16 %v3431_v8, %v3430_v13 }
 0x2de   :  { %v8309_v27 = vpop.eup %5557  ;;  %v2697_v52 = vmul.f32 2.0, %v5556_v16  ;;  %5575 = vrcp.f32 %v2447_v35  ;;  %v2485_v7 = vpop.xlane.xlu0 %2484  ;;  %5134 = vmatprep.subr.bf16.mxu0 %v3536_v56  ;;  %5164 = vmatprep.subr.bf16.mxu1 %v3543_v2  ;;  %v2340_v43 = vmul.f32 1.442695, %v10619_v11  ;;  %v10621_v16 = vsub.f32 %v10463_v49, %v7896_v48  ;;  %v10622_v19 = vld [vmem:[#allocation115_spill] sm:$0xff]  ;;  %v3445_v49 = vld [vmem:[%s9979_s3 + $0x1b8] sm:$0xff] }
 0x2df   :  { %10616 = vst [vmem:[#allocation25_spill] sm:$0xff] %v8309_v27  ;;  %5577 = vpow2.f32 %v2302_v12  ;;  %v8324_v22 = vpop.eup %5559  ;;  %v3076_v12 = vld [vmem:[%s9980_s4 + $0x30] sm:$0xff]  ;;  %v10623_v47 = vld [vmem:[#allocation107_spill] sm:$0xff]  ;;  %v3205_v14 = vmul.f32 %v3077_v25, %v2949_v6  ;;  %v10624_v13 = vld [vmem:[#allocation113_spill] sm:$0xff] }
 0x2e0   :  { %v2334_v31 = vmul.f32 1.442695, %v10621_v16  ;;  %v2947_v10 = vmul.f32 %v10622_v19, %v2697_v52  ;;  %5579 = vrcp.f32 %v2485_v7  ;;  %2518 = vadd.xlane.f32.xlu1 %v8252_v23  ;;  %5135 = vmatpush3.bf16.msra.mxu0 %v3536_v56  ;;  %v2965_v35 = vmul.f32 %v10623_v47, %v2733_v39  ;;  %v3090_v16 = vld [vmem:[%s9980_s4 + $0xa0] sm:$0xff]  ;;  %v10625_v6 = vld [vmem:[#allocation99_spill] sm:$0xff]  ;;  %v3432_v25 = vld [vmem:[%s9979_s3 + $0x150] sm:$0xff] }
 0x2e1   :  { %v5562_v48 = vpop.eup %5561  ;;  %5581 = vrcp.f32 %v2483_v42  ;;  %v2479_v52 = vpop.xlane.xlu1 %2478  ;;  %2556 = vadd.xlane.f32.xlu0 %v8278_v17  ;;  %v3202_v7 = vmul.f32 %v3074_v50, %v2946_v34  ;;  %5165 = vmatpush3.bf16.msra.mxu1 %v3543_v2  ;;  %v2962_v8 = vmul.f32 %v10624_v13, %v2727_v59  ;;  %v3093_v42 = vld [vmem:[%s9980_s4 + $0xb8] sm:$0xff]  ;;  %v2964_v34 = vmul.f32 %v10625_v6, %v2731_v44  ;;  %v3091_v59 = vld [vmem:[%s9980_s4 + $0xa8] sm:$0xff]  ;;  %v10627_v44 = vld [vmem:[#allocation38_spill] sm:$0xff] }
 0x2e2   :  { %v8344_v56 = vpop.eup %5563  ;;  %v2729_v32 = vmul.f32 2.0, %v5562_v48  ;;  %5583 = vrcp.f32 %v2479_v52  ;;  %v2449_v11 = vpop.xlane.xlu0 %2448  ;;  %v3203_v5 = vmul.f32 %v3075_v38, %v2947_v10  ;;  %5136 = vmatprep.subr.bf16.mxu0 %v8297_v60  ;;  %5166 = vmatprep.subr.bf16.mxu1 %v3544_v15  ;;  %v3204_v39 = vmul.f32 %v3076_v12, %v2948_v3  ;;  %v3433_v38 = vld [vmem:[%s9979_s3 + $0x158] sm:$0xff]  ;;  %v10629_v12 = vld [vmem:[#allocation120_spill] sm:$0xff]  ;;  %v3446_v52 = vld [vmem:[%s9979_s3 + $0x1c0] sm:$0xff] }
 0x2e3   :  { %v8354_v2 = vpop.eup %5565  ;;  %5585 = vrcp.f32 %v2449_v11  ;;  %v3545_v50 = vpack.c.bf16 %v3445_v49, %v3444_v57  ;;  %v10626_v10 = vld [vmem:[#allocation41_spill] sm:$0xff]  ;;  %v3092_v49 = vld [vmem:[%s9980_s4 + $0xb0] sm:$0xff] }
 0x2e4   :  { %v8366_v19 = vpop.eup %5567  ;;  %5587 = vpow2.f32 %v2340_v43  ;;  %v10628_v48 = vsub.f32 %v10626_v10, %v10627_v44  ;;  %v2963_v47 = vmul.f32 %v10629_v12, %v2729_v32  ;;  %2550 = vadd.xlane.f32.xlu1 %v8309_v27  ;;  %v3328_v57 = vpack.c.bf16 %v3203_v5, %v3202_v7  ;;  %5137 = vmatpush3.bf16.msra.mxu0 %v8297_v60  ;;  %v3447_v43 = vld [vmem:[%s9979_s3 + $0x1c8] sm:$0xff]  ;;  %v10631_v10 = vld [vmem:[#allocation45_spill] sm:$0xff]  ;;  %v10632_v44 = vld [vmem:[#allocation42_spill] sm:$0xff] }
 0x2e5   :  { %v8383_v13 = vpop.eup %5569  ;;  %5589 = vpow2.f32 %v2334_v31  ;;  %v10630_v7 = vsub.f32 %v10466_v20, %v7906_v53  ;;  %v2459_v11 = vpop.xlane.xlu1 %2458  ;;  %2520 = vadd.xlane.f32.xlu0 %v8324_v22  ;;  %v3329_v5 = vpack.c.bf16 %v3205_v14, %v3204_v39  ;;  %v3221_v60 = vmul.f32 %v3093_v42, %v2965_v35  ;;  %5167 = vmatpush3.bf16.msra.mxu1 %v3544_v15  ;;  %v3434_v20 = vld [vmem:[%s9979_s3 + $0x160] sm:$0xff]  ;;  %v3449_v39 = vld [vmem:[%s9979_s3 + $0x1d8] sm:$0xff] }
 0x2e6   :  { %v2304_v3 = vmul.f32 1.442695, %v10628_v48  ;;  %v5572_v6 = vpop.eup %5571  ;;  %v10633_v48 = vsub.f32 %v10631_v10, %v10632_v44  ;;  %5086 = vmatprep.mubr.bf16.mxu0 %v3328_v57  ;;  %v2481_v1 = vpop.xlane.xlu0 %2480  ;;  %v3218_v27 = vmul.f32 %v3090_v16, %v2962_v8  ;;  %v3219_v17 = vmul.f32 %v3091_v59, %v2963_v47  ;;  %5138 = vmatprep.subr.bf16.mxu0 %v8334_v4  ;;  %v3435_v8 = vld [vmem:[%s9979_s3 + $0x168] sm:$0xff]  ;;  %v3448_v16 = vld [vmem:[%s9979_s3 + $0x1d0] sm:$0xff] }
 0x2e7   :  { %v2314_v32 = vmul.f32 1.442695, %v10630_v7  ;;  %v3539_v31 = vpack.c.bf16 %v3433_v38, %v3432_v25  ;;  %v5574_v53 = vpop.eup %5573  ;;  %v10634_v15 = vsub.f32 %v10469_v30, %v7916_v54  ;;  %5591 = vrcp.f32 %v2481_v1  ;;  %5087 = vmatmul.mubr.bf16.gmra.mrb[68].mxu0 %v3329_v5  ;;  %5168 = vmatprep.subr.bf16.mxu1 %v3545_v50  ;;  %v3436_v47 = vld [vmem:[%s9979_s3 + $0x170] sm:$0xff]  ;;  %v3450_v5 = vld [vmem:[%s9979_s3 + $0x1e0] sm:$0xff] }
 0x2e8   :  { %v2336_v12 = vmul.f32 1.442695, %v10633_v48  ;;  %v3220_v14 = vmul.f32 %v3092_v49, %v2964_v34  ;;  %v3546_v42 = vpack.c.bf16 %v3447_v43, %v3446_v52  ;;  %v5576_v59 = vpop.eup %5575  ;;  %5593 = vpow2.f32 %v2304_v3  ;;  %2562 = vadd.xlane.f32.xlu1 %v8344_v56  ;;  %5139 = vmatpush3.bf16.msra.mxu0 %v8334_v4  ;;  %v10635_v52 = vld [vmem:[#allocation48_spill] sm:$0xff]  ;;  %v10636_v43 = vld [vmem:[#allocation39_spill] sm:$0xff]  ;;  %v10638_v48 = vld [vmem:[#allocation18_spill] sm:$0xff] }
 0x2e9   :  { %v2346_v35 = vmul.f32 1.442695, %v10634_v15  ;;  %v3336_v30 = vpack.c.bf16 %v3219_v17, %v3218_v27  ;;  %v8410_v54 = vpop.eup %5577  ;;  %5595 = vpow2.f32 %v2314_v32  ;;  %v2709_v1 = vmul.f32 2.0, %v5572_v6  ;;  %v2491_v25 = vpop.xlane.xlu1 %2490  ;;  %2552 = vadd.xlane.f32.xlu0 %v8354_v2  ;;  %5169 = vmatpush3.bf16.msra.mxu1 %v3545_v50  ;;  %v3437_v17 = vld [vmem:[%s9979_s3 + $0x178] sm:$0xff] }
 0x2ea   :  { %v2703_v34 = vmul.f32 2.0, %v5576_v59  ;;  %v3337_v38 = vpack.c.bf16 %v3221_v60, %v3220_v14  ;;  %v5580_v27 = vpop.eup %5579  ;;  %5597 = vpow2.f32 %v2336_v12  ;;  %v2461_v4 = vpop.xlane.xlu0 %2460  ;;  %5140 = vmatprep.subr.bf16.mxu0 %v3539_v31  ;;  %v3540_v3 = vpack.c.bf16 %v3435_v8, %v3434_v20  ;;  %5170 = vmatprep.subr.bf16.mxu1 %v3546_v42  ;;  %v3451_v60 = vld [vmem:[%s9979_s3 + $0x1e8] sm:$0xff]  ;;  %v10639_v20 = vld [vmem:[#allocation121_spill] sm:$0xff]  ;;  %v3452_v14 = vld [vmem:[%s9979_s3 + $0x1f0] sm:$0xff] }
 0x2eb   :  { %5118 = vmatprep.mubr.bf16.mxu1 %v3336_v30  ;;  %v3547_v57 = vpack.c.bf16 %v3449_v39, %v3448_v16  ;;  %v5582_v49 = vpop.eup %5581  ;;  %5599 = vpow2.f32 %v2346_v35  ;;  %v10637_v50 = vsub.f32 %v10635_v52, %v10636_v43  ;;  %v2707_v32 = vmul.f32 2.0, %v5574_v53  ;;  %v10642_v52 = vld [vmem:[#allocation52_spill] sm:$0xff]  ;;  %v10643_v43 = vld [vmem:[#allocation43_spill] sm:$0xff] }
 0x2ec   :  { %5119 = vmatmul.mubr.bf16.gmra.mrb[68].mxu1 %v3337_v38  ;;  %v5584_v6 = vpop.eup %5583  ;;  %5601 = vrcp.f32 %v2461_v4  ;;  %2594 = vadd.xlane.f32.xlu1 %v8366_v19  ;;  %v3541_v10 = vpack.c.bf16 %v3437_v17, %v3436_v47  ;;  %v2953_v12 = vmul.f32 %v10638_v48, %v2709_v1  ;;  %v2950_v53 = vmul.f32 %v10639_v20, %v2703_v34  ;;  %v10641_v47 = vld [vmem:[#allocation119_spill] sm:$0xff] }
 0x2ed   :  { %v2316_v7 = vmul.f32 1.442695, %v10637_v50  ;;  %5141 = vmatpush3.bf16.msra.mxu0 %v3539_v31  ;;  %v5586_v44 = vpop.eup %5585  ;;  %v2741_v15 = vmul.f32 2.0, %v5580_v27  ;;  %5603 = vrcp.f32 %v2459_v11  ;;  %v2455_v35 = vpop.xlane.xlu1 %2454  ;;  %2564 = vadd.xlane.f32.xlu0 %v8383_v13  ;;  %v3453_v31 = vld [vmem:[%s9979_s3 + $0x1f8] sm:$0xff]  ;;  %v2735_v16 = vmul.f32 2.0, %v5584_v6  ;;  %v3078_v11 = vld [vmem:[%s9980_s4 + $0x40] sm:$0xff] }
 0x2ee   :  { %5171 = vmatpush3.bf16.msra.mxu1 %v3546_v42  ;;  %v8438_v8 = vpop.eup %5587  ;;  %v2705_v39 = vmul.f32 2.0, %v5586_v44  ;;  %5605 = vrcp.f32 %v2455_v35  ;;  %v2493_v59 = vpop.xlane.xlu0 %2492  ;;  %v3081_v42 = vld [vmem:[%s9980_s4 + $0x58] sm:$0xff]  ;;  %5142 = vmatprep.subr.bf16.mxu0 %v3540_v3  ;;  %v3548_v30 = vpack.c.bf16 %v3451_v60, %v3450_v5  ;;  %v10640_v34 = vsub.f32 %v10472_v45, %v7926_v58  ;;  %v3079_v4 = vld [vmem:[%s9980_s4 + $0x48] sm:$0xff]  ;;  %v10645_v44 = vld [vmem:[#allocation124_spill] sm:$0xff] }
 0x2ef   :  { %5172 = vmatprep.subr.bf16.mxu1 %v3547_v57  ;;  %v8446_v1 = vpop.eup %5589  ;;  %5607 = vpow2.f32 %v2316_v7  ;;  %v2952_v17 = vmul.f32 %v10641_v47, %v2707_v32  ;;  %v2739_v27 = vmul.f32 2.0, %v5582_v49  ;;  %v10644_v50 = vsub.f32 %v10642_v52, %v10643_v43  ;;  %v3080_v45 = vld [vmem:[%s9980_s4 + $0x50] sm:$0xff]  ;;  %v10646_v7 = vld [vmem:[#allocation122_spill] sm:$0xff] }
 0x2f0   :  { %v2310_v38 = vmul.f32 1.442695, %v10640_v34  ;;  %v2951_v5 = vmul.f32 %v10645_v44, %v2705_v39  ;;  %5609 = vrcp.f32 %v2493_v59  ;;  %2558 = vadd.xlane.f32.xlu1 %v8410_v54  ;;  %v3549_v58 = vpack.c.bf16 %v3453_v31, %v3452_v14  ;;  %v10647_v39 = vld [vmem:[#allocation123_spill] sm:$0xff] }
 0x2f1   :  { %v2348_v6 = vmul.f32 1.442695, %v10644_v50  ;;  %5143 = vmatpush3.bf16.msra.mxu0 %v3540_v3  ;;  %v5592_v49 = vpop.eup %5591  ;;  %v2969_v32 = vmul.f32 %v10646_v7, %v2741_v15  ;;  %5611 = vrcp.f32 %v2491_v25  ;;  %v2487_v60 = vpop.xlane.xlu1 %2486  ;;  %2596 = vadd.xlane.f32.xlu0 %v8438_v8  ;;  %v3206_v48 = vmul.f32 %v3078_v11, %v2950_v53  ;;  %v3097_v3 = vld [vmem:[%s9980_s4 + $0xd8] sm:$0xff]  ;;  %v3095_v14 = vld [vmem:[%s9980_s4 + $0xc8] sm:$0xff]  ;;  %v10652_v7 = vld [vmem:[#allocation46_spill] sm:$0xff] }
 0x2f2   :  { %v3209_v20 = vmul.f32 %v3081_v42, %v2953_v12  ;;  %5173 = vmatpush3.bf16.msra.mxu1 %v3547_v57  ;;  %v8465_v35 = vpop.eup %5593  ;;  %v2966_v59 = vmul.f32 %v10647_v39, %v2735_v16  ;;  %v2737_v34 = vmul.f32 2.0, %v5592_v49  ;;  %5613 = vrcp.f32 %v2487_v60  ;;  %v2457_v47 = vpop.xlane.xlu0 %2456  ;;  %5144 = vmatprep.subr.bf16.mxu0 %v3541_v10  ;;  %v10648_v15 = vld [vmem:[#allocation5_spill] sm:$0xff]  ;;  %v3094_v12 = vld [vmem:[%s9980_s4 + $0xc0] sm:$0xff] }
 0x2f3   :  { %v3207_v52 = vmul.f32 %v3079_v4, %v2951_v5  ;;  %5174 = vmatprep.subr.bf16.mxu1 %v3548_v30  ;;  %v8471_v25 = vpop.eup %5595  ;;  %v2968_v53 = vmul.f32 %v10648_v15, %v2739_v27  ;;  %5615 = vrcp.f32 %v2457_v47  ;;  %v3208_v57 = vmul.f32 %v3080_v45, %v2952_v17  ;;  %v10649_v16 = vld [vmem:[#allocation125_spill] sm:$0xff]  ;;  %v3096_v27 = vld [vmem:[%s9980_s4 + $0xd0] sm:$0xff] }
 0x2f4   :  { %v8480_v31 = vpop.eup %5597  ;;  %v2967_v11 = vmul.f32 %v10649_v16, %v2737_v34  ;;  %2590 = vadd.xlane.f32.xlu1 %v8446_v1  ;;  %5617 = vpow2.f32 %v2310_v38  ;;  %v10650_v4 = vsub.f32 %v10475_v21, %v7936_v41  ;;  %v3225_v5 = vmul.f32 %v3097_v3, %v2969_v32  ;;  %v10651_v49 = vld [vmem:[#allocation49_spill] sm:$0xff] }
 0x2f5   :  { %v3330_v42 = vpack.c.bf16 %v3207_v52, %v3206_v48  ;;  %5145 = vmatpush3.bf16.msra.mxu0 %v3541_v10  ;;  %v8487_v17 = vpop.eup %5599  ;;  %v8492_v50 = vpop.xlane.xlu1 %1986  ;;  %2560 = vadd.xlane.f32.xlu0 %v8465_v35  ;;  %v3331_v44 = vpack.c.bf16 %v3209_v20, %v3208_v57  ;;  %5619 = vpow2.f32 %v2348_v6  ;;  %v10653_v60 = vsub.f32 %v10651_v49, %v10652_v7  ;;  %v10654_v6 = vld [vmem:[#allocation50_spill] sm:$0xff] }
 0x2f6   :  { %v2342_v43 = vmul.f32 1.442695, %v10650_v4  ;;  %5175 = vmatpush3.bf16.msra.mxu1 %v3548_v30  ;;  %v5602_v45 = vpop.eup %5601  ;;  %v2489_v48 = vpop.xlane.xlu0 %2488  ;;  %v3222_v38 = vmul.f32 %v3094_v12, %v2966_v59  ;;  %v3223_v39 = vmul.f32 %v3095_v14, %v2967_v11  ;;  %v3224_v41 = vmul.f32 %v3096_v27, %v2968_v53 }
 0x2f7   :  { %v2312_v10 = vmul.f32 1.442695, %v10653_v60  ;;  %5090 = vmatprep.mubr.bf16.mxu0 %v3330_v42  ;;  %5176 = vmatprep.subr.bf16.mxu1 %v3549_v58  ;;  %v5604_v21 = vpop.eup %5603  ;;  %5621 = vrcp.f32 %v2489_v48  ;;  %v10655_v20 = vsub.f32 %v10479_v33, %v10654_v6  ;;  %v2717_v52 = vmul.f32 2.0, %v5602_v45  ;;  %v10657_v33 = vld [vmem:[#allocation47_spill] sm:$0xff]  ;;  %v10662_v48 = vld [vmem:[#allocation22_spill] sm:$0xff] }
 0x2f8   :  { %5091 = vmatmul.mubr.bf16.gmra.mrb[72].mxu0 %v3331_v44  ;;  %v5606_v34 = vpop.eup %5605  ;;  %2570 = vadd.xlane.f32.xlu1 %v8471_v25  ;;  %v3338_v32 = vpack.c.bf16 %v3223_v39, %v3222_v38  ;;  %5623 = vpow2.f32 %v2342_v43  ;;  %v3339_v59 = vpack.c.bf16 %v3225_v5, %v3224_v41  ;;  %v10656_v53 = vsub.f32 %v10480_v28, %v7951_v37  ;;  %v10660_v37 = vld [vmem:[#allocation127_spill] sm:$0xff] }
 0x2f9   :  { %v8499_v30 = vpop.eup %5607  ;;  %v2322_v47 = vmul.f32 1.442695, %v10655_v20  ;;  %v8504_v3 = vpop.xlane.xlu1 %2018  ;;  %2592 = vadd.xlane.f32.xlu0 %v8480_v31  ;;  %5625 = vpow2.f32 %v2312_v10  ;;  %v2711_v12 = vmul.f32 2.0, %v5606_v34  ;;  %v10658_v11 = vsub.f32 %v10483_v51, %v10657_v33  ;;  %v10661_v51 = vld [vmem:[#allocation129_spill] sm:$0xff]  ;;  %v3083_v41 = vld [vmem:[%s9980_s4 + $0x68] sm:$0xff]  ;;  %v3084_v20 = vld [vmem:[%s9980_s4 + $0x70] sm:$0xff] }
 0x2fa   :  { %5177 = vmatpush3.bf16.msra.mxu1 %v3549_v58  ;;  %v5610_v15 = vpop.eup %5609  ;;  %v2344_v57 = vmul.f32 1.442695, %v10656_v53  ;;  %5122 = vmatprep.mubr.bf16.mxu1 %v3338_v32  ;;  %v8510_v14 = vpop.xlane.xlu0 %1988  ;;  %v2715_v27 = vmul.f32 2.0, %v5604_v21  ;;  %v10659_v58 = vsub.f32 %v10484_v26, %v7964_v9  ;;  %v2957_v44 = vmul.f32 %v10660_v37, %v2717_v52  ;;  %v3085_v26 = vld [vmem:[%s9980_s4 + $0x78] sm:$0xff]  ;;  %v3082_v21 = vld [vmem:[%s9980_s4 + $0x60] sm:$0xff]  ;;  %v10663_v32 = vld [vmem:[#allocation132_spill] sm:$0xff] }
 0x2fb   :  { %v5612_v16 = vpop.eup %5611  ;;  %v2354_v42 = vmul.f32 1.442695, %v10658_v11  ;;  %5123 = vmatmul.mubr.bf16.gmra.mrb[72].mxu1 %v3339_v59  ;;  %5627 = vpow2.f32 %v2322_v47  ;;  %v2749_v5 = vmul.f32 2.0, %v5610_v15  ;;  %v2954_v49 = vmul.f32 %v10661_v51, %v2711_v12  ;;  %v10667_v11 = vld [vmem:[#allocation131_spill] sm:$0xff]  ;;  %v3098_v37 = vld [vmem:[%s9980_s4 + $0xe0] sm:$0xff] }
 0x2fc   :  { %v5614_v4 = vpop.eup %5613  ;;  %v2324_v43 = vmul.f32 1.442695, %v10659_v58  ;;  %2602 = vadd.xlane.f32.xlu1 %v8487_v17  ;;  %5629 = vpow2.f32 %v2344_v57  ;;  %v2956_v38 = vmul.f32 %v10662_v48, %v2715_v27  ;;  %v2747_v39 = vmul.f32 2.0, %v5612_v16  ;;  %v10666_v57 = vld [vmem:[#allocation130_spill] sm:$0xff]  ;;  %v10671_v48 = vld [vmem:[#allocation51_spill] sm:$0xff] }
 0x2fd   :  { %v5616_v28 = vpop.eup %5615  ;;  %v8520_v45 = vpop.xlane.xlu1 %1982  ;;  %2572 = vadd.xlane.f32.xlu0 %v8499_v30  ;;  %v2743_v7 = vmul.f32 2.0, %v5614_v4  ;;  %5631 = vpow2.f32 %v2354_v42  ;;  %v10664_v52 = vsub.f32 %v10487_v18, %v7972_v55  ;;  %v10665_v15 = vsub.f32 %v10488_v62, %v7980_v36  ;;  %v3101_v18 = vld [vmem:[%s9980_s4 + $0xf8] sm:$0xff]  ;;  %v10668_v36 = vld [vmem:[#allocation126_spill] sm:$0xff] }
 0x2fe   :  { %v2713_v60 = vmul.f32 2.0, %v5616_v28  ;;  %v8524_v10 = vpop.xlane.xlu0 %2020  ;;  %v8529_v9 = vpop.eup %5617  ;;  %5633 = vpow2.f32 %v2324_v43  ;;  %v2973_v12 = vmul.f32 %v10666_v57, %v2749_v5  ;;  %v3213_v33 = vmul.f32 %v3085_v26, %v2957_v44  ;;  %v3099_v44 = vld [vmem:[%s9980_s4 + $0xe8] sm:$0xff]  ;;  %v10669_v51 = vld [vmem:[#allocation30_spill] sm:$0xff] }
 0x2ff   :  { %v8538_v34 = vpop.eup %5619  ;;  %v2318_v59 = vmul.f32 1.442695, %v10664_v52  ;;  %v2356_v53 = vmul.f32 1.442695, %v10665_v15  ;;  %v2970_v42 = vmul.f32 %v10667_v11, %v2743_v7  ;;  %v3210_v58 = vmul.f32 %v3082_v21, %v2954_v49  ;;  %v10670_v26 = vld [vmem:[#allocation59_spill] sm:$0xff]  ;;  %v3454_v11 = vld [vmem:[%s9979_s3 + $0x200] sm:$0xff] }
 0x300   :  { %v2955_v6 = vmul.f32 %v10663_v32, %v2713_v60  ;;  %2566 = vadd.xlane.f32.xlu1 %v8529_v9  ;;  %v2972_v55 = vmul.f32 %v10668_v36, %v2747_v39  ;;  %v3212_v28 = vmul.f32 %v3084_v20, %v2956_v38  ;;  %v3100_v60 = vld [vmem:[%s9980_s4 + $0xf0] sm:$0xff]  ;;  %v10672_v38 = vsub.f32 %v10670_v26, %v10671_v48  ;;  %v10674_v20 = vld [vmem:[#allocation54_spill] sm:$0xff]  ;;  %v10679_v36 = vld [vmem:[#allocation53_spill] sm:$0xff] }
 0x301   :  { %v5622_v47 = vpop.eup %5621  ;;  %v8552_v16 = vpop.xlane.xlu1 %2014  ;;  %2604 = vadd.xlane.f32.xlu0 %v8538_v34  ;;  %5635 = vpow2.f32 %v2318_v59  ;;  %v3229_v32 = vmul.f32 %v3101_v18, %v2973_v12  ;;  %v3226_v57 = vmul.f32 %v3098_v37, %v2970_v42  ;;  %v10678_v18 = vld [vmem:[#allocation62_spill] sm:$0xff] }
 0x302   :  { %v2745_v27 = vmul.f32 2.0, %v5622_v47  ;;  %v8556_v4 = vpop.xlane.xlu0 %1984  ;;  %v3211_v43 = vmul.f32 %v3083_v41, %v2955_v6  ;;  %v8561_v62 = vpop.eup %5623  ;;  %v2350_v39 = vmul.f32 1.442695, %v10672_v38  ;;  %v3333_v41 = vpack.c.bf16 %v3213_v33, %v3212_v28  ;;  %v10673_v6 = vld [vmem:[#allocation57_spill] sm:$0xff]  ;;  %v10684_v38 = vld [vmem:[#allocation66_spill] sm:$0xff] }
 0x303   :  { %v8570_v5 = vpop.eup %5625  ;;  %5637 = vpow2.f32 %v2356_v53  ;;  %v10675_v47 = vsub.f32 %v10673_v6, %v10674_v20  ;;  %v3228_v53 = vmul.f32 %v3100_v60, %v2972_v55  ;;  %v10680_v28 = vsub.f32 %v10678_v18, %v10679_v36  ;;  %v3470_v20 = vld [vmem:[%s9979_s3 + $0x280] sm:$0xff]  ;;  %v10691_v36 = vld [vmem:[#allocation63_spill] sm:$0xff] }
 0x304   :  { %v2971_v49 = vmul.f32 %v10669_v51, %v2745_v27  ;;  %2598 = vadd.xlane.f32.xlu1 %v8561_v62  ;;  %v3332_v7 = vpack.c.bf16 %v3211_v43, %v3210_v58  ;;  %v3455_v27 = vld [vmem:[%s9979_s3 + $0x208] sm:$0xff]  ;;  %5639 = vpow2.f32 %v2350_v39 }
 0x305   :  { %v8580_v21 = vpop.xlane.xlu1 %1994  ;;  %2568 = vadd.xlane.f32.xlu0 %v8570_v5  ;;  %v2320_v52 = vmul.f32 1.442695, %v10675_v47  ;;  %v8594_v33 = vpop.eup %5627  ;;  %v8596_v12 = vpack.c.bf16 %v3455_v27, %v3454_v11  ;;  %v2330_v37 = vmul.f32 1.442695, %v10680_v28  ;;  %v3341_v51 = vpack.c.bf16 %v3229_v32, %v3228_v53  ;;  %v10685_v39 = vld [vmem:[#allocation55_spill] sm:$0xff] }
 0x306   :  { %5094 = vmatprep.mubr.bf16.mxu0 %v3332_v7  ;;  %v8586_v15 = vpop.xlane.xlu0 %2016  ;;  %v3227_v59 = vmul.f32 %v3099_v44, %v2971_v49  ;;  %10676 = vst [vmem:[#allocation27_spill] sm:$0xff] %v8594_v33  ;;  %v8598_v58 = vpop.eup %5629  ;;  %v10681_v49 = vld [vmem:[#allocation61_spill] sm:$0xff]  ;;  %v10682_v7 = vld [vmem:[#allocation58_spill] sm:$0xff]  ;;  %v3471_v47 = vld [vmem:[%s9979_s3 + $0x288] sm:$0xff] }
 0x307   :  { %5095 = vmatmul.mubr.bf16.gmra.mrb[76].mxu0 %v3333_v41  ;;  %v8601_v43 = vpop.eup %5631  ;;  %5194 = vmatprep.subr.bf16.mxu0 %v8596_v12  ;;  %5641 = vpow2.f32 %v2320_v52  ;;  %v10683_v60 = vsub.f32 %v10681_v49, %v10682_v7  ;;  %v10686_v41 = vsub.f32 %v10684_v38, %v10685_v39  ;;  %v10687_v52 = vld [vmem:[#allocation64_spill] sm:$0xff]  ;;  %v8635_v53 = vpack.c.bf16 %v3471_v47, %v3470_v20  ;;  %v10692_v28 = vld [vmem:[#allocation11_spill] sm:$0xff] }
 0x308   :  { %2578 = vadd.xlane.f32.xlu1 %v8594_v33  ;;  %v3340_v42 = vpack.c.bf16 %v3227_v59, %v3226_v57  ;;  %10677 = vst [vmem:[#allocation133_spill] sm:$0xff] %v8601_v43  ;;  %v8610_v55 = vpop.eup %5633  ;;  %5643 = vpow2.f32 %v2330_v37  ;;  %v10688_v57 = vld [vmem:[#allocation60_spill] sm:$0xff]  ;;  %v10693_v37 = vsub.f32 %v10691_v36, %v10692_v28 }
 0x309   :  { %v8606_v44 = vpop.xlane.xlu1 %2026  ;;  %2600 = vadd.xlane.f32.xlu0 %v8598_v58  ;;  %v2352_v26 = vmul.f32 1.442695, %v10683_v60  ;;  %v2362_v32 = vmul.f32 1.442695, %v10686_v41  ;;  %v10689_v59 = vsub.f32 %v10687_v52, %v10688_v57  ;;  %5226 = vmatprep.subr.bf16.mxu1 %v8635_v53  ;;  %v10694_v7 = vld [vmem:[#allocation112_spill] sm:$0xff]  ;;  %v10700_v52 = vld [vmem:[#allocation71_spill] sm:$0xff] }
 0x30a   :  { %5126 = vmatprep.mubr.bf16.mxu1 %v3340_v42  ;;  %v8615_v48 = vpop.xlane.xlu0 %1996  ;;  %v10695_v60 = vsub.f32 %v10532_v63, %v10694_v7  ;;  %v2144_v57 = vsub.f32 %v10700_v52, %v8492_v50  ;;  %v10701_v63 = vld [vmem:[#allocation65_spill] sm:$0xff]  ;;  %v10706_v50 = vld [vmem:[#allocation76_spill] sm:$0xff] }
 0x30b   :  { %5127 = vmatmul.mubr.bf16.gmra.mrb[76].mxu1 %v3341_v51  ;;  %5645 = vpow2.f32 %v2352_v26  ;;  %v2332_v11 = vmul.f32 1.442695, %v10689_v59  ;;  %v8637_v42 = vpop.eup %5635  ;;  %v2326_v51 = vmul.f32 1.442695, %v10693_v37 }
 0x30c   :  { %2610 = vadd.xlane.f32.xlu1 %v8601_v43  ;;  %5647 = vpow2.f32 %v2362_v32  ;;  %v2364_v26 = vmul.f32 1.442695, %v10695_v60  ;;  %v10698_v32 = vld [vmem:[#allocation13_spill] sm:$0xff]  ;;  %v2160_v60 = vsub.f32 %v10706_v50, %v8504_v3 }
 0x30d   :  { %v8621_v6 = vpop.xlane.xlu1 %1990  ;;  %2580 = vadd.xlane.f32.xlu0 %v8610_v55  ;;  %v8639_v18 = vpop.eup %5637  ;;  %5649 = vpow2.f32 %v2332_v11  ;;  %v10699_v20 = vsub.f32 %v10544_v61, %v10698_v32  ;;  %v10702_v11 = vld [vmem:[#allocation118_spill] sm:$0xff]  ;;  %v2370_v61 = vmul.f32 1.442695, %v2144_v57  ;;  %v10713_v57 = vld [vmem:[#allocation72_spill] sm:$0xff] }
 0x30e   :  { %v8633_v27 = vpop.xlane.xlu0 %2028  ;;  %10690 = vst [vmem:[#allocation36_spill] sm:$0xff] %v8639_v18  ;;  %v8654_v39 = vpop.eup %5639  ;;  %5651 = vpow2.f32 %v2326_v51  ;;  %v10703_v36 = vsub.f32 %v10701_v63, %v10702_v11  ;;  %v10710_v11 = vld [vmem:[#allocation73_spill] sm:$0xff]  ;;  %v2402_v3 = vmul.f32 1.442695, %v2160_v60 }
 0x30f   :  { %10696 = vst [vmem:[#allocation29_spill] sm:$0xff] %v8654_v39  ;;  %v2358_v47 = vmul.f32 1.442695, %v10699_v20  ;;  %5653 = vpow2.f32 %v2364_v26  ;;  %v10707_v26 = vld [vmem:[#allocation69_spill] sm:$0xff]  ;;  %v10708_v20 = vld [vmem:[#allocation15_spill] sm:$0xff] }
 0x310   :  { %2574 = vadd.xlane.f32.xlu1 %v8637_v42  ;;  %v2328_v28 = vmul.f32 1.442695, %v10703_v36  ;;  %v10709_v52 = vsub.f32 %v10707_v26, %v10708_v20  ;;  %v2145_v36 = vsub.f32 %v10710_v11, %v8510_v14  ;;  %v10714_v14 = vld [vmem:[#allocation79_spill] sm:$0xff] }
 0x311   :  { %v8646_v49 = vpop.xlane.xlu1 %2022  ;;  %2612 = vadd.xlane.f32.xlu0 %v8639_v18  ;;  %v8656_v41 = vpop.eup %5641  ;;  %5655 = vpow2.f32 %v2358_v47  ;;  %v2161_v20 = vsub.f32 %v10714_v14, %v8524_v10  ;;  %v10718_v10 = vld [vmem:[#allocation74_spill] sm:$0xff] }
 0x312   :  { %v8652_v38 = vpop.xlane.xlu0 %1992  ;;  %10697 = vst [vmem:[#allocation77_spill] sm:$0xff] %v8656_v41  ;;  %v8672_v7 = vpop.eup %5643  ;;  %5657 = vpow2.f32 %v2328_v28  ;;  %v2360_v63 = vmul.f32 1.442695, %v10709_v52  ;;  %v2142_v28 = vsub.f32 %v10713_v57, %v8520_v45  ;;  %v2372_v26 = vmul.f32 1.442695, %v2145_v36  ;;  %v10717_v45 = vld [vmem:[#allocation78_spill] sm:$0xff] }
 0x313   :  { %10704 = vst [vmem:[#allocation81_spill] sm:$0xff] %v8672_v7  ;;  %5659 = vpow2.f32 %v2370_v61  ;;  %v2158_v60 = vsub.f32 %v10717_v45, %v8552_v16  ;;  %v2143_v36 = vsub.f32 %v10718_v10, %v8556_v4  ;;  %v10721_v16 = vld [vmem:[#allocation82_spill] sm:$0xff]  ;;  %v10722_v4 = vld [vmem:[#allocation80_spill] sm:$0xff] }
 0x314   :  { %2606 = vadd.xlane.f32.xlu1 %v8654_v39  ;;  %5661 = vpow2.f32 %v2360_v63  ;;  %v2366_v61 = vmul.f32 1.442695, %v2142_v28  ;;  %v2404_v63 = vmul.f32 1.442695, %v2161_v20  ;;  %v2148_v28 = vsub.f32 %v10721_v16, %v8580_v21  ;;  %v10725_v21 = vld [vmem:[#allocation88_spill] sm:$0xff] }
 0x315   :  { %v8664_v59 = vpop.xlane.xlu1 %2002  ;;  %2576 = vadd.xlane.f32.xlu0 %v8656_v41  ;;  %v8674_v51 = vpop.eup %5645  ;;  %5663 = vpow2.f32 %v2402_v3  ;;  %v2398_v3 = vmul.f32 1.442695, %v2158_v60  ;;  %v2159_v20 = vsub.f32 %v10722_v4, %v8586_v15  ;;  %v2164_v60 = vsub.f32 %v10725_v21, %v8606_v44  ;;  %v10726_v15 = vld [vmem:[#allocation85_spill] sm:$0xff]  ;;  %v10729_v44 = vld [vmem:[#allocation84_spill] sm:$0xff] }
 0x316   :  { %v8670_v37 = vpop.xlane.xlu0 %2024  ;;  %10705 = vst [vmem:[#allocation70_spill] sm:$0xff] %v8674_v51  ;;  %5665 = vpow2.f32 %v2372_v26  ;;  %v2368_v26 = vmul.f32 1.442695, %v2143_v36  ;;  %v2149_v36 = vsub.f32 %v10726_v15, %v8615_v48  ;;  %v10730_v48 = vld [vmem:[#allocation91_spill] sm:$0xff] }
 0x317   :  { %5667 = vpow2.f32 %v2366_v61  ;;  %v2378_v61 = vmul.f32 1.442695, %v2148_v28  ;;  %v2146_v28 = vsub.f32 %v10729_v44, %v8621_v6  ;;  %v10734_v6 = vld [vmem:[#allocation86_spill] sm:$0xff] }
 0x318   :  { %2586 = vadd.xlane.f32.xlu1 %v8672_v7  ;;  %v8689_v7 = vpop.eup %5647  ;;  %5669 = vpow2.f32 %v2404_v63  ;;  %v2400_v63 = vmul.f32 1.442695, %v2159_v20  ;;  %v2165_v20 = vsub.f32 %v10730_v48, %v8633_v27  ;;  %v2147_v44 = vsub.f32 %v10734_v6, %v8652_v38 }
 0x319   :  { %v8679_v32 = vpop.xlane.xlu1 %2034  ;;  %2608 = vadd.xlane.f32.xlu0 %v8674_v51  ;;  %10711 = vst [vmem:[#allocation33_spill] sm:$0xff] %v8689_v7  ;;  %v8691_v47 = vpop.eup %5649  ;;  %5671 = vpow2.f32 %v2398_v3  ;;  %v2410_v3 = vmul.f32 1.442695, %v2164_v60 }
 0x31a   :  { %v8687_v43 = vpop.xlane.xlu0 %2004  ;;  %10712 = vst [vmem:[#allocation34_spill] sm:$0xff] %v8691_v47  ;;  %v8703_v11 = vpop.eup %5651  ;;  %5673 = vpow2.f32 %v2368_v26  ;;  %v2380_v26 = vmul.f32 1.442695, %v2149_v36  ;;  %v10735_v36 = vld [vmem:[#allocation94_spill] sm:$0xff]  ;;  %v2412_v48 = vmul.f32 1.442695, %v2165_v20 }
 0x31b   :  { %10715 = vst [vmem:[#allocation89_spill] sm:$0xff] %v8703_v11  ;;  %v8705_v51 = vpop.eup %5653  ;;  %5675 = vpow2.f32 %v2378_v61 }
 0x31c   :  { %2618 = vadd.xlane.f32.xlu1 %v8689_v7  ;;  %10716 = vst [vmem:[#allocation83_spill] sm:$0xff] %v8705_v51  ;;  %v8717_v7 = vpop.eup %5655  ;;  %5677 = vpow2.f32 %v2400_v63  ;;  %v2374_v63 = vmul.f32 1.442695, %v2146_v28 }
 0x31d   :  { %v8696_v50 = vpop.xlane.xlu1 %1998  ;;  %2588 = vadd.xlane.f32.xlu0 %v8691_v47  ;;  %10719 = vst [vmem:[#allocation87_spill] sm:$0xff] %v8717_v7  ;;  %v8719_v47 = vpop.eup %5657  ;;  %5679 = vpow2.f32 %v2410_v3  ;;  %v10738_v3 = vld [vmem:[#allocation100_spill] sm:$0xff] }
 0x31e   :  { %v8701_v52 = vpop.xlane.xlu0 %2036  ;;  %10720 = vst [vmem:[#allocation75_spill] sm:$0xff] %v8719_v47  ;;  %5681 = vpow2.f32 %v2380_v26  ;;  %v2168_v28 = vsub.f32 %v10738_v3, %v8679_v32  ;;  %v10741_v32 = vld [vmem:[#allocation97_spill] sm:$0xff] }
 0x31f   :  { %5683 = vpow2.f32 %v2374_v63  ;;  %v2153_v3 = vsub.f32 %v10741_v32, %v8687_v43 }
 0x320   :  { %2582 = vadd.xlane.f32.xlu1 %v8703_v11  ;;  %5685 = vpow2.f32 %v2412_v48 }
 0x321   :  { %v8710_v57 = vpop.xlane.xlu1 %2030  ;;  %2620 = vadd.xlane.f32.xlu0 %v8705_v51  ;;  %v8731_v51 = vpop.eup %5659  ;;  %v2388_v48 = vmul.f32 1.442695, %v2153_v3 }
 0x322   :  { %v8715_v14 = vpop.xlane.xlu0 %2000  ;;  %10723 = vst [vmem:[#allocation95_spill] sm:$0xff] %v8731_v51  ;;  %v8733_v11 = vpop.eup %5661 }
 0x323   :  { %10724 = vst [vmem:[#allocation37_spill] sm:$0xff] %v8733_v11 }
 0x324   :  { %2614 = vadd.xlane.f32.xlu1 %v8717_v7  ;;  %v8745_v7 = vpop.eup %5663 }
 0x325   :  { %v8724_v45 = vpop.xlane.xlu1 %2010  ;;  %2584 = vadd.xlane.f32.xlu0 %v8719_v47  ;;  %10727 = vst [vmem:[#allocation32_spill] sm:$0xff] %v8745_v7  ;;  %v8747_v47 = vpop.eup %5665 }
 0x326   :  { %v8729_v10 = vpop.xlane.xlu0 %2032  ;;  %10728 = vst [vmem:[#allocation40_spill] sm:$0xff] %v8747_v47 }
 0x328   :  { %2626 = vadd.xlane.f32.xlu1 %v8731_v51  ;;  %v8759_v51 = vpop.eup %5667 }
 0x329   :  { %v8738_v16 = vpop.xlane.xlu1 %2042  ;;  %2616 = vadd.xlane.f32.xlu0 %v8733_v11  ;;  %10731 = vst [vmem:[#allocation31_spill] sm:$0xff] %v8759_v51  ;;  %v8763_v60 = vpop.eup %5669 }
 0x32a   :  { %v8743_v4 = vpop.xlane.xlu0 %2012  ;;  %10733 = vst [vmem:[#allocation101_spill] sm:$0xff] %v8763_v60  ;;  %v8777_v39 = vpop.eup %5671 }
 0x32b   :  { %10737 = vst [vmem:[#allocation105_spill] sm:$0xff] %v8777_v39  ;;  %v8781_v6 = vpop.eup %5673 }
 0x32c   :  { %2658 = vadd.xlane.f32.xlu1 %v8745_v7  ;;  %v10732_v7 = vld [vmem:[#allocation90_spill] sm:$0xff]  ;;  %10739 = vst [vmem:[#allocation44_spill] sm:$0xff] %v8781_v6 }
 0x32d   :  { %v8752_v21 = vpop.xlane.xlu1 %2006  ;;  %2628 = vadd.xlane.f32.xlu0 %v8747_v47  ;;  %v2162_v61 = vsub.f32 %v10732_v7, %v8646_v49  ;;  %v2152_v47 = vsub.f32 %v10735_v36, %v8664_v59  ;;  %v10736_v49 = vld [vmem:[#allocation92_spill] sm:$0xff]  ;;  %v2376_v59 = vmul.f32 1.442695, %v2147_v44 }
 0x32e   :  { %v8757_v15 = vpop.xlane.xlu0 %2044  ;;  %v2163_v7 = vsub.f32 %v10736_v49, %v8670_v37  ;;  %v8787_v49 = vpop.eup %5675 }
 0x32f   :  { %v2406_v38 = vmul.f32 1.442695, %v2162_v61  ;;  %v2386_v36 = vmul.f32 1.442695, %v2152_v47  ;;  %10740 = vst [vmem:[#allocation35_spill] sm:$0xff] %v8787_v49 }
 0x330   :  { %2622 = vadd.xlane.f32.xlu1 %v8759_v51  ;;  %v2408_v37 = vmul.f32 1.442695, %v2163_v7  ;;  %v2418_v61 = vmul.f32 1.442695, %v2168_v28  ;;  %v10746_v28 = vld [vmem:[#allocation103_spill] sm:$0xff]  ;;  %v3118_v51 = vld [vmem:[%s9980_s4 + $0x180] sm:$0xff] }
 0x331   :  { %v8770_v27 = vpop.xlane.xlu1 %2038  ;;  %2660 = vadd.xlane.f32.xlu0 %v8763_v60  ;;  %5687 = vpow2.f32 %v2406_v38  ;;  %v8791_v60 = vpop.eup %5677  ;;  %v10745_v38 = vld [vmem:[#allocation96_spill] sm:$0xff] }
 0x332   :  { %v8775_v11 = vpop.xlane.xlu0 %2008  ;;  %10742 = vst [vmem:[#allocation93_spill] sm:$0xff] %v8791_v60  ;;  %5689 = vpow2.f32 %v2376_v59  ;;  %v8795_v63 = vpop.eup %5679  ;;  %v2150_v43 = vsub.f32 %v10745_v38, %v8696_v50  ;;  %v2169_v59 = vsub.f32 %v10746_v28, %v8701_v52  ;;  %v10752_v28 = vld [vmem:[#allocation106_spill] sm:$0xff] }
 0x333   :  { %5691 = vpow2.f32 %v2386_v36  ;;  %10743 = vst [vmem:[#allocation115_spill] sm:$0xff] %v8795_v63  ;;  %v8797_v7 = vpop.eup %5681 }
 0x334   :  { %2654 = vadd.xlane.f32.xlu1 %v8777_v39  ;;  %5693 = vpow2.f32 %v2408_v37  ;;  %10744 = vst [vmem:[#allocation107_spill] sm:$0xff] %v8797_v7  ;;  %v10747_v37 = vld [vmem:[#allocation102_spill] sm:$0xff]  ;;  %v8807_v3 = vpop.eup %5683  ;;  %v2382_v50 = vmul.f32 1.442695, %v2150_v43  ;;  %v10754_v43 = vld [vmem:[#allocation104_spill] sm:$0xff] }
 0x335   :  { %v2499_v26 = vpop.xlane.xlu1 %2498  ;;  %2624 = vadd.xlane.f32.xlu0 %v8781_v6  ;;  %5695 = vpow2.f32 %v2418_v61  ;;  %v2166_v32 = vsub.f32 %v10747_v37, %v8710_v57  ;;  %10748 = vst [vmem:[#allocation113_spill] sm:$0xff] %v8807_v3  ;;  %v2156_v57 = vsub.f32 %v10752_v28, %v8724_v45  ;;  %v3456_v6 = vld [vmem:[%s9979_s3 + $0x210] sm:$0xff] }
 0x336   :  { %v8785_v20 = vpop.xlane.xlu0 %2040 }
 0x337   :  { %v2414_v37 = vmul.f32 1.442695, %v2166_v32  ;;  %v2394_v32 = vmul.f32 1.442695, %v2156_v57 }
 0x338   :  { %2634 = vadd.xlane.f32.xlu1 %v8787_v49  ;;  %v8809_v49 = vpop.eup %5685 }
 0x339   :  { %v2531_v47 = vpop.xlane.xlu1 %2530  ;;  %2656 = vadd.xlane.f32.xlu0 %v8791_v60  ;;  %10749 = vst [vmem:[#allocation99_spill] sm:$0xff] %v8809_v49 }
 0x33a   :  { %v2501_v44 = vpop.xlane.xlu0 %2500 }
 0x33b   :  { %5697 = vrcp.f32 %v2501_v44  ;;  %v10750_v44 = vld [vmem:[#allocation98_spill] sm:$0xff]  ;;  %v8814_v52 = vpop.eup %5687 }
 0x33c   :  { %2666 = vadd.xlane.f32.xlu1 %v8795_v63  ;;  %5699 = vrcp.f32 %v2499_v26  ;;  %v2151_v38 = vsub.f32 %v10750_v44, %v8715_v14  ;;  %10751 = vst [vmem:[#allocation41_spill] sm:$0xff] %v8814_v52  ;;  %v2420_v26 = vmul.f32 1.442695, %v2169_v59  ;;  %v2167_v63 = vsub.f32 %v10754_v43, %v8729_v10  ;;  %v10756_v44 = vld [vmem:[#allocation110_spill] sm:$0xff] }
 0x33d   :  { %v2495_v36 = vpop.xlane.xlu1 %2494  ;;  %2636 = vadd.xlane.f32.xlu0 %v8797_v7  ;;  %v2157_v59 = vsub.f32 %v10756_v44, %v8743_v4 }
 0x33e   :  { %5701 = vrcp.f32 %v2495_v36  ;;  %v2533_v61 = vpop.xlane.xlu0 %2532  ;;  %v2384_v45 = vmul.f32 1.442695, %v2151_v38 }
 0x33f   :  { %5703 = vpow2.f32 %v2388_v48  ;;  %v8819_v48 = vpop.eup %5689  ;;  %v2396_v4 = vmul.f32 1.442695, %v2157_v59 }
 0x340   :  { %5705 = vrcp.f32 %v2533_v61  ;;  %2630 = vadd.xlane.f32.xlu1 %v8807_v3  ;;  %10753 = vst [vmem:[#allocation38_spill] sm:$0xff] %v8819_v48  ;;  %v8823_v61 = vpop.eup %5691 }
 0x341   :  { %5707 = vrcp.f32 %v2531_v47  ;;  %v2527_v36 = vpop.xlane.xlu1 %2526  ;;  %2668 = vadd.xlane.f32.xlu0 %v8809_v49  ;;  %10755 = vst [vmem:[#allocation120_spill] sm:$0xff] %v8823_v61  ;;  %v8827_v3 = vpop.eup %5693 }
 0x342   :  { %5709 = vrcp.f32 %v2527_v36  ;;  %v2497_v14 = vpop.xlane.xlu0 %2496  ;;  %10757 = vst [vmem:[#allocation45_spill] sm:$0xff] %v8827_v3  ;;  %v8830_v47 = vpop.eup %5695  ;;  %v2416_v36 = vmul.f32 1.442695, %v2167_v63 }
 0x343   :  { %5711 = vrcp.f32 %v2497_v14  ;;  %10758 = vst [vmem:[#allocation42_spill] sm:$0xff] %v8830_v47  ;;  %v10759_v14 = vld [vmem:[#allocation108_spill] sm:$0xff] }
 0x344   :  { %5713 = vpow2.f32 %v2382_v50  ;;  %2662 = vadd.xlane.f32.xlu1 %v8814_v52  ;;  %v2154_v44 = vsub.f32 %v10759_v14, %v8752_v21  ;;  %v10761_v21 = vld [vmem:[#allocation116_spill] sm:$0xff] }
 0x345   :  { %5715 = vpow2.f32 %v2420_v26  ;;  %v2507_v28 = vpop.xlane.xlu1 %2506  ;;  %2632 = vadd.xlane.f32.xlu0 %v8819_v48  ;;  %v5698_v10 = vpop.eup %5697 }
 0x346   :  { %5717 = vpow2.f32 %v2414_v37  ;;  %v2529_v43 = vpop.xlane.xlu0 %2528  ;;  %v5700_v49 = vpop.eup %5699  ;;  %v2757_v26 = vmul.f32 2.0, %v5698_v10  ;;  %v2390_v48 = vmul.f32 1.442695, %v2154_v44  ;;  %v10763_v10 = vld [vmem:[#allocation109_spill] sm:$0xff] }
 0x347   :  { %5719 = vrcp.f32 %v2529_v43  ;;  %v2170_v43 = vsub.f32 %v10761_v21, %v8770_v27  ;;  %v10766_v27 = vld [vmem:[#allocation114_spill] sm:$0xff] }
 0x348   :  { %v5702_v50 = vpop.eup %5701  ;;  %5721 = vpow2.f32 %v2384_v45  ;;  %2642 = vadd.xlane.f32.xlu1 %v8823_v61  ;;  %v2755_v45 = vmul.f32 2.0, %v5700_v49  ;;  %v10762_v61 = vld [vmem:[#allocation111_spill] sm:$0xff]  ;;  %v2172_v49 = vsub.f32 %v10766_v27, %v8738_v16 }
 0x349   :  { %v8836_v38 = vpop.eup %5703  ;;  %5723 = vpow2.f32 %v2394_v32  ;;  %v2751_v57 = vmul.f32 2.0, %v5702_v50  ;;  %v2539_v52 = vpop.xlane.xlu1 %2538  ;;  %2664 = vadd.xlane.f32.xlu0 %v8827_v3  ;;  %v2155_v7 = vsub.f32 %v10762_v61, %v8775_v11  ;;  %v2977_v50 = vmul.f32 %v10763_v10, %v2757_v26  ;;  %v10764_v3 = vld [vmem:[#allocation14_spill] sm:$0xff]  ;;  %v3105_v11 = vld [vmem:[%s9980_s4 + $0x118] sm:$0xff]  ;;  %v3103_v16 = vld [vmem:[%s9980_s4 + $0x108] sm:$0xff] }
 0x34a   :  { %10760 = vst [vmem:[#allocation48_spill] sm:$0xff] %v8836_v38  ;;  %v5706_v63 = vpop.eup %5705  ;;  %5725 = vpow2.f32 %v2416_v36  ;;  %v2509_v37 = vpop.xlane.xlu0 %2508 }
 0x34b   :  { %v5708_v59 = vpop.eup %5707  ;;  %5727 = vpow2.f32 %v2396_v4  ;;  %v2974_v36 = vmul.f32 %v10764_v3, %v2751_v57  ;;  %v2789_v60 = vmul.f32 2.0, %v5706_v63  ;;  %v3102_v3 = vld [vmem:[%s9980_s4 + $0x100] sm:$0xff]  ;;  %v2422_v57 = vmul.f32 1.442695, %v2170_v43  ;;  %v10768_v63 = vld [vmem:[#allocation56_spill] sm:$0xff] }
 0x34c   :  { %v5710_v14 = vpop.eup %5709  ;;  %5729 = vrcp.f32 %v2509_v37  ;;  %2674 = vadd.xlane.f32.xlu1 %v8830_v47  ;;  %v2976_v21 = vmul.f32 %v10768_v63, %v2755_v45  ;;  %v2787_v10 = vmul.f32 2.0, %v5708_v59  ;;  %v3233_v43 = vmul.f32 %v3105_v11, %v2977_v50  ;;  %v10771_v45 = vld [vmem:[#allocation3_spill] sm:$0xff]  ;;  %v3121_v50 = vld [vmem:[%s9980_s4 + $0x198] sm:$0xff] }
 0x34d   :  { %v5712_v32 = vpop.eup %5711  ;;  %5731 = vrcp.f32 %v2507_v28  ;;  %v2503_v4 = vpop.xlane.xlu1 %2502  ;;  %2644 = vadd.xlane.f32.xlu0 %v8836_v38  ;;  %v2783_v61 = vmul.f32 2.0, %v5710_v14  ;;  %v2392_v14 = vmul.f32 1.442695, %v2155_v7  ;;  %v10770_v38 = vld [vmem:[#allocation7_spill] sm:$0xff]  ;;  %v2993_v63 = vmul.f32 %v10771_v45, %v2789_v60  ;;  %v10772_v60 = vld [vmem:[#allocation16_spill] sm:$0xff] }
 0x34e   :  { %v8847_v44 = vpop.eup %5713  ;;  %v2753_v37 = vmul.f32 2.0, %v5712_v32  ;;  %5733 = vrcp.f32 %v2503_v4  ;;  %v2541_v26 = vpop.xlane.xlu0 %2540  ;;  %v3104_v32 = vld [vmem:[%s9980_s4 + $0x110] sm:$0xff]  ;;  %v10769_v4 = vld [vmem:[#allocation2_spill] sm:$0xff]  ;;  %v3230_v7 = vmul.f32 %v3102_v3, %v2974_v36  ;;  %v10773_v3 = vld [vmem:[#allocation117_spill] sm:$0xff] }
 0x34f   :  { %10765 = vst [vmem:[#allocation39_spill] sm:$0xff] %v8847_v44  ;;  %v8857_v28 = vpop.eup %5715  ;;  %5735 = vpow2.f32 %v2390_v48  ;;  %v2171_v47 = vsub.f32 %v10769_v4, %v8785_v20  ;;  %v3457_v20 = vld [vmem:[%s9979_s3 + $0x218] sm:$0xff]  ;;  %v2173_v4 = vsub.f32 %v10773_v3, %v8757_v15  ;;  %v3232_v45 = vmul.f32 %v3104_v32, %v2976_v21 }
 0x350   :  { %10767 = vst [vmem:[#allocation18_spill] sm:$0xff] %v8857_v28  ;;  %v8863_v27 = vpop.eup %5717  ;;  %v2975_v48 = vmul.f32 %v10770_v38, %v2753_v37  ;;  %5737 = vrcp.f32 %v2541_v26  ;;  %2638 = vadd.xlane.f32.xlu1 %v8847_v44  ;;  %v3551_v21 = vpack.c.bf16 %v3457_v20, %v3456_v6  ;;  %v2426_v32 = vmul.f32 1.442695, %v2172_v49  ;;  %v3458_v6 = vld [vmem:[%s9979_s3 + $0x220] sm:$0xff] }
 0x351   :  { %v5720_v59 = vpop.eup %5719  ;;  %5739 = vrcp.f32 %v2539_v52  ;;  %v2535_v39 = vpop.xlane.xlu1 %2534  ;;  %2676 = vadd.xlane.f32.xlu0 %v8857_v28  ;;  %v2990_v52 = vmul.f32 %v10772_v60, %v2783_v61  ;;  %v10774_v28 = vld [vmem:[#allocation12_spill] sm:$0xff]  ;;  %v3119_v61 = vld [vmem:[%s9980_s4 + $0x188] sm:$0xff]  ;;  %v3249_v60 = vmul.f32 %v3121_v50, %v2993_v63  ;;  %v2424_v18 = vmul.f32 1.442695, %v2171_v47 }
 0x352   :  { %v8880_v38 = vpop.eup %5721  ;;  %v2785_v11 = vmul.f32 2.0, %v5720_v59  ;;  %5741 = vrcp.f32 %v2535_v39  ;;  %v2505_v37 = vpop.xlane.xlu0 %2504  ;;  %v3231_v36 = vmul.f32 %v3103_v16, %v2975_v48  ;;  %v2992_v44 = vmul.f32 %v10774_v28, %v2787_v10  ;;  %v3120_v16 = vld [vmem:[%s9980_s4 + $0x190] sm:$0xff] }
 0x353   :  { %v8886_v26 = vpop.eup %5723  ;;  %5743 = vrcp.f32 %v2505_v37  ;;  %v10775_v48 = vld [vmem:[#allocation68_spill] sm:$0xff]  ;;  %v3343_v59 = vpack.c.bf16 %v3233_v43, %v3232_v45  ;;  %v3246_v33 = vmul.f32 %v3118_v51, %v2990_v52  ;;  %v2428_v20 = vmul.f32 1.442695, %v2173_v4  ;;  %v3473_v51 = vld [vmem:[%s9979_s3 + $0x298] sm:$0xff] }
 0x354   :  { %v8897_v39 = vpop.eup %5725  ;;  %v2991_v15 = vmul.f32 %v10775_v48, %v2785_v11  ;;  %2670 = vadd.xlane.f32.xlu1 %v8863_v27  ;;  %v3342_v28 = vpack.c.bf16 %v3231_v36, %v3230_v7  ;;  %5745 = vpow2.f32 %v2422_v57  ;;  %v3248_v49 = vmul.f32 %v3120_v16, %v2992_v44  ;;  %v3459_v57 = vld [vmem:[%s9979_s3 + $0x228] sm:$0xff]  ;;  %v3472_v47 = vld [vmem:[%s9979_s3 + $0x290] sm:$0xff] }
 0x355   :  { %v8904_v10 = vpop.eup %5727  ;;  %v2515_v37 = vpop.xlane.xlu1 %2514  ;;  %2640 = vadd.xlane.f32.xlu0 %v8880_v38  ;;  %5747 = vpow2.f32 %v2392_v14  ;;  %v3460_v36 = vld [vmem:[%s9979_s3 + $0x230] sm:$0xff]  ;;  %v3552_v45 = vpack.c.bf16 %v3459_v57, %v3458_v6 }
 0x356   :  { %v5730_v3 = vpop.eup %5729  ;;  %5146 = vmatprep.mubr.bf16.mxu0 %v3342_v28  ;;  %v2537_v41 = vpop.xlane.xlu0 %2536  ;;  %v3247_v11 = vmul.f32 %v3119_v61, %v2991_v15  ;;  %v3351_v44 = vpack.c.bf16 %v3249_v60, %v3248_v49  ;;  %v3559_v61 = vpack.c.bf16 %v3473_v51, %v3472_v47  ;;  %v3474_v15 = vld [vmem:[%s9979_s3 + $0x2a0] sm:$0xff]  ;;  %v3475_v28 = vld [vmem:[%s9979_s3 + $0x2a8] sm:$0xff]  ;;  %v10776_v60 = vld [vmem:[#allocation9_spill] sm:$0xff] }
 0x357   :  { %v5732_v7 = vpop.eup %5731  ;;  %5749 = vrcp.f32 %v2537_v41  ;;  %5147 = vmatmul.mubr.bf16.vlgmr.msra.gmra.mrb[80].mxu0 %v3343_v59  ;;  %v2765_v63 = vmul.f32 2.0, %v5730_v3  ;;  %v3462_v49 = vld [vmem:[%s9979_s3 + $0x240] sm:$0xff] }
 0x358   :  { %v5734_v14 = vpop.eup %5733  ;;  %2650 = vadd.xlane.f32.xlu1 %v8886_v26  ;;  %v3350_v43 = vpack.c.bf16 %v3247_v11, %v3246_v33  ;;  %5195 = vmatpush3.bf16.msra.mxu0 %v8596_v12  ;;  %5751 = vpow2.f32 %v2426_v32  ;;  %v3461_v33 = vld [vmem:[%s9979_s3 + $0x238] sm:$0xff]  ;;  %v2763_v48 = vmul.f32 2.0, %v5732_v7  ;;  %v10777_v11 = vld [vmem:[#allocation19_spill] sm:$0xff] }
 0x359   :  { %v8921_v41 = vpop.eup %5735  ;;  %v2759_v50 = vmul.f32 2.0, %v5734_v14  ;;  %v2547_v52 = vpop.xlane.xlu1 %2546  ;;  %2672 = vadd.xlane.f32.xlu0 %v8897_v39  ;;  %5196 = vmatprep.subr.bf16.mxu0 %v3551_v21  ;;  %5753 = vpow2.f32 %v2424_v18  ;;  %v3553_v18 = vpack.c.bf16 %v3461_v33, %v3460_v36  ;;  %v2981_v3 = vmul.f32 %v10776_v60, %v2765_v63  ;;  %v3107_v36 = vld [vmem:[%s9980_s4 + $0x128] sm:$0xff] }
 0x35a   :  { %v5738_v4 = vpop.eup %5737  ;;  %5178 = vmatprep.mubr.bf16.mxu1 %v3350_v43  ;;  %v2517_v12 = vpop.xlane.xlu0 %2516  ;;  %5755 = vpow2.f32 %v2428_v20  ;;  %v3560_v14 = vpack.c.bf16 %v3475_v28, %v3474_v15  ;;  %v3108_v15 = vld [vmem:[%s9980_s4 + $0x130] sm:$0xff] }
 0x35b   :  { %v5740_v16 = vpop.eup %5739  ;;  %5179 = vmatmul.mubr.bf16.vlgmr.msra.gmra.mrb[80].mxu1 %v3351_v44  ;;  %5757 = vrcp.f32 %v2517_v12  ;;  %v2978_v6 = vmul.f32 %v10777_v11, %v2759_v50  ;;  %v2797_v7 = vmul.f32 2.0, %v5738_v4  ;;  %v10779_v44 = vld [vmem:[#allocation4_spill] sm:$0xff]  ;;  %v10780_v4 = vld [vmem:[#allocation6_spill] sm:$0xff] }
 0x35c   :  { %v5742_v32 = vpop.eup %5741  ;;  %2646 = vadd.xlane.f32.xlu1 %v8921_v41  ;;  %5197 = vmatpush3.bf16.msra.mxu0 %v3551_v21  ;;  %5759 = vrcp.f32 %v2515_v37  ;;  %v3463_v21 = vld [vmem:[%s9979_s3 + $0x248] sm:$0xff]  ;;  %v3106_v37 = vld [vmem:[%s9980_s4 + $0x120] sm:$0xff]  ;;  %v2980_v63 = vmul.f32 %v10779_v44, %v2763_v48  ;;  %v2795_v50 = vmul.f32 2.0, %v5740_v16  ;;  %v3476_v16 = vld [vmem:[%s9979_s3 + $0x2b0] sm:$0xff] }
 0x35d   :  { %v5744_v59 = vpop.eup %5743  ;;  %v2511_v20 = vpop.xlane.xlu1 %2510  ;;  %2652 = vadd.xlane.f32.xlu0 %v8904_v10  ;;  %5227 = vmatpush3.bf16.msra.mxu1 %v8635_v53  ;;  %v2791_v57 = vmul.f32 2.0, %v5742_v32  ;;  %v3109_v53 = vld [vmem:[%s9980_s4 + $0x138] sm:$0xff]  ;;  %v3554_v28 = vpack.c.bf16 %v3463_v21, %v3462_v49 }
 0x35e   :  { %v2761_v47 = vmul.f32 2.0, %v5744_v59  ;;  %5761 = vrcp.f32 %v2511_v20  ;;  %v2549_v51 = vpop.xlane.xlu0 %2548  ;;  %5198 = vmatprep.subr.bf16.mxu0 %v3552_v45  ;;  %5228 = vmatprep.subr.bf16.mxu1 %v3559_v61  ;;  %v8953_v43 = vpop.eup %5745  ;;  %v3477_v48 = vld [vmem:[%s9979_s3 + $0x2b8] sm:$0xff]  ;;  %v10781_v59 = vld [vmem:[#allocation8_spill] sm:$0xff]  ;;  %v3234_v20 = vmul.f32 %v3106_v37, %v2978_v6  ;;  %v3236_v6 = vmul.f32 %v3108_v15, %v2980_v63  ;;  %v3478_v15 = vld [vmem:[%s9979_s3 + $0x2c0] sm:$0xff] }
 0x35f   :  { %10778 = vst [vmem:[#allocation121_spill] sm:$0xff] %v8953_v43  ;;  %v8959_v33 = vpop.eup %5747  ;;  %5763 = vrcp.f32 %v2549_v51  ;;  %v2997_v60 = vmul.f32 %v10781_v59, %v2797_v7  ;;  %v3561_v37 = vpack.c.bf16 %v3477_v48, %v3476_v16  ;;  %v3479_v16 = vld [vmem:[%s9979_s3 + $0x2c8] sm:$0xff] }
 0x360   :  { %v2979_v12 = vmul.f32 %v10780_v4, %v2761_v47  ;;  %2678 = vadd.xlane.f32.xlu1 %v8953_v43  ;;  %5199 = vmatpush3.bf16.msra.mxu0 %v3552_v45  ;;  %5765 = vrcp.f32 %v2547_v52  ;;  %v3237_v47 = vmul.f32 %v3109_v53, %v2981_v3  ;;  %v10782_v45 = vld [vmem:[#allocation17_spill] sm:$0xff]  ;;  %v3122_v4 = vld [vmem:[%s9980_s4 + $0x1a0] sm:$0xff]  ;;  %v10784_v3 = vld [vmem:[#allocation20_spill] sm:$0xff] }
 0x361   :  { %v5750_v32 = vpop.eup %5749  ;;  %v2543_v11 = vpop.xlane.xlu1 %2542  ;;  %2648 = vadd.xlane.f32.xlu0 %v8959_v33  ;;  %5229 = vmatpush3.bf16.msra.mxu1 %v3559_v61  ;;  %v2994_v49 = vmul.f32 %v10782_v45, %v2791_v57  ;;  %v3125_v52 = vld [vmem:[%s9980_s4 + $0x1b8] sm:$0xff]  ;;  %v2996_v61 = vmul.f32 %v10784_v3, %v2795_v50  ;;  %v3123_v57 = vld [vmem:[%s9980_s4 + $0x1a8] sm:$0xff]  ;;  %v3464_v53 = vld [vmem:[%s9979_s3 + $0x250] sm:$0xff] }
 0x362   :  { %v2793_v21 = vmul.f32 2.0, %v5750_v32  ;;  %5767 = vrcp.f32 %v2543_v11  ;;  %v2513_v51 = vpop.xlane.xlu0 %2512  ;;  %v3235_v44 = vmul.f32 %v3107_v36, %v2979_v12  ;;  %5200 = vmatprep.subr.bf16.mxu0 %v3553_v18  ;;  %5230 = vmatprep.subr.bf16.mxu1 %v3560_v14  ;;  %v8981_v7 = vpop.eup %5751  ;;  %v3465_v36 = vld [vmem:[%s9979_s3 + $0x258] sm:$0xff]  ;;  %v3124_v50 = vld [vmem:[%s9980_s4 + $0x1b0] sm:$0xff]  ;;  %v3345_v45 = vpack.c.bf16 %v3237_v47, %v3236_v6 }
 0x363   :  { %10783 = vst [vmem:[#allocation119_spill] sm:$0xff] %v8981_v7  ;;  %5769 = vrcp.f32 %v2513_v51  ;;  %v8993_v12 = vpop.eup %5753  ;;  %v10786_v32 = vld [vmem:[#allocation21_spill] sm:$0xff]  ;;  %v3555_v3 = vpack.c.bf16 %v3465_v36, %v3464_v53  ;;  %v3480_v47 = vld [vmem:[%s9979_s3 + $0x2d0] sm:$0xff] }
 0x364   :  { %10785 = vst [vmem:[#allocation52_spill] sm:$0xff] %v8993_v12  ;;  %v2995_v59 = vmul.f32 %v10786_v32, %v2793_v21  ;;  %2682 = vadd.xlane.f32.xlu1 %v8981_v7  ;;  %v3344_v63 = vpack.c.bf16 %v3235_v44, %v3234_v20  ;;  %5201 = vmatpush3.bf16.msra.mxu0 %v3553_v18  ;;  %v9006_v48 = vpop.eup %5755  ;;  %v3466_v32 = vld [vmem:[%s9979_s3 + $0x260] sm:$0xff]  ;;  %v3467_v7 = vld [vmem:[%s9979_s3 + $0x268] sm:$0xff] }
 0x365   :  { %10787 = vst [vmem:[#allocation43_spill] sm:$0xff] %v9006_v48  ;;  %v2523_v11 = vpop.xlane.xlu1 %2522  ;;  %2680 = vadd.xlane.f32.xlu0 %v8993_v12  ;;  %v3253_v20 = vmul.f32 %v3125_v52, %v2997_v60  ;;  %5231 = vmatpush3.bf16.msra.mxu1 %v3560_v14  ;;  %v5758_v21 = vpop.eup %5757  ;;  %v3250_v18 = vmul.f32 %v3122_v4, %v2994_v49  ;;  %v3481_v49 = vld [vmem:[%s9979_s3 + $0x2d8] sm:$0xff] }
 0x366   :  { %5150 = vmatprep.mubr.bf16.mxu0 %v3344_v63  ;;  %v2545_v51 = vpop.xlane.xlu0 %2544  ;;  %v3251_v44 = vmul.f32 %v3123_v57, %v2995_v59  ;;  %5202 = vmatprep.subr.bf16.mxu0 %v3554_v28  ;;  %v5760_v43 = vpop.eup %5759  ;;  %v3252_v60 = vmul.f32 %v3124_v50, %v2996_v61  ;;  %v3562_v14 = vpack.c.bf16 %v3479_v16, %v3478_v15  ;;  %v2773_v6 = vmul.f32 2.0, %v5758_v21  ;;  %v3468_v59 = vld [vmem:[%s9979_s3 + $0x270] sm:$0xff]  ;;  %v3469_v63 = vld [vmem:[%s9979_s3 + $0x278] sm:$0xff] }
 0x367   :  { %5771 = vrcp.f32 %v2545_v51  ;;  %5151 = vmatmul.mubr.bf16.gmra.mrb[84].mxu0 %v3345_v45  ;;  %5232 = vmatprep.subr.bf16.mxu1 %v3561_v37  ;;  %v3556_v61 = vpack.c.bf16 %v3467_v7, %v3466_v32  ;;  %v2771_v45 = vmul.f32 2.0, %v5760_v43  ;;  %v3482_v7 = vld [vmem:[%s9979_s3 + $0x2e0] sm:$0xff]  ;;  %v3557_v21 = vpack.c.bf16 %v3469_v63, %v3468_v59  ;;  %v3484_v51 = vld [vmem:[%s9979_s3 + $0x2f0] sm:$0xff]  ;;  %v10790_v63 = vld [vmem:[#allocation67_spill] sm:$0xff] }
 0x368   :  { %v5762_v4 = vpop.eup %5761  ;;  %v3352_v52 = vpack.c.bf16 %v3251_v44, %v3250_v18  ;;  %5203 = vmatpush3.bf16.msra.mxu0 %v3554_v28  ;;  %v3353_v36 = vpack.c.bf16 %v3253_v20, %v3252_v60  ;;  %v3563_v28 = vpack.c.bf16 %v3481_v49, %v3480_v47  ;;  %v10788_v43 = vld [vmem:[#allocation24_spill] sm:$0xff]  ;;  %v10789_v32 = vld [vmem:[#allocation26_spill] sm:$0xff] }
 0x369   :  { %v2767_v57 = vmul.f32 2.0, %v5762_v4  ;;  %v2555_v53 = vpop.xlane.xlu1 %2554  ;;  %2684 = vadd.xlane.f32.xlu0 %v9006_v48  ;;  %5233 = vmatpush3.bf16.msra.mxu1 %v3561_v37  ;;  %v5764_v50 = vpop.eup %5763  ;;  %v3483_v37 = vld [vmem:[%s9979_s3 + $0x2e8] sm:$0xff]  ;;  %v2985_v44 = vmul.f32 %v10788_v43, %v2773_v6  ;;  %v3485_v4 = vld [vmem:[%s9979_s3 + $0x2f8] sm:$0xff]  ;;  %v3112_v43 = vld [vmem:[%s9980_s4 + $0x150] sm:$0xff] }
 0x36a   :  { %5182 = vmatprep.mubr.bf16.mxu1 %v3352_v52  ;;  %v2525_v15 = vpop.xlane.xlu0 %2524  ;;  %5204 = vmatprep.subr.bf16.mxu0 %v3555_v3  ;;  %v5766_v16 = vpop.eup %5765  ;;  %v2805_v47 = vmul.f32 2.0, %v5764_v50  ;;  %v3487_v52 = vld [vmem:[%s9979_s3 + $0x308] sm:$0xff]  ;;  %v3564_v59 = vpack.c.bf16 %v3483_v37, %v3482_v7  ;;  %v2984_v50 = vmul.f32 %v10790_v63, %v2771_v45  ;;  %v10791_v7 = vld [vmem:[#allocation128_spill] sm:$0xff] }
 0x36b   :  { %5183 = vmatmul.mubr.bf16.gmra.mrb[84].mxu1 %v3353_v36  ;;  %5234 = vmatprep.subr.bf16.mxu1 %v3562_v14  ;;  %5773 = vrcp.f32 %v2525_v15  ;;  %v2982_v60 = vmul.f32 %v10789_v32, %v2767_v57  ;;  %v2803_v15 = vmul.f32 2.0, %v5766_v16  ;;  %v3565_v32 = vpack.c.bf16 %v3485_v4, %v3484_v51  ;;  %v3129_v51 = vld [vmem:[%s9980_s4 + $0x1d8] sm:$0xff] }
 0x36c   :  { %v5768_v20 = vpop.eup %5767  ;;  %5205 = vmatpush3.bf16.msra.mxu0 %v3555_v3  ;;  %5775 = vrcp.f32 %v2523_v11  ;;  %v3486_v3 = vld [vmem:[%s9979_s3 + $0x300] sm:$0xff]  ;;  %v3001_v37 = vmul.f32 %v10791_v7, %v2805_v47 }
 0x36d   :  { %v5770_v18 = vpop.eup %5769  ;;  %v2519_v49 = vpop.xlane.xlu1 %2518  ;;  %5235 = vmatpush3.bf16.msra.mxu1 %v3562_v14  ;;  %5206 = vmatprep.subr.bf16.mxu0 %v3556_v61  ;;  %v2799_v6 = vmul.f32 2.0, %v5768_v20  ;;  %v3110_v11 = vld [vmem:[%s9980_s4 + $0x140] sm:$0xff]  ;;  %v3113_v14 = vld [vmem:[%s9980_s4 + $0x158] sm:$0xff]  ;;  %v3111_v20 = vld [vmem:[%s9980_s4 + $0x148] sm:$0xff] }
 0x36e   :  { %v2769_v36 = vmul.f32 2.0, %v5770_v18  ;;  %5777 = vrcp.f32 %v2519_v49  ;;  %v2557_v57 = vpop.xlane.xlu0 %2556  ;;  %5236 = vmatprep.subr.bf16.mxu1 %v3563_v28  ;;  %v9062_v49 = vpack.c.bf16 %v3487_v52, %v3486_v3  ;;  %v3238_v45 = vmul.f32 %v3110_v11, %v2982_v60  ;;  %v3128_v3 = vld [vmem:[%s9980_s4 + $0x1d0] sm:$0xff] }
 0x36f   :  { %5779 = vrcp.f32 %v2557_v57  ;;  %v3241_v63 = vmul.f32 %v3113_v14, %v2985_v44  ;;  %v3503_v44 = vld [vmem:[%s9979_s3 + $0x388] sm:$0xff]  ;;  %v3257_v11 = vmul.f32 %v3129_v51, %v3001_v37 }
 0x370   :  { %v2983_v18 = vmul.f32 %v8199_v46, %v2769_v36  ;;  %5207 = vmatpush3.bf16.msra.mxu0 %v3556_v61  ;;  %5781 = vrcp.f32 %v2555_v53  ;;  %v2998_v46 = vmul.f32 %v8189_v0, %v2799_v6  ;;  %v3126_v61 = vld [vmem:[%s9980_s4 + $0x1c0] sm:$0xff]  ;;  %v3127_v0 = vld [vmem:[%s9980_s4 + $0x1c8] sm:$0xff] }
 0x371   :  { %v5772_v48 = vpop.eup %5771  ;;  %v2551_v16 = vpop.xlane.xlu1 %2550  ;;  %5237 = vmatpush3.bf16.msra.mxu1 %v3563_v28  ;;  %5208 = vmatprep.subr.bf16.mxu0 %v3557_v21  ;;  %v10792_v53 = vld [vmem:[#allocation10_spill] sm:$0xff]  ;;  %v3240_v28 = vmul.f32 %v3112_v43, %v2984_v50 }
 0x372   :  { %v2801_v36 = vmul.f32 2.0, %v5772_v48  ;;  %5783 = vrcp.f32 %v2551_v16  ;;  %v2521_v57 = vpop.xlane.xlu0 %2520  ;;  %v3239_v12 = vmul.f32 %v3111_v20, %v2983_v18  ;;  %5238 = vmatprep.subr.bf16.mxu1 %v3564_v59  ;;  %v3000_v60 = vmul.f32 %v10792_v53, %v2803_v15  ;;  %v3502_v48 = vld [vmem:[%s9979_s3 + $0x380] sm:$0xff] }
 0x373   :  { %5785 = vrcp.f32 %v2521_v57  ;;  %v3347_v6 = vpack.c.bf16 %v3241_v63, %v3240_v28  ;;  %v3254_v15 = vmul.f32 %v3126_v61, %v2998_v46  ;;  %v9087_v18 = vpack.c.bf16 %v3503_v44, %v3502_v48  ;;  %v3114_v44 = vld [vmem:[%s9980_s4 + $0x160] sm:$0xff] }
 0x374   :  { %v2999_v47 = vmul.f32 %v8221_v40, %v2801_v36  ;;  %v3346_v4 = vpack.c.bf16 %v3239_v12, %v3238_v45  ;;  %5209 = vmatpush3.bf16.msra.mxu0 %v3557_v21  ;;  %v3256_v12 = vmul.f32 %v3128_v3, %v3000_v60 }
 0x375   :  { %v2563_v52 = vpop.xlane.xlu1 %2562  ;;  %5239 = vmatpush3.bf16.msra.mxu1 %v3564_v59  ;;  %5258 = vmatprep.subr.bf16.mxu0 %v9062_v49  ;;  %v5774_v14 = vpop.eup %5773 }
 0x376   :  { %5154 = vmatprep.mubr.bf16.mxu0 %v3346_v4  ;;  %v2553_v50 = vpop.xlane.xlu0 %2552  ;;  %v3255_v20 = vmul.f32 %v3127_v0, %v2999_v47  ;;  %5240 = vmatprep.subr.bf16.mxu1 %v3565_v32  ;;  %v5776_v40 = vpop.eup %5775  ;;  %v2781_v7 = vmul.f32 2.0, %v5774_v14  ;;  %v3355_v59 = vpack.c.bf16 %v3257_v11, %v3256_v12  ;;  %v3117_v47 = vld [vmem:[%s9980_s4 + $0x178] sm:$0xff]  ;;  %v10793_v11 = vld [vmem:[#allocation23_spill] sm:$0xff] }
 0x377   :  { %5787 = vrcp.f32 %v2553_v50  ;;  %5155 = vmatmul.mubr.bf16.gmra.mrb[88].mxu0 %v3347_v6  ;;  %v2779_v36 = vmul.f32 2.0, %v5776_v40 }
 0x378   :  { %v5778_v43 = vpop.eup %5777  ;;  %v3354_v21 = vpack.c.bf16 %v3255_v20, %v3254_v15  ;;  %v2989_v51 = vmul.f32 %v8242_v29, %v2781_v7  ;;  %v10795_v7 = vld [vmem:[#allocation28_spill] sm:$0xff] }
 0x379   :  { %v2775_v16 = vmul.f32 2.0, %v5778_v43  ;;  %v2595_v37 = vpop.xlane.xlu1 %2594  ;;  %5241 = vmatpush3.bf16.msra.mxu1 %v3565_v32  ;;  %v5780_v45 = vpop.eup %5779  ;;  %v2988_v4 = vmul.f32 %v8205_v24, %v2779_v36  ;;  %v10794_v24 = vld [vmem:[#allocation25_spill] sm:$0xff]  ;;  %v3132_v36 = vld [vmem:[%s9980_s4 + $0x1f0] sm:$0xff] }
 0x37a   :  { %5186 = vmatprep.mubr.bf16.mxu1 %v3354_v21  ;;  %v2565_v63 = vpop.xlane.xlu0 %2564  ;;  %5290 = vmatprep.subr.bf16.mxu1 %v9087_v18  ;;  %v5782_v46 = vpop.eup %5781  ;;  %v2813_v60 = vmul.f32 2.0, %v5780_v45  ;;  %v3245_v20 = vmul.f32 %v3117_v47, %v2989_v51  ;;  %v3131_v45 = vld [vmem:[%s9980_s4 + $0x1e8] sm:$0xff] }
 0x37b   :  { %5187 = vmatmul.mubr.bf16.gmra.mrb[88].mxu1 %v3355_v59  ;;  %5789 = vrcp.f32 %v2565_v63  ;;  %v2986_v53 = vmul.f32 %v8252_v23, %v2775_v16  ;;  %v2811_v29 = vmul.f32 2.0, %v5782_v46  ;;  %v3115_v23 = vld [vmem:[%s9980_s4 + $0x168] sm:$0xff] }
 0x37c   :  { %v5784_v57 = vpop.eup %5783  ;;  %5791 = vrcp.f32 %v2563_v52  ;;  %v3116_v52 = vld [vmem:[%s9980_s4 + $0x170] sm:$0xff]  ;;  %v3005_v14 = vmul.f32 %v10793_v11, %v2813_v60 }
 0x37d   :  { %v5786_v61 = vpop.eup %5785  ;;  %v2559_v28 = vpop.xlane.xlu1 %2558  ;;  %v2807_v0 = vmul.f32 2.0, %v5784_v57  ;;  %v3242_v15 = vmul.f32 %v3114_v44, %v2986_v53  ;;  %v3004_v16 = vmul.f32 %v10795_v7, %v2811_v29  ;;  %v3244_v59 = vmul.f32 %v3116_v52, %v2988_v4  ;;  %v3134_v7 = vld [vmem:[%s9980_s4 + $0x200] sm:$0xff] }
 0x37e   :  { %v2777_v32 = vmul.f32 2.0, %v5786_v61  ;;  %5793 = vrcp.f32 %v2559_v28  ;;  %v2597_v48 = vpop.xlane.xlu0 %2596 }
 0x37f   :  { %5795 = vrcp.f32 %v2597_v48  ;;  %v3002_v40 = vmul.f32 %v10794_v24, %v2807_v0  ;;  %v3349_v61 = vpack.c.bf16 %v3245_v20, %v3244_v59  ;;  %v3260_v48 = vmul.f32 %v3132_v36, %v3004_v16  ;;  %v3136_v59 = vld [vmem:[%s9980_s4 + $0x210] sm:$0xff] }
 0x380   :  { %v2987_v3 = vmul.f32 %v8324_v22, %v2777_v32  ;;  %5797 = vrcp.f32 %v2595_v37  ;;  %v3133_v22 = vld [vmem:[%s9980_s4 + $0x1f8] sm:$0xff]  ;;  %v3130_v37 = vld [vmem:[%s9980_s4 + $0x1e0] sm:$0xff] }
 0x381   :  { %v5788_v6 = vpop.eup %5787  ;;  %v2591_v50 = vpop.xlane.xlu1 %2590  ;;  %v3261_v51 = vmul.f32 %v3133_v22, %v3005_v14  ;;  %v3258_v28 = vmul.f32 %v3130_v37, %v3002_v40 }
 0x382   :  { %v2809_v12 = vmul.f32 2.0, %v5788_v6  ;;  %5799 = vrcp.f32 %v2591_v50  ;;  %v2561_v43 = vpop.xlane.xlu0 %2560  ;;  %v3243_v21 = vmul.f32 %v3115_v23, %v2987_v3 }
 0x383   :  { %5801 = vrcp.f32 %v2561_v43  ;;  %v3357_v23 = vpack.c.bf16 %v3261_v51, %v3260_v48  ;;  %v3152_v48 = vld [vmem:[%s9980_s4 + $0x290] sm:$0xff] }
 0x384   :  { %v3003_v63 = vmul.f32 %v8354_v2, %v2809_v12  ;;  %v3348_v46 = vpack.c.bf16 %v3243_v21, %v3242_v15  ;;  %v3137_v12 = vld [vmem:[%s9980_s4 + $0x218] sm:$0xff] }
 0x385   :  { %v2571_v57 = vpop.xlane.xlu1 %2570  ;;  %v5790_v53 = vpop.eup %5789 }
 0x386   :  { %5158 = vmatprep.mubr.bf16.mxu0 %v3348_v46  ;;  %v2593_v60 = vpop.xlane.xlu0 %2592  ;;  %v3259_v0 = vmul.f32 %v3131_v45, %v3003_v63  ;;  %v5792_v32 = vpop.eup %5791  ;;  %v2821_v2 = vmul.f32 2.0, %v5790_v53 }
 0x387   :  { %5803 = vrcp.f32 %v2593_v60  ;;  %5159 = vmatmul.mubr.bf16.gmra.mrb[92].mxu0 %v3349_v61  ;;  %v2819_v11 = vmul.f32 2.0, %v5792_v32  ;;  %v3151_v32 = vld [vmem:[%s9980_s4 + $0x288] sm:$0xff] }
 0x388   :  { %v5794_v44 = vpop.eup %5793  ;;  %v3356_v47 = vpack.c.bf16 %v3259_v0, %v3258_v28  ;;  %v3009_v15 = vmul.f32 %v8383_v13, %v2821_v2 }
 0x389   :  { %v2815_v4 = vmul.f32 2.0, %v5794_v44  ;;  %v2603_v29 = vpop.xlane.xlu1 %2602  ;;  %v5796_v3 = vpop.eup %5795  ;;  %v3008_v16 = vmul.f32 %v8344_v56, %v2819_v11  ;;  %v3153_v56 = vld [vmem:[%s9980_s4 + $0x298] sm:$0xff] }
 0x38a   :  { %5190 = vmatprep.mubr.bf16.mxu1 %v3356_v47  ;;  %v2573_v52 = vpop.xlane.xlu0 %2572  ;;  %v5798_v6 = vpop.eup %5797  ;;  %v2853_v24 = vmul.f32 2.0, %v5796_v3  ;;  %v3265_v63 = vmul.f32 %v3137_v12, %v3009_v15  ;;  %v3491_v3 = vld [vmem:[%s9979_s3 + $0x328] sm:$0xff] }
 0x38b   :  { %5191 = vmatmul.mubr.bf16.gmra.mrb[92].mxu1 %v3357_v23  ;;  %5805 = vrcp.f32 %v2573_v52  ;;  %v3006_v20 = vmul.f32 %v8410_v54, %v2815_v4  ;;  %v2851_v13 = vmul.f32 2.0, %v5798_v6  ;;  %v3135_v54 = vld [vmem:[%s9980_s4 + $0x208] sm:$0xff]  ;;  %v3264_v28 = vmul.f32 %v3136_v59, %v3008_v16  ;;  %v3490_v23 = vld [vmem:[%s9979_s3 + $0x320] sm:$0xff] }
 0x38c   :  { %v5800_v14 = vpop.eup %5799  ;;  %5807 = vrcp.f32 %v2571_v57  ;;  %v3025_v46 = vmul.f32 %v8438_v8, %v2853_v24  ;;  %v3489_v8 = vld [vmem:[%s9979_s3 + $0x318] sm:$0xff]  ;;  %v3568_v12 = vpack.c.bf16 %v3491_v3, %v3490_v23  ;;  %v3506_v59 = vld [vmem:[%s9979_s3 + $0x3a0] sm:$0xff] }
 0x38d   :  { %v5802_v50 = vpop.eup %5801  ;;  %v2567_v40 = vpop.xlane.xlu1 %2566  ;;  %v2847_v43 = vmul.f32 2.0, %v5800_v14  ;;  %v3262_v57 = vmul.f32 %v3134_v7, %v3006_v20  ;;  %v3024_v0 = vmul.f32 %v8366_v19, %v2851_v13  ;;  %v3359_v2 = vpack.c.bf16 %v3265_v63, %v3264_v28  ;;  %v3508_v28 = vld [vmem:[%s9979_s3 + $0x3b0] sm:$0xff] }
 0x38e   :  { %v2817_v21 = vmul.f32 2.0, %v5802_v50  ;;  %5809 = vrcp.f32 %v2567_v40  ;;  %v2605_v22 = vpop.xlane.xlu0 %2604  ;;  %v3281_v4 = vmul.f32 %v3153_v56, %v3025_v46  ;;  %v3505_v50 = vld [vmem:[%s9979_s3 + $0x398] sm:$0xff] }
 0x38f   :  { %5811 = vrcp.f32 %v2605_v22  ;;  %v3022_v61 = vmul.f32 %v8446_v1, %v2847_v43  ;;  %v3150_v1 = vld [vmem:[%s9980_s4 + $0x280] sm:$0xff]  ;;  %v3280_v20 = vmul.f32 %v3152_v48, %v3024_v0  ;;  %v3492_v43 = vld [vmem:[%s9979_s3 + $0x330] sm:$0xff]  ;;  %v3509_v0 = vld [vmem:[%s9979_s3 + $0x3b8] sm:$0xff] }
 0x390   :  { %v3007_v37 = vmul.f32 %v8465_v35, %v2817_v21  ;;  %5813 = vrcp.f32 %v2603_v29  ;;  %v3488_v35 = vld [vmem:[%s9979_s3 + $0x310] sm:$0xff]  ;;  %v3141_v48 = vld [vmem:[%s9980_s4 + $0x238] sm:$0xff]  ;;  %v3577_v23 = vpack.c.bf16 %v3509_v0, %v3508_v28 }
 0x391   :  { %v5804_v45 = vpop.eup %5803  ;;  %v2599_v36 = vpop.xlane.xlu1 %2598  ;;  %v3567_v19 = vpack.c.bf16 %v3489_v8, %v3488_v35  ;;  %v3278_v11 = vmul.f32 %v3150_v1, %v3022_v61  ;;  %v3367_v21 = vpack.c.bf16 %v3281_v4, %v3280_v20  ;;  %v3494_v61 = vld [vmem:[%s9979_s3 + $0x340] sm:$0xff]  ;;  %v3157_v20 = vld [vmem:[%s9980_s4 + $0x2b8] sm:$0xff] }
 0x392   :  { %v2849_v51 = vmul.f32 2.0, %v5804_v45  ;;  %5815 = vrcp.f32 %v2599_v36  ;;  %v2569_v53 = vpop.xlane.xlu0 %2568  ;;  %v3263_v60 = vmul.f32 %v3135_v54, %v3007_v37  ;;  %v3493_v54 = vld [vmem:[%s9979_s3 + $0x338] sm:$0xff] }
 0x393   :  { %5817 = vrcp.f32 %v2569_v53 }
 0x394   :  { %v3023_v44 = vmul.f32 %v8480_v31, %v2849_v51  ;;  %v3358_v47 = vpack.c.bf16 %v3263_v60, %v3262_v57  ;;  %v3504_v31 = vld [vmem:[%s9979_s3 + $0x390] sm:$0xff]  ;;  %v3569_v57 = vpack.c.bf16 %v3493_v54, %v3492_v43  ;;  %v3154_v43 = vld [vmem:[%s9980_s4 + $0x2a0] sm:$0xff] }
 0x395   :  { %v2579_v29 = vpop.xlane.xlu1 %2578  ;;  %v5806_v52 = vpop.eup %5805  ;;  %v3575_v13 = vpack.c.bf16 %v3505_v50, %v3504_v31 }
 0x396   :  { %5210 = vmatprep.mubr.bf16.mxu0 %v3358_v47  ;;  %v2601_v6 = vpop.xlane.xlu0 %2600  ;;  %v3279_v14 = vmul.f32 %v3151_v32, %v3023_v44  ;;  %v5808_v15 = vpop.eup %5807  ;;  %v2829_v22 = vmul.f32 2.0, %v5806_v52  ;;  %v3138_v32 = vld [vmem:[%s9980_s4 + $0x220] sm:$0xff] }
 0x397   :  { %5819 = vrcp.f32 %v2601_v6  ;;  %5211 = vmatmul.mubr.bf16.vlgmr.msra.gmra.mrb[96].mxu0 %v3359_v2  ;;  %v2827_v46 = vmul.f32 2.0, %v5808_v15  ;;  %v3139_v2 = vld [vmem:[%s9980_s4 + $0x228] sm:$0xff] }
 0x398   :  { %v5810_v24 = vpop.eup %5809  ;;  %v3366_v40 = vpack.c.bf16 %v3279_v14, %v3278_v11  ;;  %5259 = vmatpush3.bf16.msra.mxu0 %v9062_v49  ;;  %v3507_v49 = vld [vmem:[%s9979_s3 + $0x3a8] sm:$0xff]  ;;  %v3013_v53 = vmul.f32 %v8499_v30, %v2829_v22  ;;  %v3497_v14 = vld [vmem:[%s9979_s3 + $0x358] sm:$0xff] }
 0x399   :  { %v2823_v7 = vmul.f32 2.0, %v5810_v24  ;;  %v2611_v16 = vpop.xlane.xlu1 %2610  ;;  %5260 = vmatprep.subr.bf16.mxu0 %v3567_v19  ;;  %v5812_v37 = vpop.eup %5811  ;;  %v3576_v56 = vpack.c.bf16 %v3507_v49, %v3506_v59  ;;  %v3012_v44 = vmul.f32 %v8471_v25, %v2827_v46  ;;  %v3510_v24 = vld [vmem:[%s9979_s3 + $0x3c0] sm:$0xff] }
 0x39a   :  { %5242 = vmatprep.mubr.bf16.mxu1 %v3366_v40  ;;  %v2581_v45 = vpop.xlane.xlu0 %2580  ;;  %v5814_v63 = vpop.eup %5813  ;;  %v2861_v35 = vmul.f32 2.0, %v5812_v37  ;;  %v3269_v11 = vmul.f32 %v3141_v48, %v3013_v53  ;;  %v3511_v40 = vld [vmem:[%s9979_s3 + $0x3c8] sm:$0xff]  ;;  %v3498_v37 = vld [vmem:[%s9979_s3 + $0x360] sm:$0xff] }
 0x39b   :  { %5243 = vmatmul.mubr.bf16.vlgmr.msra.gmra.mrb[96].mxu1 %v3367_v21  ;;  %5821 = vrcp.f32 %v2581_v45  ;;  %v3010_v60 = vmul.f32 %v8529_v9, %v2823_v7  ;;  %v2859_v47 = vmul.f32 2.0, %v5814_v63  ;;  %v3155_v21 = vld [vmem:[%s9980_s4 + $0x2a8] sm:$0xff]  ;;  %v3578_v49 = vpack.c.bf16 %v3511_v40, %v3510_v24  ;;  %v3142_v40 = vld [vmem:[%s9980_s4 + $0x240] sm:$0xff] }
 0x39c   :  { %v5816_v36 = vpop.eup %5815  ;;  %5261 = vmatpush3.bf16.msra.mxu0 %v3567_v19  ;;  %5291 = vmatpush3.bf16.msra.mxu1 %v9087_v18  ;;  %5823 = vrcp.f32 %v2579_v29  ;;  %v3495_v18 = vld [vmem:[%s9979_s3 + $0x348] sm:$0xff]  ;;  %v3140_v29 = vld [vmem:[%s9980_s4 + $0x230] sm:$0xff]  ;;  %v3029_v52 = vmul.f32 %v8538_v34, %v2861_v35 }
 0x39d   :  { %v5818_v51 = vpop.eup %5817  ;;  %v2575_v8 = vpop.xlane.xlu1 %2574  ;;  %5262 = vmatprep.subr.bf16.mxu0 %v3568_v12  ;;  %5292 = vmatprep.subr.bf16.mxu1 %v3575_v13  ;;  %v2855_v30 = vmul.f32 2.0, %v5816_v36  ;;  %v3570_v19 = vpack.c.bf16 %v3495_v18, %v3494_v61  ;;  %v3266_v6 = vmul.f32 %v3138_v32, %v3010_v60  ;;  %v3514_v32 = vld [vmem:[%s9979_s3 + $0x3e0] sm:$0xff]  ;;  %v3515_v48 = vld [vmem:[%s9979_s3 + $0x3e8] sm:$0xff] }
 0x39e   :  { %v2825_v1 = vmul.f32 2.0, %v5818_v51  ;;  %5825 = vrcp.f32 %v2575_v8  ;;  %v2613_v9 = vpop.xlane.xlu0 %2612  ;;  %v3285_v59 = vmul.f32 %v3157_v20, %v3029_v52  ;;  %v3500_v8 = vld [vmem:[%s9979_s3 + $0x370] sm:$0xff] }
 0x39f   :  { %5827 = vrcp.f32 %v2613_v9  ;;  %v3026_v31 = vmul.f32 %v8561_v62, %v2855_v30  ;;  %v3268_v62 = vmul.f32 %v3140_v29, %v3012_v44  ;;  %v3501_v9 = vld [vmem:[%s9979_s3 + $0x378] sm:$0xff] }
 0x3a0   :  { %v3011_v4 = vmul.f32 %v8570_v5, %v2825_v1  ;;  %5263 = vmatpush3.bf16.msra.mxu0 %v3568_v12  ;;  %5293 = vmatpush3.bf16.msra.mxu1 %v3575_v13  ;;  %5829 = vrcp.f32 %v2611_v16  ;;  %v3496_v5 = vld [vmem:[%s9979_s3 + $0x350] sm:$0xff]  ;;  %v3028_v12 = vmul.f32 %v8487_v17, %v2859_v47  ;;  %v3573_v52 = vpack.c.bf16 %v3501_v9, %v3500_v8 }
 0x3a1   :  { %v5820_v3 = vpop.eup %5819  ;;  %v2607_v25 = vpop.xlane.xlu1 %2606  ;;  %5264 = vmatprep.subr.bf16.mxu0 %v3569_v57  ;;  %5294 = vmatprep.subr.bf16.mxu1 %v3576_v56  ;;  %v3156_v16 = vld [vmem:[%s9980_s4 + $0x2b0] sm:$0xff]  ;;  %v3571_v17 = vpack.c.bf16 %v3497_v14, %v3496_v5  ;;  %v3361_v54 = vpack.c.bf16 %v3269_v11, %v3268_v62  ;;  %v3282_v46 = vmul.f32 %v3154_v43, %v3026_v31  ;;  %v10796_v62 = vld [vmem:[#allocation27_spill] sm:$0xff] }
 0x3a2   :  { %v2857_v50 = vmul.f32 2.0, %v5820_v3  ;;  %5831 = vrcp.f32 %v2607_v25  ;;  %v2577_v15 = vpop.xlane.xlu0 %2576  ;;  %v3267_v34 = vmul.f32 %v3139_v2, %v3011_v4  ;;  %v3284_v51 = vmul.f32 %v3156_v16, %v3028_v12  ;;  %v3145_v12 = vld [vmem:[%s9980_s4 + $0x258] sm:$0xff] }
 0x3a3   :  { %5833 = vrcp.f32 %v2577_v15  ;;  %v3580_v25 = vpack.c.bf16 %v3515_v48, %v3514_v32  ;;  %v3516_v15 = vld [vmem:[%s9979_s3 + $0x3f0] sm:$0xff]  ;;  %v10797_v16 = vld [vmem:[#allocation77_spill] sm:$0xff] }
 0x3a4   :  { %v3027_v22 = vmul.f32 %v8598_v58, %v2857_v50  ;;  %v3360_v7 = vpack.c.bf16 %v3267_v34, %v3266_v6  ;;  %5265 = vmatpush3.bf16.msra.mxu0 %v3569_v57  ;;  %5295 = vmatpush3.bf16.msra.mxu1 %v3576_v56  ;;  %v3499_v58 = vld [vmem:[%s9979_s3 + $0x368] sm:$0xff]  ;;  %v3512_v57 = vld [vmem:[%s9979_s3 + $0x3d0] sm:$0xff]  ;;  %v3513_v56 = vld [vmem:[%s9979_s3 + $0x3d8] sm:$0xff]  ;;  %v3369_v30 = vpack.c.bf16 %v3285_v59, %v3284_v51 }
 0x3a5   :  { %v2587_v13 = vpop.xlane.xlu1 %2586  ;;  %5266 = vmatprep.subr.bf16.mxu0 %v3570_v19  ;;  %5296 = vmatprep.subr.bf16.mxu1 %v3577_v23  ;;  %v5822_v45 = vpop.eup %5821  ;;  %v3572_v35 = vpack.c.bf16 %v3499_v58, %v3498_v37  ;;  %v3579_v1 = vpack.c.bf16 %v3513_v56, %v3512_v57  ;;  %v10798_v37 = vld [vmem:[#allocation36_spill] sm:$0xff]  ;;  %v10799_v57 = vld [vmem:[#allocation29_spill] sm:$0xff] }
 0x3a6   :  { %5214 = vmatprep.mubr.bf16.mxu0 %v3360_v7  ;;  %v2609_v63 = vpop.xlane.xlu0 %2608  ;;  %v3283_v36 = vmul.f32 %v3155_v21, %v3027_v22  ;;  %v5824_v61 = vpop.eup %5823  ;;  %v2837_v18 = vmul.f32 2.0, %v5822_v45  ;;  %v3143_v7 = vld [vmem:[%s9980_s4 + $0x248] sm:$0xff]  ;;  %v3160_v32 = vld [vmem:[%s9980_s4 + $0x2d0] sm:$0xff] }
 0x3a7   :  { %5835 = vrcp.f32 %v2609_v63  ;;  %5215 = vmatmul.mubr.bf16.gmra.mrb[100].mxu0 %v3361_v54  ;;  %v2835_v29 = vmul.f32 2.0, %v5824_v61  ;;  %v3144_v54 = vld [vmem:[%s9980_s4 + $0x250] sm:$0xff] }
 0x3a8   :  { %v5826_v53 = vpop.eup %5825  ;;  %v3368_v60 = vpack.c.bf16 %v3283_v36, %v3282_v46  ;;  %5267 = vmatpush3.bf16.msra.mxu0 %v3570_v19  ;;  %5297 = vmatpush3.bf16.msra.mxu1 %v3577_v23  ;;  %v3017_v11 = vmul.f32 %v8610_v55, %v2837_v18  ;;  %v3517_v55 = vld [vmem:[%s9979_s3 + $0x3f8] sm:$0xff] }
 0x3a9   :  { %v2831_v28 = vmul.f32 2.0, %v5826_v53  ;;  %v2619_v0 = vpop.xlane.xlu1 %2618  ;;  %5268 = vmatprep.subr.bf16.mxu0 %v3571_v17  ;;  %5298 = vmatprep.subr.bf16.mxu1 %v3578_v49  ;;  %v5828_v44 = vpop.eup %5827  ;;  %v3016_v43 = vmul.f32 %v10796_v62, %v2835_v29  ;;  %v3581_v59 = vpack.c.bf16 %v3517_v55, %v3516_v15 }
 0x3aa   :  { %v5084_v47 = vpop.f32.mrb[64].mxu0  ;;  %5246 = vmatprep.mubr.bf16.mxu1 %v3368_v60  ;;  %v2589_v2 = vpop.xlane.xlu0 %2588  ;;  %v2869_v14 = vmul.f32 2.0, %v5828_v44  ;;  %v3273_v36 = vmul.f32 %v3145_v12, %v3017_v11  ;;  %v3161_v60 = vld [vmem:[%s9980_s4 + $0x2d8] sm:$0xff]  ;;  %v10802_v12 = vld [vmem:[#allocation34_spill] sm:$0xff] }
 0x3ab   :  { %v5830_v4 = vpop.eup %5829  ;;  %4360 = vst.msk [vmem:[%s9981_s5 + $0x10] sm:$0xff] %vm629_vm0, %v5084_v47  ;;  %v3616_v19 = vpop.f32.mrb[65].mxu0  ;;  %5247 = vmatmul.mubr.bf16.gmra.mrb[100].mxu1 %v3369_v30  ;;  %5837 = vrcp.f32 %v2589_v2  ;;  %v3014_v5 = vmul.f32 %v8637_v42, %v2831_v28  ;;  %v3272_v18 = vmul.f32 %v3144_v54, %v3016_v43  ;;  %v3158_v28 = vld [vmem:[%s9980_s4 + $0x2c0] sm:$0xff]  ;;  %v10803_v43 = vld [vmem:[#allocation89_spill] sm:$0xff] }
 0x3ac   :  { %v5832_v23 = vpop.eup %5831  ;;  %4358 = vst.msk [vmem:[%s9981_s5] sm:$0xff] %vm629_vm0, %v3616_v19  ;;  %v5085_v3 = vpop.f32.mrb[66].mxu0  ;;  %5269 = vmatpush3.bf16.msra.mxu0 %v3571_v17  ;;  %5299 = vmatpush3.bf16.msra.mxu1 %v3578_v49  ;;  %5839 = vrcp.f32 %v2587_v13  ;;  %v2867_v21 = vmul.f32 2.0, %v5830_v4  ;;  %v3033_v58 = vmul.f32 %v10798_v37, %v2869_v14  ;;  %v10801_v30 = vld [vmem:[#allocation70_spill] sm:$0xff]  ;;  %v3149_v37 = vld [vmem:[%s9980_s4 + $0x278] sm:$0xff] }
 0x3ad   :  { %v5834_v6 = vpop.eup %5833  ;;  %v2583_v31 = vpop.xlane.xlu1 %2582  ;;  %4361 = vst.msk [vmem:[%s9981_s5 + $0x18] sm:$0xff] %vm629_vm0, %v5085_v3  ;;  %5270 = vmatprep.subr.bf16.mxu0 %v3572_v35  ;;  %5300 = vmatprep.subr.bf16.mxu1 %v3579_v1  ;;  %v2863_v42 = vmul.f32 2.0, %v5832_v23  ;;  %v3270_v46 = vmul.f32 %v3142_v40, %v3014_v5  ;;  %v3363_v44 = vpack.c.bf16 %v3273_v36, %v3272_v18  ;;  %v3147_v36 = vld [vmem:[%s9980_s4 + $0x268] sm:$0xff] }
 0x3ae   :  { %v3619_v50 = vpop.f32.mrb[67].mxu0  ;;  %v2833_v34 = vmul.f32 2.0, %v5834_v6  ;;  %5841 = vrcp.f32 %v2583_v31  ;;  %v5116_v20 = vpop.f32.mrb[64].mxu1  ;;  %v3289_v47 = vmul.f32 %v3161_v60, %v3033_v58  ;;  %v10804_v58 = vld [vmem:[#allocation81_spill] sm:$0xff]  ;;  %v10806_v60 = vld [vmem:[#allocation83_spill] sm:$0xff] }
 0x3af   :  { %4359 = vst.msk [vmem:[%s9981_s5 + $0x8] sm:$0xff] %vm629_vm0, %v3619_v50  ;;  %v2621_v24 = vpop.xlane.xlu0 %2620  ;;  %4376 = vst.msk [vmem:[%s9981_s5 + $0x90] sm:$0xff] %vm629_vm0, %v5116_v20  ;;  %v3713_v22 = vpop.f32.mrb[65].mxu1  ;;  %v3030_v56 = vmul.f32 %v10799_v57, %v2863_v42  ;;  %v10805_v57 = vld [vmem:[#allocation75_spill] sm:$0xff] }
 0x3b0   :  { %v3015_v17 = vmul.f32 %v10797_v16, %v2833_v34  ;;  %5843 = vrcp.f32 %v2621_v24  ;;  %4374 = vst.msk [vmem:[%s9981_s5 + $0x80] sm:$0xff] %vm629_vm0, %v3713_v22  ;;  %v5117_v13 = vpop.f32.mrb[66].mxu1  ;;  %5271 = vmatpush3.bf16.msra.mxu0 %v3572_v35  ;;  %5301 = vmatpush3.bf16.msra.mxu1 %v3579_v1  ;;  %v10800_v35 = vld [vmem:[#allocation133_spill] sm:$0xff] }
 0x3b1   :  { %v5836_v49 = vpop.eup %5835  ;;  %5845 = vrcp.f32 %v2619_v0  ;;  %v2615_v45 = vpop.xlane.xlu1 %2614  ;;  %4377 = vst.msk [vmem:[%s9981_s5 + $0x98] sm:$0xff] %vm629_vm0, %v5117_v13  ;;  %5272 = vmatprep.subr.bf16.mxu0 %v3573_v52  ;;  %5302 = vmatprep.subr.bf16.mxu1 %v3580_v25  ;;  %v3032_v8 = vmul.f32 %v10800_v35, %v2867_v21  ;;  %v3159_v0 = vld [vmem:[%s9980_s4 + $0x2c8] sm:$0xff]  ;;  %v3286_v29 = vmul.f32 %v3158_v28, %v3030_v56 }
 0x3b2   :  { %v3716_v63 = vpop.f32.mrb[67].mxu1  ;;  %v2865_v61 = vmul.f32 2.0, %v5836_v49  ;;  %5847 = vrcp.f32 %v2615_v45  ;;  %v3271_v53 = vmul.f32 %v3143_v7, %v3015_v17  ;;  %v3146_v49 = vld [vmem:[%s9980_s4 + $0x260] sm:$0xff] }
 0x3b3   :  { %4375 = vst.msk [vmem:[%s9981_s5 + $0x88] sm:$0xff] %vm629_vm0, %v3716_v63  ;;  %v2585_v51 = vpop.xlane.xlu0 %2584  ;;  %v3288_v3 = vmul.f32 %v3160_v32, %v3032_v8 }
 0x3b4   :  { %5849 = vrcp.f32 %v2585_v51  ;;  %v3031_v1 = vmul.f32 %v10801_v30, %v2865_v61  ;;  %v3362_v9 = vpack.c.bf16 %v3271_v53, %v3270_v46  ;;  %5273 = vmatpush3.bf16.msra.mxu0 %v3573_v52  ;;  %5303 = vmatpush3.bf16.msra.mxu1 %v3580_v25  ;;  %v3148_v51 = vld [vmem:[%s9980_s4 + $0x270] sm:$0xff]  ;;  %v10807_v30 = vld [vmem:[#allocation87_spill] sm:$0xff] }
 0x3b5   :  { %v2627_v48 = vpop.xlane.xlu1 %2626  ;;  %5304 = vmatprep.subr.bf16.mxu1 %v3581_v59  ;;  %v5838_v2 = vpop.eup %5837  ;;  %v3371_v25 = vpack.c.bf16 %v3289_v47, %v3288_v3  ;;  %v10808_v47 = vld [vmem:[#allocation33_spill] sm:$0xff] }
 0x3b6   :  { %5218 = vmatprep.mubr.bf16.mxu0 %v3362_v9  ;;  %v3287_v19 = vmul.f32 %v3159_v0, %v3031_v1  ;;  %v5840_v23 = vpop.eup %5839  ;;  %v2845_v5 = vmul.f32 2.0, %v5838_v2 }
 0x3b7   :  { %v2617_v4 = vpop.xlane.xlu0 %2616  ;;  %5219 = vmatmul.mubr.bf16.gmra.mrb[104].mxu0 %v3363_v44  ;;  %v2843_v42 = vmul.f32 2.0, %v5840_v23  ;;  %v3165_v44 = vld [vmem:[%s9980_s4 + $0x2f8] sm:$0xff] }
 0x3b8   :  { %5851 = vrcp.f32 %v2617_v4  ;;  %v5842_v6 = vpop.eup %5841  ;;  %v3370_v11 = vpack.c.bf16 %v3287_v19, %v3286_v29  ;;  %5305 = vmatpush3.bf16.msra.mxu1 %v3581_v59  ;;  %v3021_v62 = vmul.f32 %v10802_v12, %v2845_v5  ;;  %v3162_v29 = vld [vmem:[%s9980_s4 + $0x2e0] sm:$0xff]  ;;  %v3163_v19 = vld [vmem:[%s9980_s4 + $0x2e8] sm:$0xff]  ;;  %v10809_v23 = vld [vmem:[#allocation37_spill] sm:$0xff] }
 0x3b9   :  { %v2839_v14 = vmul.f32 2.0, %v5842_v6  ;;  %v2659_v52 = vpop.xlane.xlu1 %2658  ;;  %v3020_v45 = vmul.f32 %v10804_v58, %v2843_v42  ;;  %v10811_v58 = vld [vmem:[#allocation31_spill] sm:$0xff] }
 0x3ba   :  { %v5844_v31 = vpop.eup %5843  ;;  %v5088_v50 = vpop.f32.mrb[68].mxu0  ;;  %5250 = vmatprep.mubr.bf16.mxu1 %v3370_v11  ;;  %v3277_v0 = vmul.f32 %v3149_v37, %v3021_v62  ;;  %v3164_v11 = vld [vmem:[%s9980_s4 + $0x2f0] sm:$0xff] }
 0x3bb   :  { %v2629_v15 = vpop.xlane.xlu0 %2628  ;;  %v5846_v55 = vpop.eup %5845  ;;  %4364 = vst.msk [vmem:[%s9981_s5 + $0x30] sm:$0xff] %vm629_vm0, %v5088_v50  ;;  %5251 = vmatmul.mubr.bf16.gmra.mrb[104].mxu1 %v3371_v25  ;;  %v3018_v21 = vmul.f32 %v10803_v43, %v2839_v14  ;;  %v2877_v22 = vmul.f32 2.0, %v5844_v31  ;;  %v3276_v4 = vmul.f32 %v3148_v51, %v3020_v45 }
 0x3bc   :  { %v3632_v34 = vpop.f32.mrb[69].mxu0  ;;  %v5848_v20 = vpop.eup %5847  ;;  %5853 = vrcp.f32 %v2629_v15  ;;  %v2875_v63 = vmul.f32 2.0, %v5846_v55 }
 0x3bd   :  { %4362 = vst.msk [vmem:[%s9981_s5 + $0x20] sm:$0xff] %vm629_vm0, %v3632_v34  ;;  %v5089_v24 = vpop.f32.mrb[70].mxu0  ;;  %5855 = vrcp.f32 %v2627_v48  ;;  %v2623_v7 = vpop.xlane.xlu1 %2622  ;;  %v2871_v17 = vmul.f32 2.0, %v5848_v20  ;;  %v3037_v35 = vmul.f32 %v10806_v60, %v2877_v22  ;;  %v3274_v28 = vmul.f32 %v3146_v49, %v3018_v21  ;;  %v10810_v49 = vld [vmem:[#allocation40_spill] sm:$0xff]  ;;  %v3166_v60 = vld [vmem:[%s9980_s4 + $0x300] sm:$0xff] }
 0x3be   :  { %v5850_v40 = vpop.eup %5849  ;;  %4365 = vst.msk [vmem:[%s9981_s5 + $0x38] sm:$0xff] %vm629_vm0, %v5089_v24  ;;  %v3635_v16 = vpop.f32.mrb[71].mxu0  ;;  %5857 = vrcp.f32 %v2623_v7  ;;  %v3036_v2 = vmul.f32 %v10808_v47, %v2875_v63  ;;  %v3365_v14 = vpack.c.bf16 %v3277_v0, %v3276_v4  ;;  %v3167_v0 = vld [vmem:[%s9980_s4 + $0x308] sm:$0xff]  ;;  %v10814_v47 = vld [vmem:[#allocation101_spill] sm:$0xff] }
 0x3bf   :  { %v2841_v13 = vmul.f32 2.0, %v5850_v40  ;;  %4363 = vst.msk [vmem:[%s9981_s5 + $0x28] sm:$0xff] %vm629_vm0, %v3635_v16  ;;  %v5120_v54 = vpop.f32.mrb[68].mxu1  ;;  %v2661_v59 = vpop.xlane.xlu0 %2660  ;;  %v3034_v1 = vmul.f32 %v10807_v30, %v2871_v17  ;;  %v3168_v30 = vld [vmem:[%s9980_s4 + $0x310] sm:$0xff] }
 0x3c0   :  { %4380 = vst.msk [vmem:[%s9981_s5 + $0xb0] sm:$0xff] %vm629_vm0, %v5120_v54  ;;  %v3729_v46 = vpop.f32.mrb[69].mxu1  ;;  %5859 = vrcp.f32 %v2661_v59  ;;  %v3292_v42 = vmul.f32 %v3164_v11, %v3036_v2 }
 0x3c1   :  { %v3019_v56 = vmul.f32 %v10805_v57, %v2841_v13  ;;  %4378 = vst.msk [vmem:[%s9981_s5 + $0xa0] sm:$0xff] %vm629_vm0, %v3729_v46  ;;  %v5121_v61 = vpop.f32.mrb[70].mxu1  ;;  %5861 = vrcp.f32 %v2659_v52  ;;  %v2655_v8 = vpop.xlane.xlu1 %2654  ;;  %v3293_v52 = vmul.f32 %v3165_v44, %v3037_v35  ;;  %v3290_v50 = vmul.f32 %v3162_v29, %v3034_v1  ;;  %v3169_v57 = vld [vmem:[%s9980_s4 + $0x318] sm:$0xff]  ;;  %v10812_v35 = vld [vmem:[#allocation95_spill] sm:$0xff]  ;;  %v10813_v1 = vld [vmem:[#allocation44_spill] sm:$0xff] }
 0x3c2   :  { %v5852_v53 = vpop.eup %5851  ;;  %4381 = vst.msk [vmem:[%s9981_s5 + $0xb8] sm:$0xff] %vm629_vm0, %v5121_v61  ;;  %v3732_v18 = vpop.f32.mrb[71].mxu1  ;;  %5863 = vrcp.f32 %v2655_v8 }
 0x3c3   :  { %v2873_v9 = vmul.f32 2.0, %v5852_v53  ;;  %4379 = vst.msk [vmem:[%s9981_s5 + $0xa8] sm:$0xff] %vm629_vm0, %v3732_v18  ;;  %v2625_v32 = vpop.xlane.xlu0 %2624  ;;  %v3275_v48 = vmul.f32 %v3147_v36, %v3019_v56  ;;  %v3373_v62 = vpack.c.bf16 %v3293_v52, %v3292_v42  ;;  %v10817_v42 = vld [vmem:[#allocation93_spill] sm:$0xff] }
 0x3c4   :  { %5865 = vrcp.f32 %v2625_v32 }
 0x3c5   :  { %v3035_v3 = vmul.f32 %v10809_v23, %v2873_v9  ;;  %v3364_v6 = vpack.c.bf16 %v3275_v48, %v3274_v28  ;;  %v2635_v5 = vpop.xlane.xlu1 %2634  ;;  %v3185_v23 = vld [vmem:[%s9980_s4 + $0x398] sm:$0xff] }
 0x3c6   :  { %v5854_v25 = vpop.eup %5853 }
 0x3c7   :  { %5222 = vmatprep.mubr.bf16.mxu0 %v3364_v6  ;;  %v2657_v31 = vpop.xlane.xlu0 %2656  ;;  %v3291_v15 = vmul.f32 %v3163_v19, %v3035_v3  ;;  %v5856_v55 = vpop.eup %5855  ;;  %v2885_v24 = vmul.f32 2.0, %v5854_v25  ;;  %v10815_v3 = vld [vmem:[#allocation105_spill] sm:$0xff]  ;;  %v10816_v25 = vld [vmem:[#allocation32_spill] sm:$0xff] }
 0x3c8   :  { %5867 = vrcp.f32 %v2657_v31  ;;  %5223 = vmatmul.mubr.bf16.gmra.mrb[108].mxu0 %v3365_v14  ;;  %v5858_v34 = vpop.eup %5857  ;;  %v2883_v16 = vmul.f32 2.0, %v5856_v55  ;;  %v3184_v55 = vld [vmem:[%s9980_s4 + $0x390] sm:$0xff] }
 0x3c9   :  { %v3372_v20 = vpack.c.bf16 %v3291_v15, %v3290_v50  ;;  %v2879_v40 = vmul.f32 2.0, %v5858_v34  ;;  %v2667_v12 = vpop.xlane.xlu1 %2666  ;;  %v3041_v37 = vmul.f32 %v10810_v49, %v2885_v24  ;;  %v3182_v50 = vld [vmem:[%s9980_s4 + $0x380] sm:$0xff]  ;;  %v3183_v15 = vld [vmem:[%s9980_s4 + $0x388] sm:$0xff] }
 0x3ca   :  { %v5860_v43 = vpop.eup %5859  ;;  %v3040_v8 = vmul.f32 %v10812_v35, %v2883_v16  ;;  %v10819_v35 = vld [vmem:[#allocation113_spill] sm:$0xff] }
 0x3cb   :  { %v5092_v21 = vpop.f32.mrb[72].mxu0  ;;  %5254 = vmatprep.mubr.bf16.mxu1 %v3372_v20  ;;  %v2637_v22 = vpop.xlane.xlu0 %2636  ;;  %v3038_v45 = vmul.f32 %v10811_v58, %v2879_v40  ;;  %v2917_v63 = vmul.f32 2.0, %v5860_v43  ;;  %v3297_v44 = vmul.f32 %v3169_v57, %v3041_v37 }
 0x3cc   :  { %v5862_v7 = vpop.eup %5861  ;;  %4368 = vst.msk [vmem:[%s9981_s5 + $0x50] sm:$0xff] %vm629_vm0, %v5092_v21  ;;  %v3648_v17 = vpop.f32.mrb[73].mxu0  ;;  %5255 = vmatmul.mubr.bf16.gmra.mrb[108].mxu1 %v3373_v62  ;;  %5869 = vrcp.f32 %v2637_v22  ;;  %v3296_v52 = vmul.f32 %v3168_v30, %v3040_v8 }
 0x3cd   :  { %v5864_v13 = vpop.eup %5863  ;;  %4366 = vst.msk [vmem:[%s9981_s5 + $0x40] sm:$0xff] %vm629_vm0, %v3648_v17  ;;  %v5093_v54 = vpop.f32.mrb[74].mxu0  ;;  %5871 = vrcp.f32 %v2635_v5  ;;  %v2915_v18 = vmul.f32 2.0, %v5862_v7  ;;  %v3057_v2 = vmul.f32 %v10814_v47, %v2917_v63  ;;  %v3294_v19 = vmul.f32 %v3166_v60, %v3038_v45  ;;  %v10820_v47 = vld [vmem:[#allocation35_spill] sm:$0xff] }
 0x3ce   :  { %v5866_v59 = vpop.eup %5865  ;;  %v2631_v46 = vpop.xlane.xlu1 %2630  ;;  %4369 = vst.msk [vmem:[%s9981_s5 + $0x58] sm:$0xff] %vm629_vm0, %v5093_v54  ;;  %v2911_v56 = vmul.f32 2.0, %v5864_v13  ;;  %v3375_v24 = vpack.c.bf16 %v3297_v44, %v3296_v52  ;;  %v3173_v44 = vld [vmem:[%s9980_s4 + $0x338] sm:$0xff] }
 0x3cf   :  { %v3651_v36 = vpop.f32.mrb[75].mxu0  ;;  %v2881_v61 = vmul.f32 2.0, %v5866_v59  ;;  %5873 = vrcp.f32 %v2631_v46  ;;  %v5124_v51 = vpop.f32.mrb[72].mxu1  ;;  %v3056_v31 = vmul.f32 %v10816_v25, %v2915_v18  ;;  %v3313_v40 = vmul.f32 %v3185_v23, %v3057_v2  ;;  %v10821_v23 = vld [vmem:[#allocation38_spill] sm:$0xff] }
 0x3d0   :  { %4367 = vst.msk [vmem:[%s9981_s5 + $0x48] sm:$0xff] %vm629_vm0, %v3651_v36  ;;  %v2669_v53 = vpop.xlane.xlu0 %2668  ;;  %4384 = vst.msk [vmem:[%s9981_s5 + $0xd0] sm:$0xff] %vm629_vm0, %v5124_v51  ;;  %v3745_v28 = vpop.f32.mrb[73].mxu1  ;;  %v3054_v6 = vmul.f32 %v10815_v3, %v2911_v56 }
 0x3d1   :  { %v3039_v9 = vmul.f32 %v10813_v1, %v2881_v61  ;;  %5875 = vrcp.f32 %v2669_v53  ;;  %4382 = vst.msk [vmem:[%s9981_s5 + $0xc0] sm:$0xff] %vm629_vm0, %v3745_v28  ;;  %v5125_v32 = vpop.f32.mrb[74].mxu1  ;;  %v3312_v16 = vmul.f32 %v3184_v55, %v3056_v31  ;;  %v10818_v53 = vld [vmem:[#allocation107_spill] sm:$0xff]  ;;  %v10823_v55 = vld [vmem:[#allocation41_spill] sm:$0xff] }
 0x3d2   :  { %v5868_v48 = vpop.eup %5867  ;;  %5877 = vrcp.f32 %v2667_v12  ;;  %v2663_v4 = vpop.xlane.xlu1 %2662  ;;  %4385 = vst.msk [vmem:[%s9981_s5 + $0xd8] sm:$0xff] %vm629_vm0, %v5125_v32  ;;  %v3310_v21 = vmul.f32 %v3182_v50, %v3054_v6 }
 0x3d3   :  { %v3748_v29 = vpop.f32.mrb[75].mxu1  ;;  %v2913_v11 = vmul.f32 2.0, %v5868_v48  ;;  %5879 = vrcp.f32 %v2663_v4  ;;  %v3295_v14 = vmul.f32 %v3167_v0, %v3039_v9  ;;  %v3383_v54 = vpack.c.bf16 %v3313_v40, %v3312_v16  ;;  %v3170_v48 = vld [vmem:[%s9980_s4 + $0x320] sm:$0xff]  ;;  %v3189_v40 = vld [vmem:[%s9980_s4 + $0x3b8] sm:$0xff] }
 0x3d4   :  { %4383 = vst.msk [vmem:[%s9981_s5 + $0xc8] sm:$0xff] %vm629_vm0, %v3748_v29  ;;  %v2633_v5 = vpop.xlane.xlu0 %2632 }
 0x3d5   :  { %5881 = vrcp.f32 %v2633_v5  ;;  %v3055_v34 = vmul.f32 %v10817_v42, %v2913_v11  ;;  %v3374_v20 = vpack.c.bf16 %v3295_v14, %v3294_v19  ;;  %v3171_v19 = vld [vmem:[%s9980_s4 + $0x328] sm:$0xff]  ;;  %v3172_v11 = vld [vmem:[%s9980_s4 + $0x330] sm:$0xff] }
 0x3d6   :  { %v2643_v12 = vpop.xlane.xlu1 %2642  ;;  %v5870_v62 = vpop.eup %5869  ;;  %v10822_v14 = vld [vmem:[#allocation99_spill] sm:$0xff] }
 0x3d7   :  { %5274 = vmatprep.mubr.bf16.mxu0 %v3374_v20  ;;  %v3311_v22 = vmul.f32 %v3183_v15, %v3055_v34  ;;  %v5872_v7 = vpop.eup %5871  ;;  %v2893_v59 = vmul.f32 2.0, %v5870_v62 }
 0x3d8   :  { %v2665_v43 = vpop.xlane.xlu0 %2664  ;;  %5275 = vmatmul.mubr.bf16.vlgmr.msra.gmra.mrb[112].mxu0 %v3375_v24  ;;  %v2891_v36 = vmul.f32 2.0, %v5872_v7  ;;  %v10825_v7 = vld [vmem:[#allocation45_spill] sm:$0xff] }
 0x3d9   :  { %5883 = vrcp.f32 %v2665_v43  ;;  %v5874_v17 = vpop.eup %5873  ;;  %v3382_v13 = vpack.c.bf16 %v3311_v22, %v3310_v21  ;;  %v3045_v60 = vmul.f32 %v10818_v53, %v2893_v59  ;;  %v3186_v21 = vld [vmem:[%s9980_s4 + $0x3a0] sm:$0xff]  ;;  %v3187_v22 = vld [vmem:[%s9980_s4 + $0x3a8] sm:$0xff] }
 0x3da   :  { %v2887_v49 = vmul.f32 2.0, %v5874_v17  ;;  %v2675_v37 = vpop.xlane.xlu1 %2674  ;;  %v5096_v45 = vpop.f32.mrb[76].mxu0  ;;  %v3044_v2 = vmul.f32 %v10820_v47, %v2891_v36 }
 0x3db   :  { %v5876_v58 = vpop.eup %5875  ;;  %5306 = vmatprep.mubr.bf16.mxu1 %v3382_v13  ;;  %4372 = vst.msk [vmem:[%s9981_s5 + $0x70] sm:$0xff] %vm629_vm0, %v5096_v45  ;;  %v3664_v57 = vpop.f32.mrb[77].mxu0  ;;  %v3301_v15 = vmul.f32 %v3173_v44, %v3045_v60  ;;  %v3188_v13 = vld [vmem:[%s9980_s4 + $0x3b0] sm:$0xff] }
 0x3dc   :  { %v2645_v63 = vpop.xlane.xlu0 %2644  ;;  %v5878_v46 = vpop.eup %5877  ;;  %5307 = vmatmul.mubr.bf16.vlgmr.msra.gmra.mrb[112].mxu1 %v3383_v54  ;;  %4370 = vst.msk [vmem:[%s9981_s5 + $0x60] sm:$0xff] %vm629_vm0, %v3664_v57  ;;  %v3042_v8 = vmul.f32 %v10819_v35, %v2887_v49  ;;  %v2925_v18 = vmul.f32 2.0, %v5876_v58  ;;  %v3300_v43 = vmul.f32 %v3172_v11, %v3044_v2 }
 0x3dd   :  { %v5880_v56 = vpop.eup %5879  ;;  %5885 = vrcp.f32 %v2645_v63  ;;  %v5097_v61 = vpop.f32.mrb[78].mxu0  ;;  %v2923_v4 = vmul.f32 2.0, %v5878_v46 }
 0x3de   :  { %5887 = vrcp.f32 %v2643_v12  ;;  %v2639_v28 = vpop.xlane.xlu1 %2638  ;;  %4373 = vst.msk [vmem:[%s9981_s5 + $0x78] sm:$0xff] %vm629_vm0, %v5097_v61  ;;  %v3667_v0 = vpop.f32.mrb[79].mxu0  ;;  %v2919_v30 = vmul.f32 2.0, %v5880_v56  ;;  %v3061_v52 = vmul.f32 %v10822_v14, %v2925_v18  ;;  %v3298_v50 = vmul.f32 %v3170_v48, %v3042_v8  ;;  %v10824_v12 = vld [vmem:[#allocation115_spill] sm:$0xff] }
 0x3df   :  { %v5882_v51 = vpop.eup %5881  ;;  %5889 = vrcp.f32 %v2639_v28  ;;  %4371 = vst.msk [vmem:[%s9981_s5 + $0x68] sm:$0xff] %vm629_vm0, %v3667_v0  ;;  %v5128_v9 = vpop.f32.mrb[76].mxu1  ;;  %v3060_v62 = vmul.f32 %v10824_v12, %v2923_v4  ;;  %v3377_v59 = vpack.c.bf16 %v3301_v15, %v3300_v43 }
 0x3e0   :  { %v2889_v1 = vmul.f32 2.0, %v5882_v51  ;;  %v2677_v32 = vpop.xlane.xlu0 %2676  ;;  %4388 = vst.msk [vmem:[%s9981_s5 + $0xf0] sm:$0xff] %vm629_vm0, %v5128_v9  ;;  %v3761_v29 = vpop.f32.mrb[77].mxu1  ;;  %v3058_v42 = vmul.f32 %v10823_v55, %v2919_v30  ;;  %v3317_v49 = vmul.f32 %v3189_v40, %v3061_v52  ;;  %v3176_v52 = vld [vmem:[%s9980_s4 + $0x350] sm:$0xff] }
 0x3e1   :  { %5891 = vrcp.f32 %v2677_v32  ;;  %4386 = vst.msk [vmem:[%s9981_s5 + $0xe0] sm:$0xff] %vm629_vm0, %v3761_v29  ;;  %v5129_v6 = vpop.f32.mrb[78].mxu1  ;;  %v3316_v36 = vmul.f32 %v3188_v13, %v3060_v62  ;;  %v10827_v32 = vld [vmem:[#allocation39_spill] sm:$0xff]  ;;  %v10830_v62 = vld [vmem:[#allocation42_spill] sm:$0xff]  ;;  %v3192_v13 = vld [vmem:[%s9980_s4 + $0x3d0] sm:$0xff] }
 0x3e2   :  { %v3043_v3 = vmul.f32 %v10821_v23, %v2889_v1  ;;  %5893 = vrcp.f32 %v2675_v37  ;;  %v2671_v25 = vpop.xlane.xlu1 %2670  ;;  %4389 = vst.msk [vmem:[%s9981_s5 + $0xf8] sm:$0xff] %vm629_vm0, %v5129_v6  ;;  %v3764_v31 = vpop.f32.mrb[79].mxu1  ;;  %v3314_v45 = vmul.f32 %v3186_v21, %v3058_v42  ;;  %v10826_v1 = vld [vmem:[#allocation48_spill] sm:$0xff]  ;;  %v3177_v23 = vld [vmem:[%s9980_s4 + $0x358] sm:$0xff] }
 0x3e3   :  { %v5884_v5 = vpop.eup %5883  ;;  %5895 = vrcp.f32 %v2671_v25  ;;  %4387 = vst.msk [vmem:[%s9981_s5 + $0xe8] sm:$0xff] %vm629_vm0, %v3764_v31  ;;  %v3385_v60 = vpack.c.bf16 %v3317_v49, %v3316_v36  ;;  %v10829_v31 = vld [vmem:[#allocation18_spill] sm:$0xff] }
 0x3e4   :  { %v2921_v34 = vmul.f32 2.0, %v5884_v5  ;;  %v2641_v20 = vpop.xlane.xlu0 %2640  ;;  %v3299_v24 = vmul.f32 %v3171_v19, %v3043_v3  ;;  %v3174_v19 = vld [vmem:[%s9980_s4 + $0x340] sm:$0xff]  ;;  %v10828_v3 = vld [vmem:[#allocation120_spill] sm:$0xff]  ;;  %v3175_v5 = vld [vmem:[%s9980_s4 + $0x348] sm:$0xff] }
 0x3e5   :  { %5897 = vrcp.f32 %v2641_v20 }
 0x3e6   :  { %v3059_v16 = vmul.f32 %v10825_v7, %v2921_v34  ;;  %v3376_v17 = vpack.c.bf16 %v3299_v24, %v3298_v50  ;;  %v2651_v54 = vpop.xlane.xlu1 %2650 }
 0x3e7   :  { %v5886_v37 = vpop.eup %5885 }
 0x3e8   :  { %5278 = vmatprep.mubr.bf16.mxu0 %v3376_v17  ;;  %v2673_v58 = vpop.xlane.xlu0 %2672  ;;  %v3315_v63 = vmul.f32 %v3187_v22, %v3059_v16  ;;  %v5888_v46 = vpop.eup %5887  ;;  %v2901_v61 = vmul.f32 2.0, %v5886_v37  ;;  %v3190_v22 = vld [vmem:[%s9980_s4 + $0x3c0] sm:$0xff] }
 0x3e9   :  { %5899 = vrcp.f32 %v2673_v58  ;;  %5279 = vmatmul.mubr.bf16.gmra.mrb[116].mxu0 %v3377_v59  ;;  %v5890_v57 = vpop.eup %5889  ;;  %v2899_v28 = vmul.f32 2.0, %v5888_v46 }
 0x3ea   :  { %v3384_v56 = vpack.c.bf16 %v3315_v63, %v3314_v45  ;;  %v2895_v51 = vmul.f32 2.0, %v5890_v57  ;;  %5901 = vrcp.f32 %v2651_v54  ;;  %v2647_v53 = vpop.xlane.xlu1 %2646  ;;  %v3049_v9 = vmul.f32 %v10826_v1, %v2901_v61  ;;  %v3180_v1 = vld [vmem:[%s9980_s4 + $0x370] sm:$0xff] }
 0x3eb   :  { %v5892_v35 = vpop.eup %5891  ;;  %5903 = vrcp.f32 %v2647_v53  ;;  %v3048_v6 = vmul.f32 %v10828_v3, %v2899_v28  ;;  %v3181_v28 = vld [vmem:[%s9980_s4 + $0x378] sm:$0xff] }
 0x3ec   :  { %5310 = vmatprep.mubr.bf16.mxu1 %v3384_v56  ;;  %v2653_v8 = vpop.xlane.xlu0 %2652  ;;  %v5894_v18 = vpop.eup %5893  ;;  %v3046_v48 = vmul.f32 %v10827_v32, %v2895_v51  ;;  %v2933_v44 = vmul.f32 2.0, %v5892_v35  ;;  %v3305_v42 = vmul.f32 %v3177_v23, %v3049_v9  ;;  %v10832_v23 = vld [vmem:[#allocation52_spill] sm:$0xff] }
 0x3ed   :  { %5905 = vrcp.f32 %v2653_v8  ;;  %5311 = vmatmul.mubr.bf16.gmra.mrb[116].mxu1 %v3385_v60  ;;  %v5896_v0 = vpop.eup %5895  ;;  %v2931_v11 = vmul.f32 2.0, %v5894_v18  ;;  %v3304_v21 = vmul.f32 %v3176_v52, %v3048_v6  ;;  %v3178_v18 = vld [vmem:[%s9980_s4 + $0x360] sm:$0xff] }
 0x3ee   :  { %v2679_v47 = vpop.xlane.xlu1 %2678  ;;  %v2927_v2 = vmul.f32 2.0, %v5896_v0  ;;  %v3065_v50 = vmul.f32 %v10829_v31, %v2933_v44  ;;  %v3302_v55 = vmul.f32 %v3174_v19, %v3046_v48  ;;  %v10831_v44 = vld [vmem:[#allocation121_spill] sm:$0xff]  ;;  %v3194_v19 = vld [vmem:[%s9980_s4 + $0x3e0] sm:$0xff] }
 0x3ef   :  { %v5898_v30 = vpop.eup %5897  ;;  %5907 = vrcp.f32 %v2679_v47  ;;  %v3064_v43 = vmul.f32 %v10830_v62, %v2931_v11  ;;  %v3379_v49 = vpack.c.bf16 %v3305_v42, %v3304_v21  ;;  %v10834_v42 = vld [vmem:[#allocation43_spill] sm:$0xff] }
 0x3f0   :  { %v2897_v4 = vmul.f32 2.0, %v5898_v30  ;;  %v2649_v29 = vpop.xlane.xlu0 %2648  ;;  %v3062_v34 = vmul.f32 %v8863_v27, %v2927_v2  ;;  %v3191_v27 = vld [vmem:[%s9980_s4 + $0x3c8] sm:$0xff] }
 0x3f1   :  { %5909 = vrcp.f32 %v2649_v29  ;;  %v3320_v57 = vmul.f32 %v3192_v13, %v3064_v43 }
 0x3f2   :  { %v3047_v14 = vmul.f32 %v8880_v38, %v2897_v4  ;;  %v2683_v15 = vpop.xlane.xlu1 %2682  ;;  %v3193_v38 = vld [vmem:[%s9980_s4 + $0x3d8] sm:$0xff]  ;;  %v3318_v63 = vmul.f32 %v3190_v22, %v3062_v34 }
 0x3f3   :  { %v5900_v25 = vpop.eup %5899  ;;  %5911 = vrcp.f32 %v2683_v15  ;;  %v3321_v37 = vmul.f32 %v3193_v38, %v3065_v50  ;;  %v3196_v15 = vld [vmem:[%s9980_s4 + $0x3f0] sm:$0xff] }
 0x3f4   :  { %v2929_v20 = vmul.f32 2.0, %v5900_v25  ;;  %v2681_v24 = vpop.xlane.xlu0 %2680  ;;  %v3303_v40 = vmul.f32 %v3175_v5, %v3047_v14  ;;  %v5902_v12 = vpop.eup %5901  ;;  %v10833_v14 = vld [vmem:[#allocation119_spill] sm:$0xff] }
 0x3f5   :  { %5913 = vrcp.f32 %v2681_v24  ;;  %v5904_v7 = vpop.eup %5903  ;;  %v2907_v36 = vmul.f32 2.0, %v5902_v12  ;;  %v3387_v60 = vpack.c.bf16 %v3321_v37, %v3320_v57 }
 0x3f6   :  { %v3063_v16 = vmul.f32 %v8897_v39, %v2929_v20  ;;  %v3378_v17 = vpack.c.bf16 %v3303_v40, %v3302_v55  ;;  %v2903_v59 = vmul.f32 2.0, %v5904_v7  ;;  %v3197_v55 = vld [vmem:[%s9980_s4 + $0x3f8] sm:$0xff] }
 0x3f7   :  { %v5906_v54 = vpop.eup %5905  ;;  %v3052_v0 = vmul.f32 %v8886_v26, %v2907_v36 }
 0x3f8   :  { %v2909_v58 = vmul.f32 2.0, %v5906_v54  ;;  %5282 = vmatprep.mubr.bf16.mxu0 %v3378_v17  ;;  %v2685_v45 = vpop.xlane.xlu0 %2684  ;;  %v3319_v46 = vmul.f32 %v3191_v27, %v3063_v16  ;;  %v3050_v51 = vmul.f32 %v8921_v41, %v2903_v59  ;;  %v3179_v41 = vld [vmem:[%s9980_s4 + $0x368] sm:$0xff] }
 0x3f9   :  { %5915 = vrcp.f32 %v2685_v45  ;;  %5283 = vmatmul.mubr.bf16.gmra.mrb[120].mxu0 %v3379_v49  ;;  %v5908_v56 = vpop.eup %5907  ;;  %v3308_v29 = vmul.f32 %v3180_v1, %v3052_v0 }
 0x3fa   :  { %v3386_v39 = vpack.c.bf16 %v3319_v46, %v3318_v63  ;;  %v3053_v53 = vmul.f32 %v8904_v10, %v2909_v58  ;;  %v2935_v35 = vmul.f32 2.0, %v5908_v56  ;;  %v3306_v32 = vmul.f32 %v3178_v18, %v3050_v51 }
 0x3fb   :  { %v5910_v61 = vpop.eup %5909 }
 0x3fc   :  { %v2905_v8 = vmul.f32 2.0, %v5910_v61  ;;  %5314 = vmatprep.mubr.bf16.mxu1 %v3386_v39  ;;  %v3309_v48 = vmul.f32 %v3181_v28, %v3053_v53  ;;  %v3066_v47 = vmul.f32 %v10831_v44, %v2935_v35 }
 0x3fd   :  { %5315 = vmatmul.mubr.bf16.gmra.mrb[120].mxu1 %v3387_v60  ;;  %v5912_v10 = vpop.eup %5911 }
 0x3fe   :  { %v3051_v30 = vmul.f32 %v8959_v33, %v2905_v8  ;;  %v2939_v2 = vmul.f32 2.0, %v5912_v10  ;;  %v3195_v33 = vld [vmem:[%s9980_s4 + $0x3e8] sm:$0xff]  ;;  %v3381_v5 = vpack.c.bf16 %v3309_v48, %v3308_v29  ;;  %v3322_v31 = vmul.f32 %v3194_v19, %v3066_v47 }
 0x3ff   :  { %v5914_v9 = vpop.eup %5913 }
 0x400   :  { %v2937_v4 = vmul.f32 2.0, %v5914_v9  ;;  %v3307_v26 = vmul.f32 %v3179_v41, %v3051_v30  ;;  %v3068_v52 = vmul.f32 %v10833_v14, %v2939_v2 }
 0x402   :  { %v3067_v3 = vmul.f32 %v10832_v23, %v2937_v4  ;;  %v3380_v6 = vpack.c.bf16 %v3307_v26, %v3306_v32  ;;  %v3324_v24 = vmul.f32 %v3196_v15, %v3068_v52 }
 0x403   :  { %v5916_v11 = vpop.eup %5915 }
 0x404   :  { %v2941_v25 = vmul.f32 2.0, %v5916_v11  ;;  %5286 = vmatprep.mubr.bf16.mxu0 %v3380_v6  ;;  %v3323_v50 = vmul.f32 %v3195_v33, %v3067_v3 }
 0x405   :  { %5287 = vmatmul.mubr.bf16.gmra.mrb[124].mxu0 %v3381_v5 }
 0x406   :  { %v3069_v34 = vmul.f32 %v10834_v42, %v2941_v25  ;;  %v3388_v20 = vpack.c.bf16 %v3323_v50, %v3322_v31 }
 0x408   :  { %5318 = vmatprep.mubr.bf16.mxu1 %v3388_v20  ;;  %v3325_v40 = vmul.f32 %v3197_v55, %v3069_v34 }
 0x40a   :  { %v3389_v38 = vpack.c.bf16 %v3325_v40, %v3324_v24 }
 0x40c   :  { %5319 = vmatmul.mubr.bf16.gmra.mrb[124].mxu1 %v3389_v38 }
 0x42a   :  { %v5148_v12 = vpop.f32.mrb[80].mxu0 }
 0x42b   :  { %4392 = vst.msk [vmem:[%s9981_s5 + $0x110] sm:$0xff] %vm629_vm0, %v5148_v12  ;;  %v3810_v62 = vpop.f32.mrb[81].mxu0 }
 0x42c   :  { %4390 = vst.msk [vmem:[%s9981_s5 + $0x100] sm:$0xff] %vm629_vm0, %v3810_v62  ;;  %v5149_v43 = vpop.f32.mrb[82].mxu0 }
 0x42d   :  { %4393 = vst.msk [vmem:[%s9981_s5 + $0x118] sm:$0xff] %vm629_vm0, %v5149_v43  ;;  %v3813_v21 = vpop.f32.mrb[83].mxu0 }
 0x42e   :  { %4391 = vst.msk [vmem:[%s9981_s5 + $0x108] sm:$0xff] %vm629_vm0, %v3813_v21  ;;  %v5180_v22 = vpop.f32.mrb[80].mxu1 }
 0x42f   :  { %4408 = vst.msk [vmem:[%s9981_s5 + $0x190] sm:$0xff] %vm629_vm0, %v5180_v22  ;;  %v3907_v27 = vpop.f32.mrb[81].mxu1 }
 0x430   :  { %4406 = vst.msk [vmem:[%s9981_s5 + $0x180] sm:$0xff] %vm629_vm0, %v3907_v27  ;;  %v5181_v7 = vpop.f32.mrb[82].mxu1 }
 0x431   :  { %4409 = vst.msk [vmem:[%s9981_s5 + $0x198] sm:$0xff] %vm629_vm0, %v5181_v7  ;;  %v3910_v16 = vpop.f32.mrb[83].mxu1 }
 0x432   :  { %4407 = vst.msk [vmem:[%s9981_s5 + $0x188] sm:$0xff] %vm629_vm0, %v3910_v16 }
 0x43a   :  { %v5152_v17 = vpop.f32.mrb[84].mxu0 }
 0x43b   :  { %4396 = vst.msk [vmem:[%s9981_s5 + $0x130] sm:$0xff] %vm629_vm0, %v5152_v17  ;;  %v3826_v13 = vpop.f32.mrb[85].mxu0 }
 0x43c   :  { %4394 = vst.msk [vmem:[%s9981_s5 + $0x120] sm:$0xff] %vm629_vm0, %v3826_v13  ;;  %v5153_v54 = vpop.f32.mrb[86].mxu0 }
 0x43d   :  { %4397 = vst.msk [vmem:[%s9981_s5 + $0x138] sm:$0xff] %vm629_vm0, %v5153_v54  ;;  %v3829_v59 = vpop.f32.mrb[87].mxu0 }
 0x43e   :  { %4395 = vst.msk [vmem:[%s9981_s5 + $0x128] sm:$0xff] %vm629_vm0, %v3829_v59  ;;  %v5184_v49 = vpop.f32.mrb[84].mxu1 }
 0x43f   :  { %4412 = vst.msk [vmem:[%s9981_s5 + $0x1b0] sm:$0xff] %vm629_vm0, %v5184_v49  ;;  %v3923_v37 = vpop.f32.mrb[85].mxu1 }
 0x440   :  { %4410 = vst.msk [vmem:[%s9981_s5 + $0x1a0] sm:$0xff] %vm629_vm0, %v3923_v37  ;;  %v5185_v58 = vpop.f32.mrb[86].mxu1 }
 0x441   :  { %4413 = vst.msk [vmem:[%s9981_s5 + $0x1b8] sm:$0xff] %vm629_vm0, %v5185_v58  ;;  %v3926_v45 = vpop.f32.mrb[87].mxu1 }
 0x442   :  { %4411 = vst.msk [vmem:[%s9981_s5 + $0x1a8] sm:$0xff] %vm629_vm0, %v3926_v45 }
 0x44a   :  { %v5156_v63 = vpop.f32.mrb[88].mxu0 }
 0x44b   :  { %4400 = vst.msk [vmem:[%s9981_s5 + $0x150] sm:$0xff] %vm629_vm0, %v5156_v63  ;;  %v3842_v46 = vpop.f32.mrb[89].mxu0 }
 0x44c   :  { %4398 = vst.msk [vmem:[%s9981_s5 + $0x140] sm:$0xff] %vm629_vm0, %v3842_v46  ;;  %v5157_v36 = vpop.f32.mrb[90].mxu0 }
 0x44d   :  { %4401 = vst.msk [vmem:[%s9981_s5 + $0x158] sm:$0xff] %vm629_vm0, %v5157_v36  ;;  %v3845_v57 = vpop.f32.mrb[91].mxu0 }
 0x44e   :  { %4399 = vst.msk [vmem:[%s9981_s5 + $0x148] sm:$0xff] %vm629_vm0, %v3845_v57  ;;  %v5188_v56 = vpop.f32.mrb[88].mxu1 }
 0x44f   :  { %4416 = vst.msk [vmem:[%s9981_s5 + $0x1d0] sm:$0xff] %vm629_vm0, %v5188_v56  ;;  %v3939_v39 = vpop.f32.mrb[89].mxu1 }
 0x450   :  { %4414 = vst.msk [vmem:[%s9981_s5 + $0x1c0] sm:$0xff] %vm629_vm0, %v3939_v39  ;;  %v5189_v61 = vpop.f32.mrb[90].mxu1 }
 0x451   :  { %4417 = vst.msk [vmem:[%s9981_s5 + $0x1d8] sm:$0xff] %vm629_vm0, %v5189_v61  ;;  %v3942_v51 = vpop.f32.mrb[91].mxu1 }
 0x452   :  { %4415 = vst.msk [vmem:[%s9981_s5 + $0x1c8] sm:$0xff] %vm629_vm0, %v3942_v51 }
 0x45a   :  { %v5160_v53 = vpop.f32.mrb[92].mxu0 }
 0x45b   :  { %4404 = vst.msk [vmem:[%s9981_s5 + $0x170] sm:$0xff] %vm629_vm0, %v5160_v53  ;;  %v3858_v60 = vpop.f32.mrb[93].mxu0 }
 0x45c   :  { %4402 = vst.msk [vmem:[%s9981_s5 + $0x160] sm:$0xff] %vm629_vm0, %v3858_v60  ;;  %v5161_v35 = vpop.f32.mrb[94].mxu0 }
 0x45d   :  { %4405 = vst.msk [vmem:[%s9981_s5 + $0x178] sm:$0xff] %vm629_vm0, %v5161_v35  ;;  %v3861_v8 = vpop.f32.mrb[95].mxu0 }
 0x45e   :  { %4403 = vst.msk [vmem:[%s9981_s5 + $0x168] sm:$0xff] %vm629_vm0, %v3861_v8  ;;  %v5192_v18 = vpop.f32.mrb[92].mxu1 }
 0x45f   :  { %4420 = vst.msk [vmem:[%s9981_s5 + $0x1f0] sm:$0xff] %vm629_vm0, %v5192_v18  ;;  %v3955_v28 = vpop.f32.mrb[93].mxu1 }
 0x460   :  { %4418 = vst.msk [vmem:[%s9981_s5 + $0x1e0] sm:$0xff] %vm629_vm0, %v3955_v28  ;;  %v5193_v0 = vpop.f32.mrb[94].mxu1 }
 0x461   :  { %4421 = vst.msk [vmem:[%s9981_s5 + $0x1f8] sm:$0xff] %vm629_vm0, %v5193_v0  ;;  %v3958_v41 = vpop.f32.mrb[95].mxu1 }
 0x462   :  { %4419 = vst.msk [vmem:[%s9981_s5 + $0x1e8] sm:$0xff] %vm629_vm0, %v3958_v41 }
 0x46a   :  { %v5212_v10 = vpop.f32.mrb[96].mxu0 }
 0x46b   :  { %4424 = vst.msk [vmem:[%s9981_s5 + $0x210] sm:$0xff] %vm629_vm0, %v5212_v10  ;;  %v4004_v30 = vpop.f32.mrb[97].mxu0 }
 0x46c   :  { %4422 = vst.msk [vmem:[%s9981_s5 + $0x200] sm:$0xff] %vm629_vm0, %v4004_v30  ;;  %v5213_v1 = vpop.f32.mrb[98].mxu0 }
 0x46d   :  { %4425 = vst.msk [vmem:[%s9981_s5 + $0x218] sm:$0xff] %vm629_vm0, %v5213_v1  ;;  %v4007_v9 = vpop.f32.mrb[99].mxu0 }
 0x46e   :  { %4423 = vst.msk [vmem:[%s9981_s5 + $0x208] sm:$0xff] %vm629_vm0, %v4007_v9  ;;  %v5244_v32 = vpop.f32.mrb[96].mxu1 }
 0x46f   :  { %4440 = vst.msk [vmem:[%s9981_s5 + $0x290] sm:$0xff] %vm629_vm0, %v5244_v32  ;;  %v4101_v48 = vpop.f32.mrb[97].mxu1 }
 0x470   :  { %4438 = vst.msk [vmem:[%s9981_s5 + $0x280] sm:$0xff] %vm629_vm0, %v4101_v48  ;;  %v5245_v44 = vpop.f32.mrb[98].mxu1 }
 0x471   :  { %4441 = vst.msk [vmem:[%s9981_s5 + $0x298] sm:$0xff] %vm629_vm0, %v5245_v44  ;;  %v4104_v47 = vpop.f32.mrb[99].mxu1 }
 0x472   :  { %4439 = vst.msk [vmem:[%s9981_s5 + $0x288] sm:$0xff] %vm629_vm0, %v4104_v47 }
 0x47a   :  { %v5216_v2 = vpop.f32.mrb[100].mxu0 }
 0x47b   :  { %4428 = vst.msk [vmem:[%s9981_s5 + $0x230] sm:$0xff] %vm629_vm0, %v5216_v2  ;;  %v4020_v4 = vpop.f32.mrb[101].mxu0 }
 0x47c   :  { %4426 = vst.msk [vmem:[%s9981_s5 + $0x220] sm:$0xff] %vm629_vm0, %v4020_v4  ;;  %v5217_v26 = vpop.f32.mrb[102].mxu0 }
 0x47d   :  { %4429 = vst.msk [vmem:[%s9981_s5 + $0x238] sm:$0xff] %vm629_vm0, %v5217_v26  ;;  %v4023_v29 = vpop.f32.mrb[103].mxu0 }
 0x47e   :  { %4427 = vst.msk [vmem:[%s9981_s5 + $0x228] sm:$0xff] %vm629_vm0, %v4023_v29  ;;  %v5248_v19 = vpop.f32.mrb[100].mxu1 }
 0x47f   :  { %4444 = vst.msk [vmem:[%s9981_s5 + $0x2b0] sm:$0xff] %vm629_vm0, %v5248_v19  ;;  %v4117_v33 = vpop.f32.mrb[101].mxu1 }
 0x480   :  { %4442 = vst.msk [vmem:[%s9981_s5 + $0x2a0] sm:$0xff] %vm629_vm0, %v4117_v33  ;;  %v5249_v23 = vpop.f32.mrb[102].mxu1 }
 0x481   :  { %4445 = vst.msk [vmem:[%s9981_s5 + $0x2b8] sm:$0xff] %vm629_vm0, %v5249_v23  ;;  %v4120_v3 = vpop.f32.mrb[103].mxu1 }
 0x482   :  { %4443 = vst.msk [vmem:[%s9981_s5 + $0x2a8] sm:$0xff] %vm629_vm0, %v4120_v3 }
 0x48a   :  { %v5220_v6 = vpop.f32.mrb[104].mxu0 }
 0x48b   :  { %4432 = vst.msk [vmem:[%s9981_s5 + $0x250] sm:$0xff] %vm629_vm0, %v5220_v6  ;;  %v4036_v11 = vpop.f32.mrb[105].mxu0 }
 0x48c   :  { %4430 = vst.msk [vmem:[%s9981_s5 + $0x240] sm:$0xff] %vm629_vm0, %v4036_v11  ;;  %v5221_v5 = vpop.f32.mrb[106].mxu0 }
 0x48d   :  { %4433 = vst.msk [vmem:[%s9981_s5 + $0x258] sm:$0xff] %vm629_vm0, %v5221_v5  ;;  %v4039_v14 = vpop.f32.mrb[107].mxu0 }
 0x48e   :  { %4431 = vst.msk [vmem:[%s9981_s5 + $0x248] sm:$0xff] %vm629_vm0, %v4039_v14  ;;  %v5252_v52 = vpop.f32.mrb[104].mxu1 }
 0x48f   :  { %4448 = vst.msk [vmem:[%s9981_s5 + $0x2d0] sm:$0xff] %vm629_vm0, %v5252_v52  ;;  %v4133_v25 = vpop.f32.mrb[105].mxu1 }
 0x490   :  { %4446 = vst.msk [vmem:[%s9981_s5 + $0x2c0] sm:$0xff] %vm629_vm0, %v4133_v25  ;;  %v5253_v31 = vpop.f32.mrb[106].mxu1 }
 0x491   :  { %4449 = vst.msk [vmem:[%s9981_s5 + $0x2d8] sm:$0xff] %vm629_vm0, %v5253_v31  ;;  %v4136_v50 = vpop.f32.mrb[107].mxu1 }
 0x492   :  { %4447 = vst.msk [vmem:[%s9981_s5 + $0x2c8] sm:$0xff] %vm629_vm0, %v4136_v50 }
 0x49b   :  { %v5224_v15 = vpop.f32.mrb[108].mxu0 }
 0x49c   :  { %4436 = vst.msk [vmem:[%s9981_s5 + $0x270] sm:$0xff] %vm629_vm0, %v5224_v15  ;;  %v4052_v55 = vpop.f32.mrb[109].mxu0 }
 0x49d   :  { %4434 = vst.msk [vmem:[%s9981_s5 + $0x260] sm:$0xff] %vm629_vm0, %v4052_v55  ;;  %v5225_v42 = vpop.f32.mrb[110].mxu0 }
 0x49e   :  { %4437 = vst.msk [vmem:[%s9981_s5 + $0x278] sm:$0xff] %vm629_vm0, %v5225_v42  ;;  %v4055_v34 = vpop.f32.mrb[111].mxu0 }
 0x49f   :  { %4435 = vst.msk [vmem:[%s9981_s5 + $0x268] sm:$0xff] %vm629_vm0, %v4055_v34  ;;  %v5256_v20 = vpop.f32.mrb[108].mxu1 }
 0x4a0   :  { %4452 = vst.msk [vmem:[%s9981_s5 + $0x2f0] sm:$0xff] %vm629_vm0, %v5256_v20  ;;  %v4149_v24 = vpop.f32.mrb[109].mxu1 }
 0x4a1   :  { %4450 = vst.msk [vmem:[%s9981_s5 + $0x2e0] sm:$0xff] %vm629_vm0, %v4149_v24  ;;  %v5257_v40 = vpop.f32.mrb[110].mxu1 }
 0x4a2   :  { %4453 = vst.msk [vmem:[%s9981_s5 + $0x2f8] sm:$0xff] %vm629_vm0, %v5257_v40  ;;  %v4152_v38 = vpop.f32.mrb[111].mxu1 }
 0x4a3   :  { %4451 = vst.msk [vmem:[%s9981_s5 + $0x2e8] sm:$0xff] %vm629_vm0, %v4152_v38 }
 0x4ab   :  { %v5276_v12 = vpop.f32.mrb[112].mxu0 }
 0x4ac   :  { %4456 = vst.msk [vmem:[%s9981_s5 + $0x310] sm:$0xff] %vm629_vm0, %v5276_v12  ;;  %v4198_v62 = vpop.f32.mrb[113].mxu0 }
 0x4ad   :  { %4454 = vst.msk [vmem:[%s9981_s5 + $0x300] sm:$0xff] %vm629_vm0, %v4198_v62  ;;  %v5277_v43 = vpop.f32.mrb[114].mxu0 }
 0x4ae   :  { %4457 = vst.msk [vmem:[%s9981_s5 + $0x318] sm:$0xff] %vm629_vm0, %v5277_v43  ;;  %v4201_v21 = vpop.f32.mrb[115].mxu0 }
 0x4af   :  { %4455 = vst.msk [vmem:[%s9981_s5 + $0x308] sm:$0xff] %vm629_vm0, %v4201_v21  ;;  %v5308_v22 = vpop.f32.mrb[112].mxu1 }
 0x4b0   :  { %4472 = vst.msk [vmem:[%s9981_s5 + $0x390] sm:$0xff] %vm629_vm0, %v5308_v22  ;;  %v4295_v27 = vpop.f32.mrb[113].mxu1 }
 0x4b1   :  { %4470 = vst.msk [vmem:[%s9981_s5 + $0x380] sm:$0xff] %vm629_vm0, %v4295_v27  ;;  %v5309_v7 = vpop.f32.mrb[114].mxu1 }
 0x4b2   :  { %4473 = vst.msk [vmem:[%s9981_s5 + $0x398] sm:$0xff] %vm629_vm0, %v5309_v7  ;;  %v4298_v16 = vpop.f32.mrb[115].mxu1 }
 0x4b3   :  { %4471 = vst.msk [vmem:[%s9981_s5 + $0x388] sm:$0xff] %vm629_vm0, %v4298_v16 }
 0x4bc   :  { %v5280_v17 = vpop.f32.mrb[116].mxu0 }
 0x4bd   :  { %4460 = vst.msk [vmem:[%s9981_s5 + $0x330] sm:$0xff] %vm629_vm0, %v5280_v17  ;;  %v4214_v13 = vpop.f32.mrb[117].mxu0 }
 0x4be   :  { %4458 = vst.msk [vmem:[%s9981_s5 + $0x320] sm:$0xff] %vm629_vm0, %v4214_v13  ;;  %v5281_v54 = vpop.f32.mrb[118].mxu0 }
 0x4bf   :  { %4461 = vst.msk [vmem:[%s9981_s5 + $0x338] sm:$0xff] %vm629_vm0, %v5281_v54  ;;  %v4217_v59 = vpop.f32.mrb[119].mxu0 }
 0x4c0   :  { %4459 = vst.msk [vmem:[%s9981_s5 + $0x328] sm:$0xff] %vm629_vm0, %v4217_v59  ;;  %v5312_v49 = vpop.f32.mrb[116].mxu1 }
 0x4c1   :  { %4476 = vst.msk [vmem:[%s9981_s5 + $0x3b0] sm:$0xff] %vm629_vm0, %v5312_v49  ;;  %v4311_v37 = vpop.f32.mrb[117].mxu1 }
 0x4c2   :  { %4474 = vst.msk [vmem:[%s9981_s5 + $0x3a0] sm:$0xff] %vm629_vm0, %v4311_v37  ;;  %v5313_v58 = vpop.f32.mrb[118].mxu1 }
 0x4c3   :  { %4477 = vst.msk [vmem:[%s9981_s5 + $0x3b8] sm:$0xff] %vm629_vm0, %v5313_v58  ;;  %v4314_v45 = vpop.f32.mrb[119].mxu1 }
 0x4c4   :  { %4475 = vst.msk [vmem:[%s9981_s5 + $0x3a8] sm:$0xff] %vm629_vm0, %v4314_v45 }
 0x4cc   :  { %v5284_v63 = vpop.f32.mrb[120].mxu0 }
 0x4cd   :  { %4464 = vst.msk [vmem:[%s9981_s5 + $0x350] sm:$0xff] %vm629_vm0, %v5284_v63  ;;  %v4230_v46 = vpop.f32.mrb[121].mxu0 }
 0x4ce   :  { %4462 = vst.msk [vmem:[%s9981_s5 + $0x340] sm:$0xff] %vm629_vm0, %v4230_v46  ;;  %v5285_v36 = vpop.f32.mrb[122].mxu0 }
 0x4cf   :  { %4465 = vst.msk [vmem:[%s9981_s5 + $0x358] sm:$0xff] %vm629_vm0, %v5285_v36  ;;  %v4233_v57 = vpop.f32.mrb[123].mxu0 }
 0x4d0   :  { %4463 = vst.msk [vmem:[%s9981_s5 + $0x348] sm:$0xff] %vm629_vm0, %v4233_v57  ;;  %v5316_v56 = vpop.f32.mrb[120].mxu1 }
 0x4d1   :  { %4480 = vst.msk [vmem:[%s9981_s5 + $0x3d0] sm:$0xff] %vm629_vm0, %v5316_v56  ;;  %v4327_v39 = vpop.f32.mrb[121].mxu1 }
 0x4d2   :  { %4478 = vst.msk [vmem:[%s9981_s5 + $0x3c0] sm:$0xff] %vm629_vm0, %v4327_v39  ;;  %v5317_v61 = vpop.f32.mrb[122].mxu1 }
 0x4d3   :  { %4481 = vst.msk [vmem:[%s9981_s5 + $0x3d8] sm:$0xff] %vm629_vm0, %v5317_v61  ;;  %v4330_v51 = vpop.f32.mrb[123].mxu1 }
 0x4d4   :  { %4479 = vst.msk [vmem:[%s9981_s5 + $0x3c8] sm:$0xff] %vm629_vm0, %v4330_v51 }
 0x4d8   :  { %v5288_v53 = vpop.f32.mrb[124].mxu0 }
 0x4d9   :  { %4468 = vst.msk [vmem:[%s9981_s5 + $0x370] sm:$0xff] %vm629_vm0, %v5288_v53  ;;  %v4246_v60 = vpop.f32.mrb[125].mxu0 }
 0x4da   :  { %4466 = vst.msk [vmem:[%s9981_s5 + $0x360] sm:$0xff] %vm629_vm0, %v4246_v60  ;;  %v5289_v35 = vpop.f32.mrb[126].mxu0 }
 0x4db   :  { %4469 = vst.msk [vmem:[%s9981_s5 + $0x378] sm:$0xff] %vm629_vm0, %v5289_v35  ;;  %v4249_v8 = vpop.f32.mrb[127].mxu0 }
 0x4dc   :  { %4467 = vst.msk [vmem:[%s9981_s5 + $0x368] sm:$0xff] %vm629_vm0, %v4249_v8 }
 0x4df   :  { %v5320_v18 = vpop.f32.mrb[124].mxu1 }
 0x4e0   :  { %4484 = vst.msk [vmem:[%s9981_s5 + $0x3f0] sm:$0xff] %vm629_vm0, %v5320_v18  ;;  %v4343_v28 = vpop.f32.mrb[125].mxu1 }
 0x4e1   :  { %4482 = vst.msk [vmem:[%s9981_s5 + $0x3e0] sm:$0xff] %vm629_vm0, %v4343_v28  ;;  %v5321_v0 = vpop.f32.mrb[126].mxu1 }
 0x4e2   :  { %4485 = vst.msk [vmem:[%s9981_s5 + $0x3f8] sm:$0xff] %vm629_vm0, %v5321_v0  ;;  %v4346_v41 = vpop.f32.mrb[127].mxu1 }
 0x4e3   :  { %4483 = vst.msk [vmem:[%s9981_s5 + $0x3e8] sm:$0xff] %vm629_vm0, %v4346_v41 }

</bundles_post_ra>
